<compile_context>
chip_gen: v6e
topology: v6e:2x2x1
jax: 0.10.0
libtpu: 0.0.40
codegen_flags: <defaults>
</compile_context>

<pallas_src>
import functools

import jax
import jax.numpy as jnp
from jax import lax
from jax.experimental import pallas as pl
from jax.experimental.pallas import tpu as pltpu


# ---------------------------------------------------------------------------
# Kernel
# ---------------------------------------------------------------------------
def share_group_conv_kernel(w_ref, x_ref, o_ref, *, G, K, dilation, sub_bt):
    """One grid step convolves a (bt, G, Cout, Hp, Wp) input block.

    w_ref : (G*K*K,) f32 in SMEM  -- shared conv weight, scalar-prefetched
    x_ref : (bt, G, Cout, Hp, Wp) -- zero-padded, channel-grouped input block
    o_ref : (bt, Cout, Hv, Wv)    -- stride-1 "valid" conv output block
    """
    bt = x_ref.shape[0]
    Cout = x_ref.shape[2]
    Hv, Wv = o_ref.shape[-2], o_ref.shape[-1]
    n_sub = bt // sub_bt  # static; bt is a multiple of sub_bt by construction

    def body(s, carry):
        b0 = pl.multiple_of(s * sub_bt, sub_bt)
        acc = jnp.zeros((sub_bt, Cout, Hv, Wv), jnp.float32)
        for g in range(G):                      # static, small (Cin // Cout)
            for ki in range(K):
                hi = ki * dilation
                for kj in range(K):
                    wj = kj * dilation
                    tap = x_ref[pl.ds(b0, sub_bt), g, :, hi:hi + Hv, wj:wj + Wv]
                    w = w_ref[(g * K + ki) * K + kj]          # SMEM scalar
                    acc = acc + w * tap.astype(jnp.float32)
        o_ref[pl.ds(b0, sub_bt)] = acc.astype(o_ref.dtype)
        return carry

    lax.fori_loop(0, n_sub, body, 0, unroll=bool(n_sub <= 8))


# ---------------------------------------------------------------------------
# Tile sizing helpers (generation-aware, per the performance review)
# ---------------------------------------------------------------------------
def _vmem_budget_and_limit():
    cap = 64 * 1024 * 1024                      # conservative fallback (v7x-like)
    try:
        cap = int(pltpu.get_tpu_info().vmem_capacity_bytes)
    except Exception:
        pass
    budget = min(24 * 1024 * 1024, cap // 4)    # double-buffered in+out blocks
    limit = min(32 * 1024 * 1024, cap // 2)     # Mosaic scoped-VMEM limit
    return budget, limit


def _padded_plane_bytes(h, w, itemsize):
    """VMEM footprint of an (h, w) plane after (sublane, 128-lane) tiling."""
    sub = 8 * max(1, 4 // max(1, itemsize))     # f32: 8, bf16: 16, int8: 32
    hp = ((h + sub - 1) // sub) * sub
    wp = ((w + 127) // 128) * 128
    return hp * wp * itemsize


def _pick_batch_tile(B, in_img_vmem, out_img_vmem, acc_img_bytes, budget):
    per_img = in_img_vmem + out_img_vmem
    target = min(8 * 1024 * 1024, budget // 2)          # ~2-8 MiB per grid step
    cap_bt = max(1, budget // max(1, 2 * per_img))      # double-buffer fits VMEM
    bt = max(1, min(B, target // max(1, per_img), cap_bt))
    # Inner batch sub-chunk keeps the live f32 accumulator around <= 32 KiB.
    sub_bt = max(1, min(bt, (32 * 1024) // max(1, acc_img_bytes)))
    bt = max(sub_bt, (bt // sub_bt) * sub_bt)           # bt multiple of sub_bt
    return bt, sub_bt


# ---------------------------------------------------------------------------
# Public entry point (PyTorch NCHW layout in and out)
# ---------------------------------------------------------------------------
def share_group_conv(x, weight, *, out_channel, kernel_size,
                     stride=1, padding=0, dilation=1):
    """x: (B, Cin, H, W).  weight: (1, Cin//Cout, k, k) == oralconv.weight."""
    B, Cin, H, W = x.shape
    Cout, K = out_channel, kernel_size
    assert Cin % Cout == 0, "in_channel must be divisible by out_channel"
    G = Cin // Cout
    assert weight.shape == (1, G, K, K), weight.shape

    # Channel grouping (j, j+Cout, j+2*Cout, ...) == free reshape of NCHW.
    xr = x.reshape(B, G, Cout, H, W)
    # TODO(synk): spatial zero-pad done in the wrapper; fusing it into the
    # kernel would save one HBM pass.
    if padding:
        xr = jnp.pad(xr, ((0, 0), (0, 0), (0, 0),
                          (padding, padding), (padding, padding)))
    Hp, Wp = H + 2 * padding, W + 2 * padding
    Hv, Wv = Hp - dilation * (K - 1), Wp - dilation * (K - 1)
    assert Hv >= 1 and Wv >= 1, "kernel does not fit in the (padded) input"

    budget, vmem_limit = _vmem_budget_and_limit()
    isz = x.dtype.itemsize
    in_img = G * Cout * _padded_plane_bytes(Hp, Wp, isz)
    out_img = Cout * _padded_plane_bytes(Hv, Wv, isz)
    acc_img = Cout * _padded_plane_bytes(Hv, Wv, 4)
    bt, sub_bt = _pick_batch_tile(B, in_img, out_img, acc_img, budget)
    assert bt % sub_bt == 0

    # cdiv-style grid: zero-pad the batch to a multiple of bt (padded rows are
    # computed on zeros and sliced away below).
    B_pad = ((B + bt - 1) // bt) * bt
    if B_pad != B:
        xr = jnp.pad(xr, ((0, B_pad - B), (0, 0), (0, 0), (0, 0), (0, 0)))
    grid = (B_pad // bt,)

    w_flat = weight.reshape(-1).astype(jnp.float32)     # (G*K*K,) -> SMEM

    kernel = functools.partial(share_group_conv_kernel,
                               G=G, K=K, dilation=dilation, sub_bt=sub_bt)

    out_full = pl.pallas_call(
        kernel,
        out_shape=jax.ShapeDtypeStruct((B_pad, Cout, Hv, Wv), x.dtype),
        grid_spec=pltpu.PrefetchScalarGridSpec(
            num_scalar_prefetch=1,
            grid=grid,
            in_specs=[pl.BlockSpec((bt, G, Cout, Hp, Wp),
                                   lambda i, w: (i, 0, 0, 0, 0))],
            out_specs=pl.BlockSpec((bt, Cout, Hv, Wv),
                                   lambda i, w: (i, 0, 0, 0)),
        ),
        compiler_params=pltpu.CompilerParams(
            dimension_semantics=("parallel",),
            vmem_limit_bytes=int(vmem_limit),
        ),
    )(w_flat, xr)

    out = out_full[:B]
    if stride != 1:
        # TODO(synk): stride handled by subsampling the stride-1 valid output
        # in the wrapper (one cheap XLA strided slice), not in-kernel.
        out = out[:, :, ::stride, ::stride]
    return out


# ---------------------------------------------------------------------------
# Pure-JAX reference mirroring the PyTorch forward exactly
# ---------------------------------------------------------------------------
def share_group_conv_reference(x, weight, *, out_channel,
                               stride=1, padding=0, dilation=1):
    B, Cin, H, W = x.shape
    Cout = out_channel
    outs = []
    for j in range(Cout):
        term = x[:, j::Cout, :, :]                       # (B, G, H, W)
        o = lax.conv_general_dilated(
            term.astype(jnp.float32), weight.astype(jnp.float32),
            window_strides=(stride, stride),
            padding=[(padding, padding), (padding, padding)],
            rhs_dilation=(dilation, dilation),
            dimension_numbers=("NCHW", "OIHW", "NCHW"))
        outs.append(o)
    return jnp.concatenate(outs, axis=1).astype(x.dtype)


if __name__ == "__main__":
    key = jax.random.PRNGKey(0)

    def check(case, B, Cin, Cout, H, W, K, stride, padding, dilation):
        kx, kw = jax.random.split(jax.random.fold_in(key, case))
        x = jax.random.normal(kx, (B, Cin, H, W), jnp.float32)
        w = 0.5 * jax.random.normal(kw, (1, Cin // Cout, K, K), jnp.float32)
        out = share_group_conv(x, w, out_channel=Cout, kernel_size=K,
                               stride=stride, padding=padding, dilation=dilation)
        out = jax.block_until_ready(out)
        ref = share_group_conv_reference(x, w, out_channel=Cout, stride=stride,
                                         padding=padding, dilation=dilation)
        assert out.shape == ref.shape, (out.shape, ref.shape)
        err = float(jnp.max(jnp.abs(out - ref)))
        assert jnp.allclose(out, ref, rtol=1e-4, atol=1e-4), \
            f"case {case}: mismatch vs reference: {err}"

    # Main case: ShareGroupConv(12 -> 4, k=3, padding=1) on a 16x16 map.
    check(0, 2, 12, 4, 16, 16, 3, 1, 1, 1)
    # ENSELayer-style usages of the module:
    #   ShareGroupConv(3c -> c, k=3) on the 4x4 pooled map,
    #   ShareGroupConv(c -> c, k=3, padding=1, stride=3) on the 2x2 map.
    check(1, 2, 12, 4, 4, 4, 3, 1, 0, 1)
    check(2, 2, 4, 4, 2, 2, 3, 3, 1, 1)

    print("KERNEL_OK")
</pallas_src>

<mosaic_0001>
module attributes {stable_mosaic.version = 11 : i64} {
  func.func @share_group_conv_kernel(%arg0: i32, %arg1: memref<27xf32, #tpu.memory_space<smem>>, %arg2: memref<2x3x4x18x18xf32, #tpu.memory_space<vmem>>, %arg3: memref<2x4x16x16xf32, #tpu.memory_space<vmem>>) attributes {dimension_semantics = [#tpu.dimension_semantics<parallel>], iteration_bounds = array<i64: 1>, scalar_prefetch = 1 : i64, scratch_operands = 0 : i64, tpu.core_type = #tpu.core_type<tc>, window_params = [{transform_indices = @transform_0, window_bounds = array<i64: 2, 3, 4, 18, 18>}, {transform_indices = @transform_1, window_bounds = array<i64: 2, 4, 16, 16>}]} {
    %c0_i32 = arith.constant 0 : i32
    %c1_i32 = arith.constant 1 : i32
    %0 = arith.muli %c0_i32, %c1_i32 : i32
    %1 = tpu.assume_multiple %0, 1 : i32
    %cst = arith.constant 0.000000e+00 : f32
    %2 = vector.broadcast %cst : f32 to vector<1x4x16x16xf32>
    %3 = arith.index_cast %1 : i32 to index
    %c0 = arith.constant 0 : index
    %c0_0 = arith.constant 0 : index
    %c0_1 = arith.constant 0 : index
    %c0_2 = arith.constant 0 : index
    %4 = vector.load %arg2[%3, %c0, %c0_0, %c0_1, %c0_2] : memref<2x3x4x18x18xf32, #tpu.memory_space<vmem>>, vector<1x1x4x16x16xf32>
    %5 = vector.shape_cast %4 : vector<1x1x4x16x16xf32> to vector<1x4x16x16xf32>
    %c0_3 = arith.constant 0 : index
    %6 = memref.load %arg1[%c0_3] : memref<27xf32, #tpu.memory_space<smem>>
    %7 = vector.broadcast %6 : f32 to vector<1x4x16x16xf32>
    %8 = arith.mulf %7, %5 : vector<1x4x16x16xf32>
    %9 = arith.addf %2, %8 : vector<1x4x16x16xf32>
    %10 = arith.index_cast %1 : i32 to index
    %c0_4 = arith.constant 0 : index
    %c0_5 = arith.constant 0 : index
    %c0_6 = arith.constant 0 : index
    %c1 = arith.constant 1 : index
    %11 = vector.load %arg2[%10, %c0_4, %c0_5, %c0_6, %c1] : memref<2x3x4x18x18xf32, #tpu.memory_space<vmem>>, vector<1x1x4x16x16xf32>
    %12 = vector.shape_cast %11 : vector<1x1x4x16x16xf32> to vector<1x4x16x16xf32>
    %c1_7 = arith.constant 1 : index
    %13 = memref.load %arg1[%c1_7] : memref<27xf32, #tpu.memory_space<smem>>
    %14 = vector.broadcast %13 : f32 to vector<1x4x16x16xf32>
    %15 = arith.mulf %14, %12 : vector<1x4x16x16xf32>
    %16 = arith.addf %9, %15 : vector<1x4x16x16xf32>
    %17 = arith.index_cast %1 : i32 to index
    %c0_8 = arith.constant 0 : index
    %c0_9 = arith.constant 0 : index
    %c0_10 = arith.constant 0 : index
    %c2 = arith.constant 2 : index
    %18 = vector.load %arg2[%17, %c0_8, %c0_9, %c0_10, %c2] : memref<2x3x4x18x18xf32, #tpu.memory_space<vmem>>, vector<1x1x4x16x16xf32>
    %19 = vector.shape_cast %18 : vector<1x1x4x16x16xf32> to vector<1x4x16x16xf32>
    %c2_11 = arith.constant 2 : index
    %20 = memref.load %arg1[%c2_11] : memref<27xf32, #tpu.memory_space<smem>>
    %21 = vector.broadcast %20 : f32 to vector<1x4x16x16xf32>
    %22 = arith.mulf %21, %19 : vector<1x4x16x16xf32>
    %23 = arith.addf %16, %22 : vector<1x4x16x16xf32>
    %24 = arith.index_cast %1 : i32 to index
    %c0_12 = arith.constant 0 : index
    %c0_13 = arith.constant 0 : index
    %c1_14 = arith.constant 1 : index
    %c0_15 = arith.constant 0 : index
    %25 = vector.load %arg2[%24, %c0_12, %c0_13, %c1_14, %c0_15] : memref<2x3x4x18x18xf32, #tpu.memory_space<vmem>>, vector<1x1x4x16x16xf32>
    %26 = vector.shape_cast %25 : vector<1x1x4x16x16xf32> to vector<1x4x16x16xf32>
    %c3 = arith.constant 3 : index
    %27 = memref.load %arg1[%c3] : memref<27xf32, #tpu.memory_space<smem>>
    %28 = vector.broadcast %27 : f32 to vector<1x4x16x16xf32>
    %29 = arith.mulf %28, %26 : vector<1x4x16x16xf32>
    %30 = arith.addf %23, %29 : vector<1x4x16x16xf32>
    %31 = arith.index_cast %1 : i32 to index
    %c0_16 = arith.constant 0 : index
    %c0_17 = arith.constant 0 : index
    %c1_18 = arith.constant 1 : index
    %c1_19 = arith.constant 1 : index
    %32 = vector.load %arg2[%31, %c0_16, %c0_17, %c1_18, %c1_19] : memref<2x3x4x18x18xf32, #tpu.memory_space<vmem>>, vector<1x1x4x16x16xf32>
    %33 = vector.shape_cast %32 : vector<1x1x4x16x16xf32> to vector<1x4x16x16xf32>
    %c4 = arith.constant 4 : index
    %34 = memref.load %arg1[%c4] : memref<27xf32, #tpu.memory_space<smem>>
    %35 = vector.broadcast %34 : f32 to vector<1x4x16x16xf32>
    %36 = arith.mulf %35, %33 : vector<1x4x16x16xf32>
    %37 = arith.addf %30, %36 : vector<1x4x16x16xf32>
    %38 = arith.index_cast %1 : i32 to index
    %c0_20 = arith.constant 0 : index
    %c0_21 = arith.constant 0 : index
    %c1_22 = arith.constant 1 : index
    %c2_23 = arith.constant 2 : index
    %39 = vector.load %arg2[%38, %c0_20, %c0_21, %c1_22, %c2_23] : memref<2x3x4x18x18xf32, #tpu.memory_space<vmem>>, vector<1x1x4x16x16xf32>
    %40 = vector.shape_cast %39 : vector<1x1x4x16x16xf32> to vector<1x4x16x16xf32>
    %c5 = arith.constant 5 : index
    %41 = memref.load %arg1[%c5] : memref<27xf32, #tpu.memory_space<smem>>
    %42 = vector.broadcast %41 : f32 to vector<1x4x16x16xf32>
    %43 = arith.mulf %42, %40 : vector<1x4x16x16xf32>
    %44 = arith.addf %37, %43 : vector<1x4x16x16xf32>
    %45 = arith.index_cast %1 : i32 to index
    %c0_24 = arith.constant 0 : index
    %c0_25 = arith.constant 0 : index
    %c2_26 = arith.constant 2 : index
    %c0_27 = arith.constant 0 : index
    %46 = vector.load %arg2[%45, %c0_24, %c0_25, %c2_26, %c0_27] : memref<2x3x4x18x18xf32, #tpu.memory_space<vmem>>, vector<1x1x4x16x16xf32>
    %47 = vector.shape_cast %46 : vector<1x1x4x16x16xf32> to vector<1x4x16x16xf32>
    %c6 = arith.constant 6 : index
    %48 = memref.load %arg1[%c6] : memref<27xf32, #tpu.memory_space<smem>>
    %49 = vector.broadcast %48 : f32 to vector<1x4x16x16xf32>
    %50 = arith.mulf %49, %47 : vector<1x4x16x16xf32>
    %51 = arith.addf %44, %50 : vector<1x4x16x16xf32>
    %52 = arith.index_cast %1 : i32 to index
    %c0_28 = arith.constant 0 : index
    %c0_29 = arith.constant 0 : index
    %c2_30 = arith.constant 2 : index
    %c1_31 = arith.constant 1 : index
    %53 = vector.load %arg2[%52, %c0_28, %c0_29, %c2_30, %c1_31] : memref<2x3x4x18x18xf32, #tpu.memory_space<vmem>>, vector<1x1x4x16x16xf32>
    %54 = vector.shape_cast %53 : vector<1x1x4x16x16xf32> to vector<1x4x16x16xf32>
    %c7 = arith.constant 7 : index
    %55 = memref.load %arg1[%c7] : memref<27xf32, #tpu.memory_space<smem>>
    %56 = vector.broadcast %55 : f32 to vector<1x4x16x16xf32>
    %57 = arith.mulf %56, %54 : vector<1x4x16x16xf32>
    %58 = arith.addf %51, %57 : vector<1x4x16x16xf32>
    %59 = arith.index_cast %1 : i32 to index
    %c0_32 = arith.constant 0 : index
    %c0_33 = arith.constant 0 : index
    %c2_34 = arith.constant 2 : index
    %c2_35 = arith.constant 2 : index
    %60 = vector.load %arg2[%59, %c0_32, %c0_33, %c2_34, %c2_35] : memref<2x3x4x18x18xf32, #tpu.memory_space<vmem>>, vector<1x1x4x16x16xf32>
    %61 = vector.shape_cast %60 : vector<1x1x4x16x16xf32> to vector<1x4x16x16xf32>
    %c8 = arith.constant 8 : index
    %62 = memref.load %arg1[%c8] : memref<27xf32, #tpu.memory_space<smem>>
    %63 = vector.broadcast %62 : f32 to vector<1x4x16x16xf32>
    %64 = arith.mulf %63, %61 : vector<1x4x16x16xf32>
    %65 = arith.addf %58, %64 : vector<1x4x16x16xf32>
    %66 = arith.index_cast %1 : i32 to index
    %c1_36 = arith.constant 1 : index
    %c0_37 = arith.constant 0 : index
    %c0_38 = arith.constant 0 : index
    %c0_39 = arith.constant 0 : index
    %67 = vector.load %arg2[%66, %c1_36, %c0_37, %c0_38, %c0_39] : memref<2x3x4x18x18xf32, #tpu.memory_space<vmem>>, vector<1x1x4x16x16xf32>
    %68 = vector.shape_cast %67 : vector<1x1x4x16x16xf32> to vector<1x4x16x16xf32>
    %c9 = arith.constant 9 : index
    %69 = memref.load %arg1[%c9] : memref<27xf32, #tpu.memory_space<smem>>
    %70 = vector.broadcast %69 : f32 to vector<1x4x16x16xf32>
    %71 = arith.mulf %70, %68 : vector<1x4x16x16xf32>
    %72 = arith.addf %65, %71 : vector<1x4x16x16xf32>
    %73 = arith.index_cast %1 : i32 to index
    %c1_40 = arith.constant 1 : index
    %c0_41 = arith.constant 0 : index
    %c0_42 = arith.constant 0 : index
    %c1_43 = arith.constant 1 : index
    %74 = vector.load %arg2[%73, %c1_40, %c0_41, %c0_42, %c1_43] : memref<2x3x4x18x18xf32, #tpu.memory_space<vmem>>, vector<1x1x4x16x16xf32>
    %75 = vector.shape_cast %74 : vector<1x1x4x16x16xf32> to vector<1x4x16x16xf32>
    %c10 = arith.constant 10 : index
    %76 = memref.load %arg1[%c10] : memref<27xf32, #tpu.memory_space<smem>>
    %77 = vector.broadcast %76 : f32 to vector<1x4x16x16xf32>
    %78 = arith.mulf %77, %75 : vector<1x4x16x16xf32>
    %79 = arith.addf %72, %78 : vector<1x4x16x16xf32>
    %80 = arith.index_cast %1 : i32 to index
    %c1_44 = arith.constant 1 : index
    %c0_45 = arith.constant 0 : index
    %c0_46 = arith.constant 0 : index
    %c2_47 = arith.constant 2 : index
    %81 = vector.load %arg2[%80, %c1_44, %c0_45, %c0_46, %c2_47] : memref<2x3x4x18x18xf32, #tpu.memory_space<vmem>>, vector<1x1x4x16x16xf32>
    %82 = vector.shape_cast %81 : vector<1x1x4x16x16xf32> to vector<1x4x16x16xf32>
    %c11 = arith.constant 11 : index
    %83 = memref.load %arg1[%c11] : memref<27xf32, #tpu.memory_space<smem>>
    %84 = vector.broadcast %83 : f32 to vector<1x4x16x16xf32>
    %85 = arith.mulf %84, %82 : vector<1x4x16x16xf32>
    %86 = arith.addf %79, %85 : vector<1x4x16x16xf32>
    %87 = arith.index_cast %1 : i32 to index
    %c1_48 = arith.constant 1 : index
    %c0_49 = arith.constant 0 : index
    %c1_50 = arith.constant 1 : index
    %c0_51 = arith.constant 0 : index
    %88 = vector.load %arg2[%87, %c1_48, %c0_49, %c1_50, %c0_51] : memref<2x3x4x18x18xf32, #tpu.memory_space<vmem>>, vector<1x1x4x16x16xf32>
    %89 = vector.shape_cast %88 : vector<1x1x4x16x16xf32> to vector<1x4x16x16xf32>
    %c12 = arith.constant 12 : index
    %90 = memref.load %arg1[%c12] : memref<27xf32, #tpu.memory_space<smem>>
    %91 = vector.broadcast %90 : f32 to vector<1x4x16x16xf32>
    %92 = arith.mulf %91, %89 : vector<1x4x16x16xf32>
    %93 = arith.addf %86, %92 : vector<1x4x16x16xf32>
    %94 = arith.index_cast %1 : i32 to index
    %c1_52 = arith.constant 1 : index
    %c0_53 = arith.constant 0 : index
    %c1_54 = arith.constant 1 : index
    %c1_55 = arith.constant 1 : index
    %95 = vector.load %arg2[%94, %c1_52, %c0_53, %c1_54, %c1_55] : memref<2x3x4x18x18xf32, #tpu.memory_space<vmem>>, vector<1x1x4x16x16xf32>
    %96 = vector.shape_cast %95 : vector<1x1x4x16x16xf32> to vector<1x4x16x16xf32>
    %c13 = arith.constant 13 : index
    %97 = memref.load %arg1[%c13] : memref<27xf32, #tpu.memory_space<smem>>
    %98 = vector.broadcast %97 : f32 to vector<1x4x16x16xf32>
    %99 = arith.mulf %98, %96 : vector<1x4x16x16xf32>
    %100 = arith.addf %93, %99 : vector<1x4x16x16xf32>
    %101 = arith.index_cast %1 : i32 to index
    %c1_56 = arith.constant 1 : index
    %c0_57 = arith.constant 0 : index
    %c1_58 = arith.constant 1 : index
    %c2_59 = arith.constant 2 : index
    %102 = vector.load %arg2[%101, %c1_56, %c0_57, %c1_58, %c2_59] : memref<2x3x4x18x18xf32, #tpu.memory_space<vmem>>, vector<1x1x4x16x16xf32>
    %103 = vector.shape_cast %102 : vector<1x1x4x16x16xf32> to vector<1x4x16x16xf32>
    %c14 = arith.constant 14 : index
    %104 = memref.load %arg1[%c14] : memref<27xf32, #tpu.memory_space<smem>>
    %105 = vector.broadcast %104 : f32 to vector<1x4x16x16xf32>
    %106 = arith.mulf %105, %103 : vector<1x4x16x16xf32>
    %107 = arith.addf %100, %106 : vector<1x4x16x16xf32>
    %108 = arith.index_cast %1 : i32 to index
    %c1_60 = arith.constant 1 : index
    %c0_61 = arith.constant 0 : index
    %c2_62 = arith.constant 2 : index
    %c0_63 = arith.constant 0 : index
    %109 = vector.load %arg2[%108, %c1_60, %c0_61, %c2_62, %c0_63] : memref<2x3x4x18x18xf32, #tpu.memory_space<vmem>>, vector<1x1x4x16x16xf32>
    %110 = vector.shape_cast %109 : vector<1x1x4x16x16xf32> to vector<1x4x16x16xf32>
    %c15 = arith.constant 15 : index
    %111 = memref.load %arg1[%c15] : memref<27xf32, #tpu.memory_space<smem>>
    %112 = vector.broadcast %111 : f32 to vector<1x4x16x16xf32>
    %113 = arith.mulf %112, %110 : vector<1x4x16x16xf32>
    %114 = arith.addf %107, %113 : vector<1x4x16x16xf32>
    %115 = arith.index_cast %1 : i32 to index
    %c1_64 = arith.constant 1 : index
    %c0_65 = arith.constant 0 : index
    %c2_66 = arith.constant 2 : index
    %c1_67 = arith.constant 1 : index
    %116 = vector.load %arg2[%115, %c1_64, %c0_65, %c2_66, %c1_67] : memref<2x3x4x18x18xf32, #tpu.memory_space<vmem>>, vector<1x1x4x16x16xf32>
    %117 = vector.shape_cast %116 : vector<1x1x4x16x16xf32> to vector<1x4x16x16xf32>
    %c16 = arith.constant 16 : index
    %118 = memref.load %arg1[%c16] : memref<27xf32, #tpu.memory_space<smem>>
    %119 = vector.broadcast %118 : f32 to vector<1x4x16x16xf32>
    %120 = arith.mulf %119, %117 : vector<1x4x16x16xf32>
    %121 = arith.addf %114, %120 : vector<1x4x16x16xf32>
    %122 = arith.index_cast %1 : i32 to index
    %c1_68 = arith.constant 1 : index
    %c0_69 = arith.constant 0 : index
    %c2_70 = arith.constant 2 : index
    %c2_71 = arith.constant 2 : index
    %123 = vector.load %arg2[%122, %c1_68, %c0_69, %c2_70, %c2_71] : memref<2x3x4x18x18xf32, #tpu.memory_space<vmem>>, vector<1x1x4x16x16xf32>
    %124 = vector.shape_cast %123 : vector<1x1x4x16x16xf32> to vector<1x4x16x16xf32>
    %c17 = arith.constant 17 : index
    %125 = memref.load %arg1[%c17] : memref<27xf32, #tpu.memory_space<smem>>
    %126 = vector.broadcast %125 : f32 to vector<1x4x16x16xf32>
    %127 = arith.mulf %126, %124 : vector<1x4x16x16xf32>
    %128 = arith.addf %121, %127 : vector<1x4x16x16xf32>
    %129 = arith.index_cast %1 : i32 to index
    %c2_72 = arith.constant 2 : index
    %c0_73 = arith.constant 0 : index
    %c0_74 = arith.constant 0 : index
    %c0_75 = arith.constant 0 : index
    %130 = vector.load %arg2[%129, %c2_72, %c0_73, %c0_74, %c0_75] : memref<2x3x4x18x18xf32, #tpu.memory_space<vmem>>, vector<1x1x4x16x16xf32>
    %131 = vector.shape_cast %130 : vector<1x1x4x16x16xf32> to vector<1x4x16x16xf32>
    %c18 = arith.constant 18 : index
    %132 = memref.load %arg1[%c18] : memref<27xf32, #tpu.memory_space<smem>>
    %133 = vector.broadcast %132 : f32 to vector<1x4x16x16xf32>
    %134 = arith.mulf %133, %131 : vector<1x4x16x16xf32>
    %135 = arith.addf %128, %134 : vector<1x4x16x16xf32>
    %136 = arith.index_cast %1 : i32 to index
    %c2_76 = arith.constant 2 : index
    %c0_77 = arith.constant 0 : index
    %c0_78 = arith.constant 0 : index
    %c1_79 = arith.constant 1 : index
    %137 = vector.load %arg2[%136, %c2_76, %c0_77, %c0_78, %c1_79] : memref<2x3x4x18x18xf32, #tpu.memory_space<vmem>>, vector<1x1x4x16x16xf32>
    %138 = vector.shape_cast %137 : vector<1x1x4x16x16xf32> to vector<1x4x16x16xf32>
    %c19 = arith.constant 19 : index
    %139 = memref.load %arg1[%c19] : memref<27xf32, #tpu.memory_space<smem>>
    %140 = vector.broadcast %139 : f32 to vector<1x4x16x16xf32>
    %141 = arith.mulf %140, %138 : vector<1x4x16x16xf32>
    %142 = arith.addf %135, %141 : vector<1x4x16x16xf32>
    %143 = arith.index_cast %1 : i32 to index
    %c2_80 = arith.constant 2 : index
    %c0_81 = arith.constant 0 : index
    %c0_82 = arith.constant 0 : index
    %c2_83 = arith.constant 2 : index
    %144 = vector.load %arg2[%143, %c2_80, %c0_81, %c0_82, %c2_83] : memref<2x3x4x18x18xf32, #tpu.memory_space<vmem>>, vector<1x1x4x16x16xf32>
    %145 = vector.shape_cast %144 : vector<1x1x4x16x16xf32> to vector<1x4x16x16xf32>
    %c20 = arith.constant 20 : index
    %146 = memref.load %arg1[%c20] : memref<27xf32, #tpu.memory_space<smem>>
    %147 = vector.broadcast %146 : f32 to vector<1x4x16x16xf32>
    %148 = arith.mulf %147, %145 : vector<1x4x16x16xf32>
    %149 = arith.addf %142, %148 : vector<1x4x16x16xf32>
    %150 = arith.index_cast %1 : i32 to index
    %c2_84 = arith.constant 2 : index
    %c0_85 = arith.constant 0 : index
    %c1_86 = arith.constant 1 : index
    %c0_87 = arith.constant 0 : index
    %151 = vector.load %arg2[%150, %c2_84, %c0_85, %c1_86, %c0_87] : memref<2x3x4x18x18xf32, #tpu.memory_space<vmem>>, vector<1x1x4x16x16xf32>
    %152 = vector.shape_cast %151 : vector<1x1x4x16x16xf32> to vector<1x4x16x16xf32>
    %c21 = arith.constant 21 : index
    %153 = memref.load %arg1[%c21] : memref<27xf32, #tpu.memory_space<smem>>
    %154 = vector.broadcast %153 : f32 to vector<1x4x16x16xf32>
    %155 = arith.mulf %154, %152 : vector<1x4x16x16xf32>
    %156 = arith.addf %149, %155 : vector<1x4x16x16xf32>
    %157 = arith.index_cast %1 : i32 to index
    %c2_88 = arith.constant 2 : index
    %c0_89 = arith.constant 0 : index
    %c1_90 = arith.constant 1 : index
    %c1_91 = arith.constant 1 : index
    %158 = vector.load %arg2[%157, %c2_88, %c0_89, %c1_90, %c1_91] : memref<2x3x4x18x18xf32, #tpu.memory_space<vmem>>, vector<1x1x4x16x16xf32>
    %159 = vector.shape_cast %158 : vector<1x1x4x16x16xf32> to vector<1x4x16x16xf32>
    %c22 = arith.constant 22 : index
    %160 = memref.load %arg1[%c22] : memref<27xf32, #tpu.memory_space<smem>>
    %161 = vector.broadcast %160 : f32 to vector<1x4x16x16xf32>
    %162 = arith.mulf %161, %159 : vector<1x4x16x16xf32>
    %163 = arith.addf %156, %162 : vector<1x4x16x16xf32>
    %164 = arith.index_cast %1 : i32 to index
    %c2_92 = arith.constant 2 : index
    %c0_93 = arith.constant 0 : index
    %c1_94 = arith.constant 1 : index
    %c2_95 = arith.constant 2 : index
    %165 = vector.load %arg2[%164, %c2_92, %c0_93, %c1_94, %c2_95] : memref<2x3x4x18x18xf32, #tpu.memory_space<vmem>>, vector<1x1x4x16x16xf32>
    %166 = vector.shape_cast %165 : vector<1x1x4x16x16xf32> to vector<1x4x16x16xf32>
    %c23 = arith.constant 23 : index
    %167 = memref.load %arg1[%c23] : memref<27xf32, #tpu.memory_space<smem>>
    %168 = vector.broadcast %167 : f32 to vector<1x4x16x16xf32>
    %169 = arith.mulf %168, %166 : vector<1x4x16x16xf32>
    %170 = arith.addf %163, %169 : vector<1x4x16x16xf32>
    %171 = arith.index_cast %1 : i32 to index
    %c2_96 = arith.constant 2 : index
    %c0_97 = arith.constant 0 : index
    %c2_98 = arith.constant 2 : index
    %c0_99 = arith.constant 0 : index
    %172 = vector.load %arg2[%171, %c2_96, %c0_97, %c2_98, %c0_99] : memref<2x3x4x18x18xf32, #tpu.memory_space<vmem>>, vector<1x1x4x16x16xf32>
    %173 = vector.shape_cast %172 : vector<1x1x4x16x16xf32> to vector<1x4x16x16xf32>
    %c24 = arith.constant 24 : index
    %174 = memref.load %arg1[%c24] : memref<27xf32, #tpu.memory_space<smem>>
    %175 = vector.broadcast %174 : f32 to vector<1x4x16x16xf32>
    %176 = arith.mulf %175, %173 : vector<1x4x16x16xf32>
    %177 = arith.addf %170, %176 : vector<1x4x16x16xf32>
    %178 = arith.index_cast %1 : i32 to index
    %c2_100 = arith.constant 2 : index
    %c0_101 = arith.constant 0 : index
    %c2_102 = arith.constant 2 : index
    %c1_103 = arith.constant 1 : index
    %179 = vector.load %arg2[%178, %c2_100, %c0_101, %c2_102, %c1_103] : memref<2x3x4x18x18xf32, #tpu.memory_space<vmem>>, vector<1x1x4x16x16xf32>
    %180 = vector.shape_cast %179 : vector<1x1x4x16x16xf32> to vector<1x4x16x16xf32>
    %c25 = arith.constant 25 : index
    %181 = memref.load %arg1[%c25] : memref<27xf32, #tpu.memory_space<smem>>
    %182 = vector.broadcast %181 : f32 to vector<1x4x16x16xf32>
    %183 = arith.mulf %182, %180 : vector<1x4x16x16xf32>
    %184 = arith.addf %177, %183 : vector<1x4x16x16xf32>
    %185 = arith.index_cast %1 : i32 to index
    %c2_104 = arith.constant 2 : index
    %c0_105 = arith.constant 0 : index
    %c2_106 = arith.constant 2 : index
    %c2_107 = arith.constant 2 : index
    %186 = vector.load %arg2[%185, %c2_104, %c0_105, %c2_106, %c2_107] : memref<2x3x4x18x18xf32, #tpu.memory_space<vmem>>, vector<1x1x4x16x16xf32>
    %187 = vector.shape_cast %186 : vector<1x1x4x16x16xf32> to vector<1x4x16x16xf32>
    %c26 = arith.constant 26 : index
    %188 = memref.load %arg1[%c26] : memref<27xf32, #tpu.memory_space<smem>>
    %189 = vector.broadcast %188 : f32 to vector<1x4x16x16xf32>
    %190 = arith.mulf %189, %187 : vector<1x4x16x16xf32>
    %191 = arith.addf %184, %190 : vector<1x4x16x16xf32>
    %192 = arith.index_cast %1 : i32 to index
    %c0_108 = arith.constant 0 : index
    %c0_109 = arith.constant 0 : index
    %c0_110 = arith.constant 0 : index
    %193 = vector.load %arg3[%192, %c0_108, %c0_109, %c0_110] : memref<2x4x16x16xf32, #tpu.memory_space<vmem>>, vector<1x4x16x16xf32>
    tpu.vector_store %arg3[%192, %c0_108, %c0_109, %c0_110], %191 {strides = array<i32>} : memref<2x4x16x16xf32, #tpu.memory_space<vmem>>, vector<1x4x16x16xf32>,
    %c1_i32_111 = arith.constant 1 : i32
    %c1_i32_112 = arith.constant 1 : i32
    %194 = arith.muli %c1_i32_111, %c1_i32_112 : i32
    %195 = tpu.assume_multiple %194, 1 : i32
    %cst_113 = arith.constant 0.000000e+00 : f32
    %196 = vector.broadcast %cst_113 : f32 to vector<1x4x16x16xf32>
    %197 = arith.index_cast %195 : i32 to index
    %c0_114 = arith.constant 0 : index
    %c0_115 = arith.constant 0 : index
    %c0_116 = arith.constant 0 : index
    %c0_117 = arith.constant 0 : index
    %198 = vector.load %arg2[%197, %c0_114, %c0_115, %c0_116, %c0_117] : memref<2x3x4x18x18xf32, #tpu.memory_space<vmem>>, vector<1x1x4x16x16xf32>
    %199 = vector.shape_cast %198 : vector<1x1x4x16x16xf32> to vector<1x4x16x16xf32>
    %c0_118 = arith.constant 0 : index
    %200 = memref.load %arg1[%c0_118] : memref<27xf32, #tpu.memory_space<smem>>
    %201 = vector.broadcast %200 : f32 to vector<1x4x16x16xf32>
    %202 = arith.mulf %201, %199 : vector<1x4x16x16xf32>
    %203 = arith.addf %196, %202 : vector<1x4x16x16xf32>
    %204 = arith.index_cast %195 : i32 to index
    %c0_119 = arith.constant 0 : index
    %c0_120 = arith.constant 0 : index
    %c0_121 = arith.constant 0 : index
    %c1_122 = arith.constant 1 : index
    %205 = vector.load %arg2[%204, %c0_119, %c0_120, %c0_121, %c1_122] : memref<2x3x4x18x18xf32, #tpu.memory_space<vmem>>, vector<1x1x4x16x16xf32>
    %206 = vector.shape_cast %205 : vector<1x1x4x16x16xf32> to vector<1x4x16x16xf32>
    %c1_123 = arith.constant 1 : index
    %207 = memref.load %arg1[%c1_123] : memref<27xf32, #tpu.memory_space<smem>>
    %208 = vector.broadcast %207 : f32 to vector<1x4x16x16xf32>
    %209 = arith.mulf %208, %206 : vector<1x4x16x16xf32>
    %210 = arith.addf %203, %209 : vector<1x4x16x16xf32>
    %211 = arith.index_cast %195 : i32 to index
    %c0_124 = arith.constant 0 : index
    %c0_125 = arith.constant 0 : index
    %c0_126 = arith.constant 0 : index
    %c2_127 = arith.constant 2 : index
    %212 = vector.load %arg2[%211, %c0_124, %c0_125, %c0_126, %c2_127] : memref<2x3x4x18x18xf32, #tpu.memory_space<vmem>>, vector<1x1x4x16x16xf32>
    %213 = vector.shape_cast %212 : vector<1x1x4x16x16xf32> to vector<1x4x16x16xf32>
    %c2_128 = arith.constant 2 : index
    %214 = memref.load %arg1[%c2_128] : memref<27xf32, #tpu.memory_space<smem>>
    %215 = vector.broadcast %214 : f32 to vector<1x4x16x16xf32>
    %216 = arith.mulf %215, %213 : vector<1x4x16x16xf32>
    %217 = arith.addf %210, %216 : vector<1x4x16x16xf32>
    %218 = arith.index_cast %195 : i32 to index
    %c0_129 = arith.constant 0 : index
    %c0_130 = arith.constant 0 : index
    %c1_131 = arith.constant 1 : index
    %c0_132 = arith.constant 0 : index
    %219 = vector.load %arg2[%218, %c0_129, %c0_130, %c1_131, %c0_132] : memref<2x3x4x18x18xf32, #tpu.memory_space<vmem>>, vector<1x1x4x16x16xf32>
    %220 = vector.shape_cast %219 : vector<1x1x4x16x16xf32> to vector<1x4x16x16xf32>
    %c3_133 = arith.constant 3 : index
    %221 = memref.load %arg1[%c3_133] : memref<27xf32, #tpu.memory_space<smem>>
    %222 = vector.broadcast %221 : f32 to vector<1x4x16x16xf32>
    %223 = arith.mulf %222, %220 : vector<1x4x16x16xf32>
    %224 = arith.addf %217, %223 : vector<1x4x16x16xf32>
    %225 = arith.index_cast %195 : i32 to index
    %c0_134 = arith.constant 0 : index
    %c0_135 = arith.constant 0 : index
    %c1_136 = arith.constant 1 : index
    %c1_137 = arith.constant 1 : index
    %226 = vector.load %arg2[%225, %c0_134, %c0_135, %c1_136, %c1_137] : memref<2x3x4x18x18xf32, #tpu.memory_space<vmem>>, vector<1x1x4x16x16xf32>
    %227 = vector.shape_cast %226 : vector<1x1x4x16x16xf32> to vector<1x4x16x16xf32>
    %c4_138 = arith.constant 4 : index
    %228 = memref.load %arg1[%c4_138] : memref<27xf32, #tpu.memory_space<smem>>
    %229 = vector.broadcast %228 : f32 to vector<1x4x16x16xf32>
    %230 = arith.mulf %229, %227 : vector<1x4x16x16xf32>
    %231 = arith.addf %224, %230 : vector<1x4x16x16xf32>
    %232 = arith.index_cast %195 : i32 to index
    %c0_139 = arith.constant 0 : index
    %c0_140 = arith.constant 0 : index
    %c1_141 = arith.constant 1 : index
    %c2_142 = arith.constant 2 : index
    %233 = vector.load %arg2[%232, %c0_139, %c0_140, %c1_141, %c2_142] : memref<2x3x4x18x18xf32, #tpu.memory_space<vmem>>, vector<1x1x4x16x16xf32>
    %234 = vector.shape_cast %233 : vector<1x1x4x16x16xf32> to vector<1x4x16x16xf32>
    %c5_143 = arith.constant 5 : index
    %235 = memref.load %arg1[%c5_143] : memref<27xf32, #tpu.memory_space<smem>>
    %236 = vector.broadcast %235 : f32 to vector<1x4x16x16xf32>
    %237 = arith.mulf %236, %234 : vector<1x4x16x16xf32>
    %238 = arith.addf %231, %237 : vector<1x4x16x16xf32>
    %239 = arith.index_cast %195 : i32 to index
    %c0_144 = arith.constant 0 : index
    %c0_145 = arith.constant 0 : index
    %c2_146 = arith.constant 2 : index
    %c0_147 = arith.constant 0 : index
    %240 = vector.load %arg2[%239, %c0_144, %c0_145, %c2_146, %c0_147] : memref<2x3x4x18x18xf32, #tpu.memory_space<vmem>>, vector<1x1x4x16x16xf32>
    %241 = vector.shape_cast %240 : vector<1x1x4x16x16xf32> to vector<1x4x16x16xf32>
    %c6_148 = arith.constant 6 : index
    %242 = memref.load %arg1[%c6_148] : memref<27xf32, #tpu.memory_space<smem>>
    %243 = vector.broadcast %242 : f32 to vector<1x4x16x16xf32>
    %244 = arith.mulf %243, %241 : vector<1x4x16x16xf32>
    %245 = arith.addf %238, %244 : vector<1x4x16x16xf32>
    %246 = arith.index_cast %195 : i32 to index
    %c0_149 = arith.constant 0 : index
    %c0_150 = arith.constant 0 : index
    %c2_151 = arith.constant 2 : index
    %c1_152 = arith.constant 1 : index
    %247 = vector.load %arg2[%246, %c0_149, %c0_150, %c2_151, %c1_152] : memref<2x3x4x18x18xf32, #tpu.memory_space<vmem>>, vector<1x1x4x16x16xf32>
    %248 = vector.shape_cast %247 : vector<1x1x4x16x16xf32> to vector<1x4x16x16xf32>
    %c7_153 = arith.constant 7 : index
    %249 = memref.load %arg1[%c7_153] : memref<27xf32, #tpu.memory_space<smem>>
    %250 = vector.broadcast %249 : f32 to vector<1x4x16x16xf32>
    %251 = arith.mulf %250, %248 : vector<1x4x16x16xf32>
    %252 = arith.addf %245, %251 : vector<1x4x16x16xf32>
    %253 = arith.index_cast %195 : i32 to index
    %c0_154 = arith.constant 0 : index
    %c0_155 = arith.constant 0 : index
    %c2_156 = arith.constant 2 : index
    %c2_157 = arith.constant 2 : index
    %254 = vector.load %arg2[%253, %c0_154, %c0_155, %c2_156, %c2_157] : memref<2x3x4x18x18xf32, #tpu.memory_space<vmem>>, vector<1x1x4x16x16xf32>
    %255 = vector.shape_cast %254 : vector<1x1x4x16x16xf32> to vector<1x4x16x16xf32>
    %c8_158 = arith.constant 8 : index
    %256 = memref.load %arg1[%c8_158] : memref<27xf32, #tpu.memory_space<smem>>
    %257 = vector.broadcast %256 : f32 to vector<1x4x16x16xf32>
    %258 = arith.mulf %257, %255 : vector<1x4x16x16xf32>
    %259 = arith.addf %252, %258 : vector<1x4x16x16xf32>
    %260 = arith.index_cast %195 : i32 to index
    %c1_159 = arith.constant 1 : index
    %c0_160 = arith.constant 0 : index
    %c0_161 = arith.constant 0 : index
    %c0_162 = arith.constant 0 : index
    %261 = vector.load %arg2[%260, %c1_159, %c0_160, %c0_161, %c0_162] : memref<2x3x4x18x18xf32, #tpu.memory_space<vmem>>, vector<1x1x4x16x16xf32>
    %262 = vector.shape_cast %261 : vector<1x1x4x16x16xf32> to vector<1x4x16x16xf32>
    %c9_163 = arith.constant 9 : index
    %263 = memref.load %arg1[%c9_163] : memref<27xf32, #tpu.memory_space<smem>>
    %264 = vector.broadcast %263 : f32 to vector<1x4x16x16xf32>
    %265 = arith.mulf %264, %262 : vector<1x4x16x16xf32>
    %266 = arith.addf %259, %265 : vector<1x4x16x16xf32>
    %267 = arith.index_cast %195 : i32 to index
    %c1_164 = arith.constant 1 : index
    %c0_165 = arith.constant 0 : index
    %c0_166 = arith.constant 0 : index
    %c1_167 = arith.constant 1 : index
    %268 = vector.load %arg2[%267, %c1_164, %c0_165, %c0_166, %c1_167] : memref<2x3x4x18x18xf32, #tpu.memory_space<vmem>>, vector<1x1x4x16x16xf32>
    %269 = vector.shape_cast %268 : vector<1x1x4x16x16xf32> to vector<1x4x16x16xf32>
    %c10_168 = arith.constant 10 : index
    %270 = memref.load %arg1[%c10_168] : memref<27xf32, #tpu.memory_space<smem>>
    %271 = vector.broadcast %270 : f32 to vector<1x4x16x16xf32>
    %272 = arith.mulf %271, %269 : vector<1x4x16x16xf32>
    %273 = arith.addf %266, %272 : vector<1x4x16x16xf32>
    %274 = arith.index_cast %195 : i32 to index
    %c1_169 = arith.constant 1 : index
    %c0_170 = arith.constant 0 : index
    %c0_171 = arith.constant 0 : index
    %c2_172 = arith.constant 2 : index
    %275 = vector.load %arg2[%274, %c1_169, %c0_170, %c0_171, %c2_172] : memref<2x3x4x18x18xf32, #tpu.memory_space<vmem>>, vector<1x1x4x16x16xf32>
    %276 = vector.shape_cast %275 : vector<1x1x4x16x16xf32> to vector<1x4x16x16xf32>
    %c11_173 = arith.constant 11 : index
    %277 = memref.load %arg1[%c11_173] : memref<27xf32, #tpu.memory_space<smem>>
    %278 = vector.broadcast %277 : f32 to vector<1x4x16x16xf32>
    %279 = arith.mulf %278, %276 : vector<1x4x16x16xf32>
    %280 = arith.addf %273, %279 : vector<1x4x16x16xf32>
    %281 = arith.index_cast %195 : i32 to index
    %c1_174 = arith.constant 1 : index
    %c0_175 = arith.constant 0 : index
    %c1_176 = arith.constant 1 : index
    %c0_177 = arith.constant 0 : index
    %282 = vector.load %arg2[%281, %c1_174, %c0_175, %c1_176, %c0_177] : memref<2x3x4x18x18xf32, #tpu.memory_space<vmem>>, vector<1x1x4x16x16xf32>
    %283 = vector.shape_cast %282 : vector<1x1x4x16x16xf32> to vector<1x4x16x16xf32>
    %c12_178 = arith.constant 12 : index
    %284 = memref.load %arg1[%c12_178] : memref<27xf32, #tpu.memory_space<smem>>
    %285 = vector.broadcast %284 : f32 to vector<1x4x16x16xf32>
    %286 = arith.mulf %285, %283 : vector<1x4x16x16xf32>
    %287 = arith.addf %280, %286 : vector<1x4x16x16xf32>
    %288 = arith.index_cast %195 : i32 to index
    %c1_179 = arith.constant 1 : index
    %c0_180 = arith.constant 0 : index
    %c1_181 = arith.constant 1 : index
    %c1_182 = arith.constant 1 : index
    %289 = vector.load %arg2[%288, %c1_179, %c0_180, %c1_181, %c1_182] : memref<2x3x4x18x18xf32, #tpu.memory_space<vmem>>, vector<1x1x4x16x16xf32>
    %290 = vector.shape_cast %289 : vector<1x1x4x16x16xf32> to vector<1x4x16x16xf32>
    %c13_183 = arith.constant 13 : index
    %291 = memref.load %arg1[%c13_183] : memref<27xf32, #tpu.memory_space<smem>>
    %292 = vector.broadcast %291 : f32 to vector<1x4x16x16xf32>
    %293 = arith.mulf %292, %290 : vector<1x4x16x16xf32>
    %294 = arith.addf %287, %293 : vector<1x4x16x16xf32>
    %295 = arith.index_cast %195 : i32 to index
    %c1_184 = arith.constant 1 : index
    %c0_185 = arith.constant 0 : index
    %c1_186 = arith.constant 1 : index
    %c2_187 = arith.constant 2 : index
    %296 = vector.load %arg2[%295, %c1_184, %c0_185, %c1_186, %c2_187] : memref<2x3x4x18x18xf32, #tpu.memory_space<vmem>>, vector<1x1x4x16x16xf32>
    %297 = vector.shape_cast %296 : vector<1x1x4x16x16xf32> to vector<1x4x16x16xf32>
    %c14_188 = arith.constant 14 : index
    %298 = memref.load %arg1[%c14_188] : memref<27xf32, #tpu.memory_space<smem>>
    %299 = vector.broadcast %298 : f32 to vector<1x4x16x16xf32>
    %300 = arith.mulf %299, %297 : vector<1x4x16x16xf32>
    %301 = arith.addf %294, %300 : vector<1x4x16x16xf32>
    %302 = arith.index_cast %195 : i32 to index
    %c1_189 = arith.constant 1 : index
    %c0_190 = arith.constant 0 : index
    %c2_191 = arith.constant 2 : index
    %c0_192 = arith.constant 0 : index
    %303 = vector.load %arg2[%302, %c1_189, %c0_190, %c2_191, %c0_192] : memref<2x3x4x18x18xf32, #tpu.memory_space<vmem>>, vector<1x1x4x16x16xf32>
    %304 = vector.shape_cast %303 : vector<1x1x4x16x16xf32> to vector<1x4x16x16xf32>
    %c15_193 = arith.constant 15 : index
    %305 = memref.load %arg1[%c15_193] : memref<27xf32, #tpu.memory_space<smem>>
    %306 = vector.broadcast %305 : f32 to vector<1x4x16x16xf32>
    %307 = arith.mulf %306, %304 : vector<1x4x16x16xf32>
    %308 = arith.addf %301, %307 : vector<1x4x16x16xf32>
    %309 = arith.index_cast %195 : i32 to index
    %c1_194 = arith.constant 1 : index
    %c0_195 = arith.constant 0 : index
    %c2_196 = arith.constant 2 : index
    %c1_197 = arith.constant 1 : index
    %310 = vector.load %arg2[%309, %c1_194, %c0_195, %c2_196, %c1_197] : memref<2x3x4x18x18xf32, #tpu.memory_space<vmem>>, vector<1x1x4x16x16xf32>
    %311 = vector.shape_cast %310 : vector<1x1x4x16x16xf32> to vector<1x4x16x16xf32>
    %c16_198 = arith.constant 16 : index
    %312 = memref.load %arg1[%c16_198] : memref<27xf32, #tpu.memory_space<smem>>
    %313 = vector.broadcast %312 : f32 to vector<1x4x16x16xf32>
    %314 = arith.mulf %313, %311 : vector<1x4x16x16xf32>
    %315 = arith.addf %308, %314 : vector<1x4x16x16xf32>
    %316 = arith.index_cast %195 : i32 to index
    %c1_199 = arith.constant 1 : index
    %c0_200 = arith.constant 0 : index
    %c2_201 = arith.constant 2 : index
    %c2_202 = arith.constant 2 : index
    %317 = vector.load %arg2[%316, %c1_199, %c0_200, %c2_201, %c2_202] : memref<2x3x4x18x18xf32, #tpu.memory_space<vmem>>, vector<1x1x4x16x16xf32>
    %318 = vector.shape_cast %317 : vector<1x1x4x16x16xf32> to vector<1x4x16x16xf32>
    %c17_203 = arith.constant 17 : index
    %319 = memref.load %arg1[%c17_203] : memref<27xf32, #tpu.memory_space<smem>>
    %320 = vector.broadcast %319 : f32 to vector<1x4x16x16xf32>
    %321 = arith.mulf %320, %318 : vector<1x4x16x16xf32>
    %322 = arith.addf %315, %321 : vector<1x4x16x16xf32>
    %323 = arith.index_cast %195 : i32 to index
    %c2_204 = arith.constant 2 : index
    %c0_205 = arith.constant 0 : index
    %c0_206 = arith.constant 0 : index
    %c0_207 = arith.constant 0 : index
    %324 = vector.load %arg2[%323, %c2_204, %c0_205, %c0_206, %c0_207] : memref<2x3x4x18x18xf32, #tpu.memory_space<vmem>>, vector<1x1x4x16x16xf32>
    %325 = vector.shape_cast %324 : vector<1x1x4x16x16xf32> to vector<1x4x16x16xf32>
    %c18_208 = arith.constant 18 : index
    %326 = memref.load %arg1[%c18_208] : memref<27xf32, #tpu.memory_space<smem>>
    %327 = vector.broadcast %326 : f32 to vector<1x4x16x16xf32>
    %328 = arith.mulf %327, %325 : vector<1x4x16x16xf32>
    %329 = arith.addf %322, %328 : vector<1x4x16x16xf32>
    %330 = arith.index_cast %195 : i32 to index
    %c2_209 = arith.constant 2 : index
    %c0_210 = arith.constant 0 : index
    %c0_211 = arith.constant 0 : index
    %c1_212 = arith.constant 1 : index
    %331 = vector.load %arg2[%330, %c2_209, %c0_210, %c0_211, %c1_212] : memref<2x3x4x18x18xf32, #tpu.memory_space<vmem>>, vector<1x1x4x16x16xf32>
    %332 = vector.shape_cast %331 : vector<1x1x4x16x16xf32> to vector<1x4x16x16xf32>
    %c19_213 = arith.constant 19 : index
    %333 = memref.load %arg1[%c19_213] : memref<27xf32, #tpu.memory_space<smem>>
    %334 = vector.broadcast %333 : f32 to vector<1x4x16x16xf32>
    %335 = arith.mulf %334, %332 : vector<1x4x16x16xf32>
    %336 = arith.addf %329, %335 : vector<1x4x16x16xf32>
    %337 = arith.index_cast %195 : i32 to index
    %c2_214 = arith.constant 2 : index
    %c0_215 = arith.constant 0 : index
    %c0_216 = arith.constant 0 : index
    %c2_217 = arith.constant 2 : index
    %338 = vector.load %arg2[%337, %c2_214, %c0_215, %c0_216, %c2_217] : memref<2x3x4x18x18xf32, #tpu.memory_space<vmem>>, vector<1x1x4x16x16xf32>
    %339 = vector.shape_cast %338 : vector<1x1x4x16x16xf32> to vector<1x4x16x16xf32>
    %c20_218 = arith.constant 20 : index
    %340 = memref.load %arg1[%c20_218] : memref<27xf32, #tpu.memory_space<smem>>
    %341 = vector.broadcast %340 : f32 to vector<1x4x16x16xf32>
    %342 = arith.mulf %341, %339 : vector<1x4x16x16xf32>
    %343 = arith.addf %336, %342 : vector<1x4x16x16xf32>
    %344 = arith.index_cast %195 : i32 to index
    %c2_219 = arith.constant 2 : index
    %c0_220 = arith.constant 0 : index
    %c1_221 = arith.constant 1 : index
    %c0_222 = arith.constant 0 : index
    %345 = vector.load %arg2[%344, %c2_219, %c0_220, %c1_221, %c0_222] : memref<2x3x4x18x18xf32, #tpu.memory_space<vmem>>, vector<1x1x4x16x16xf32>
    %346 = vector.shape_cast %345 : vector<1x1x4x16x16xf32> to vector<1x4x16x16xf32>
    %c21_223 = arith.constant 21 : index
    %347 = memref.load %arg1[%c21_223] : memref<27xf32, #tpu.memory_space<smem>>
    %348 = vector.broadcast %347 : f32 to vector<1x4x16x16xf32>
    %349 = arith.mulf %348, %346 : vector<1x4x16x16xf32>
    %350 = arith.addf %343, %349 : vector<1x4x16x16xf32>
    %351 = arith.index_cast %195 : i32 to index
    %c2_224 = arith.constant 2 : index
    %c0_225 = arith.constant 0 : index
    %c1_226 = arith.constant 1 : index
    %c1_227 = arith.constant 1 : index
    %352 = vector.load %arg2[%351, %c2_224, %c0_225, %c1_226, %c1_227] : memref<2x3x4x18x18xf32, #tpu.memory_space<vmem>>, vector<1x1x4x16x16xf32>
    %353 = vector.shape_cast %352 : vector<1x1x4x16x16xf32> to vector<1x4x16x16xf32>
    %c22_228 = arith.constant 22 : index
    %354 = memref.load %arg1[%c22_228] : memref<27xf32, #tpu.memory_space<smem>>
    %355 = vector.broadcast %354 : f32 to vector<1x4x16x16xf32>
    %356 = arith.mulf %355, %353 : vector<1x4x16x16xf32>
    %357 = arith.addf %350, %356 : vector<1x4x16x16xf32>
    %358 = arith.index_cast %195 : i32 to index
    %c2_229 = arith.constant 2 : index
    %c0_230 = arith.constant 0 : index
    %c1_231 = arith.constant 1 : index
    %c2_232 = arith.constant 2 : index
    %359 = vector.load %arg2[%358, %c2_229, %c0_230, %c1_231, %c2_232] : memref<2x3x4x18x18xf32, #tpu.memory_space<vmem>>, vector<1x1x4x16x16xf32>
    %360 = vector.shape_cast %359 : vector<1x1x4x16x16xf32> to vector<1x4x16x16xf32>
    %c23_233 = arith.constant 23 : index
    %361 = memref.load %arg1[%c23_233] : memref<27xf32, #tpu.memory_space<smem>>
    %362 = vector.broadcast %361 : f32 to vector<1x4x16x16xf32>
    %363 = arith.mulf %362, %360 : vector<1x4x16x16xf32>
    %364 = arith.addf %357, %363 : vector<1x4x16x16xf32>
    %365 = arith.index_cast %195 : i32 to index
    %c2_234 = arith.constant 2 : index
    %c0_235 = arith.constant 0 : index
    %c2_236 = arith.constant 2 : index
    %c0_237 = arith.constant 0 : index
    %366 = vector.load %arg2[%365, %c2_234, %c0_235, %c2_236, %c0_237] : memref<2x3x4x18x18xf32, #tpu.memory_space<vmem>>, vector<1x1x4x16x16xf32>
    %367 = vector.shape_cast %366 : vector<1x1x4x16x16xf32> to vector<1x4x16x16xf32>
    %c24_238 = arith.constant 24 : index
    %368 = memref.load %arg1[%c24_238] : memref<27xf32, #tpu.memory_space<smem>>
    %369 = vector.broadcast %368 : f32 to vector<1x4x16x16xf32>
    %370 = arith.mulf %369, %367 : vector<1x4x16x16xf32>
    %371 = arith.addf %364, %370 : vector<1x4x16x16xf32>
    %372 = arith.index_cast %195 : i32 to index
    %c2_239 = arith.constant 2 : index
    %c0_240 = arith.constant 0 : index
    %c2_241 = arith.constant 2 : index
    %c1_242 = arith.constant 1 : index
    %373 = vector.load %arg2[%372, %c2_239, %c0_240, %c2_241, %c1_242] : memref<2x3x4x18x18xf32, #tpu.memory_space<vmem>>, vector<1x1x4x16x16xf32>
    %374 = vector.shape_cast %373 : vector<1x1x4x16x16xf32> to vector<1x4x16x16xf32>
    %c25_243 = arith.constant 25 : index
    %375 = memref.load %arg1[%c25_243] : memref<27xf32, #tpu.memory_space<smem>>
    %376 = vector.broadcast %375 : f32 to vector<1x4x16x16xf32>
    %377 = arith.mulf %376, %374 : vector<1x4x16x16xf32>
    %378 = arith.addf %371, %377 : vector<1x4x16x16xf32>
    %379 = arith.index_cast %195 : i32 to index
    %c2_244 = arith.constant 2 : index
    %c0_245 = arith.constant 0 : index
    %c2_246 = arith.constant 2 : index
    %c2_247 = arith.constant 2 : index
    %380 = vector.load %arg2[%379, %c2_244, %c0_245, %c2_246, %c2_247] : memref<2x3x4x18x18xf32, #tpu.memory_space<vmem>>, vector<1x1x4x16x16xf32>
    %381 = vector.shape_cast %380 : vector<1x1x4x16x16xf32> to vector<1x4x16x16xf32>
    %c26_248 = arith.constant 26 : index
    %382 = memref.load %arg1[%c26_248] : memref<27xf32, #tpu.memory_space<smem>>
    %383 = vector.broadcast %382 : f32 to vector<1x4x16x16xf32>
    %384 = arith.mulf %383, %381 : vector<1x4x16x16xf32>
    %385 = arith.addf %378, %384 : vector<1x4x16x16xf32>
    %386 = arith.index_cast %195 : i32 to index
    %c0_249 = arith.constant 0 : index
    %c0_250 = arith.constant 0 : index
    %c0_251 = arith.constant 0 : index
    %387 = vector.load %arg3[%386, %c0_249, %c0_250, %c0_251] : memref<2x4x16x16xf32, #tpu.memory_space<vmem>>, vector<1x4x16x16xf32>
    tpu.vector_store %arg3[%386, %c0_249, %c0_250, %c0_251], %385 {strides = array<i32>} : memref<2x4x16x16xf32, #tpu.memory_space<vmem>>, vector<1x4x16x16xf32>,
    %c2_i32 = arith.constant 2 : i32
    return
  }
  func.func @transform_0(%arg0: i32, %arg1: memref<27xf32, #tpu.memory_space<smem>>) -> (i32, i32, i32, i32, i32) {
    %c0_i32 = arith.constant 0 : i32
    %c0_i32_0 = arith.constant 0 : i32
    %c0_i32_1 = arith.constant 0 : i32
    %c0_i32_2 = arith.constant 0 : i32
    %c0_i32_3 = arith.constant 0 : i32
    return %arg0, %c0_i32, %c0_i32_0, %c0_i32_1, %c0_i32_2 : i32, i32, i32, i32, i32
  }
  func.func @transform_1(%arg0: i32, %arg1: memref<27xf32, #tpu.memory_space<smem>>) -> (i32, i32, i32, i32) {
    %c0_i32 = arith.constant 0 : i32
    %c0_i32_0 = arith.constant 0 : i32
    %c0_i32_1 = arith.constant 0 : i32
    %c0_i32_2 = arith.constant 0 : i32
    return %arg0, %c0_i32, %c0_i32_0, %c0_i32_1 : i32, i32, i32, i32
  }
}

</mosaic_0001>

<bundles_post_ra>
// kernel: tpu_custom_call.1
= control target key start
LH: loop header
LB: loop body
LE: loop exit
PB: predicated region body
PF: predicated region fallthrough
CT: control target
= control target key end

     0   :  { %s4827_s0 = inlined_call_operand.vmem [shape: f32[27], index: 0, kind: input, shape index: {}]   ;;  %s4828_s1 = inlined_call_operand.vmem [shape: f32[2,3,4,18,18], index: 1, kind: input, shape index: {}]   ;;  %s4829_s2 = inlined_call_operand.hbm [shape: f32[2,4,16,16], index: 2, kind: output, shape index: {}]  }
   0x1   :  { %s7_s11 = sshll.u32 %s4827_s0, 4  ;;  %s8_s11 = int_to_ptr.vmem [resolvable:$true] %s7_s11 }
   0x2   :  { %s2537_s12 = scalar_lea.vmem %s8_s11, 16  ;;  %p2542_p1 = scmp.lt.s32.totalorder %s8_s11, %s8_s11 }
   0x3   :  { %p2538_p0 = scmp.ne.s32.totalorder %s8_s11, %s2537_s12  ;;  %p2543_p2 = scmp.lt.s32.totalorder %s2537_s12, %s2537_s12 }
   0x5   :  { %p2544_p3 = por %p2543_p2, %p2542_p1 }
   0x7   :  { %p2545_p4 = pnand %p2544_p3, %p2538_p0 }
   0x9   :  { %2548 = shalt.err (!%p2545_p4)  }
   0xa   :  { %s2573_s13 = smov [#allocation3]  }
   0xb   :  { %10 = dma.vmem_to_smem %s8_s11, 16, %s2573_s13, [#allocation2] }
   0xc   :  { %2569 = dma.done.wait [#allocation2], 16 }
   0xd   :  { %2570 = vsyncadd [#allocation2], 4294967280 }
   0xe   :  { %12 = sfence }
   0xf   :  { %s2339_s14 = sld [smem:[#allocation3 + $0x1]]  ;;  %v2600_v0 = vld [vmem:[%s4828_s1 + $0x18] sm:$0xff]  ;;  %v2605_v1 = vld [vmem:[%s4828_s1] sm:$0xff]  ;;  %v2615_v4 = vld [vmem:[%s4828_s1 + $0x8] sm:$0xff]  ;;  %s2574_s22 = smov 127  }
  0x10   :  { %v2610_v3 = vld [vmem:[%s4828_s1 + $0x20] sm:$0xff]  ;;  %v2626_v9 = vld [vmem:[%s4828_s1 + $0x38] sm:$0xff]  ;;  %v2631_v10 = vld [vmem:[%s4828_s1 + $0x30] sm:$0xff]  ;;  %s2340_s27 = sld [smem:[#allocation3 + $0x2]] }
  0x15   :  { %v45_v2 = vstv %s2339_s14 }
  0x16   :  { %v48_v5 = vmul.f32 %v45_v2, %v2600_v0  ;;  %v46_v6 = vmul.f32 %v45_v2, %v2605_v1  ;;  %v49_v7 = vmul.f32 %v45_v2, %v2610_v3  ;;  %v47_v8 = vmul.f32 %v45_v2, %v2615_v4 }
  0x17   :  { %v51_v11 = vmul.f32 %v45_v2, %v2626_v9  ;;  %v50_v12 = vmul.f32 %v45_v2, %v2631_v10 }
  0x18   :  { %66 = vrot.lane.b32.xlu1 %v48_v5, %s2574_s22  ;;  %62 = vrot.lane.b32.xlu0 %v46_v6, %s2574_s22 }
  0x1c   :  { %68 = vrot.lane.b32.xlu1 %v49_v7, %s2574_s22  ;;  %64 = vrot.lane.b32.xlu0 %v47_v8, %s2574_s22 }
  0x1d   :  { %13 = vsyncpa [#allocation5], 0  ;;  %v2640_v13 = vld [vmem:[%s4828_s1 + $0x50] sm:$0xff]  ;;  %v2645_v14 = vld [vmem:[%s4828_s1 + $0x48] sm:$0xff]  ;;  %v95_v17 = vstv %s2340_s27  ;;  %s2575_s4 = smov 126   ;;  %s2342_s5 = sld [smem:[#allocation3 + $0x4]] }
  0x1e   :  { %v53_v15 = vmul.f32 %v45_v2, %v2640_v13  ;;  %v52_v16 = vmul.f32 %v45_v2, %v2645_v14  ;;  %v97_v18 = vmul.f32 %v95_v17, %v2615_v4  ;;  %v96_v19 = vmul.f32 %v95_v17, %v2605_v1  ;;  %v2670_v26 = vld [vmem:[%s4828_s1 + $0x9] sm:$0xff]  ;;  %v2675_v28 = vld [vmem:[%s4828_s1 + $0x1] sm:$0xff]  ;;  %v2689_v32 = vld [vmem:[%s4828_s1 + $0x19] sm:$0xff]  ;;  %s2343_s17 = sld [smem:[#allocation3 + $0x5]]  ;;  %s2576_s15 = smov [#allocation4]  }
  0x1f   :  { %v99_v20 = vmul.f32 %v95_v17, %v2610_v3  ;;  %v98_v21 = vmul.f32 %v95_v17, %v2600_v0  ;;  %v101_v22 = vmul.f32 %v95_v17, %v2626_v9  ;;  %v100_v23 = vmul.f32 %v95_v17, %v2631_v10  ;;  %v2684_v31 = vld [vmem:[%s4828_s1 + $0x21] sm:$0xff]  ;;  %v2698_v35 = vld [vmem:[%s4828_s1 + $0x39] sm:$0xff]  ;;  %v2703_v36 = vld [vmem:[%s4828_s1 + $0x31] sm:$0xff]  ;;  %s2345_s23 = sld [smem:[#allocation3 + $0x7]] }
  0x20   :  { %72 = vrot.lane.b32.xlu1 %v51_v11, %s2574_s22  ;;  %70 = vrot.lane.b32.xlu0 %v50_v12, %s2574_s22  ;;  %v103_v24 = vmul.f32 %v95_v17, %v2640_v13  ;;  %v102_v25 = vmul.f32 %v95_v17, %v2645_v14  ;;  %v2712_v39 = vld [vmem:[%s4828_s1 + $0x51] sm:$0xff]  ;;  %v2717_v40 = vld [vmem:[%s4828_s1 + $0x49] sm:$0xff]  ;;  %s2346_s9 = sld [smem:[#allocation3 + $0x8]]  ;;  %vm1158_vm0 = vcmask 130048  }
  0x21   :  { %v2742_v52 = vld [vmem:[%s4828_s1 + $0xa] sm:$0xff]  ;;  %v2747_v54 = vld [vmem:[%s4828_s1 + $0x2] sm:$0xff]  ;;  %v2761_v58 = vld [vmem:[%s4828_s1 + $0x1a] sm:$0xff]  ;;  %s2356_s14 = sld [smem:[#allocation3 + $0xa]] }
  0x22   :  { %v2756_v57 = vld [vmem:[%s4828_s1 + $0x22] sm:$0xff]  ;;  %v2770_v61 = vld [vmem:[%s4828_s1 + $0x3a] sm:$0xff]  ;;  %v2775_v62 = vld [vmem:[%s4828_s1 + $0x32] sm:$0xff]  ;;  %s2357_s27 = sld [smem:[#allocation3 + $0xb]] }
  0x23   :  { %v171_v27 = vstv %s2342_s5  ;;  %v2784_v5 = vld [vmem:[%s4828_s1 + $0x52] sm:$0xff]  ;;  %v2789_v6 = vld [vmem:[%s4828_s1 + $0x4a] sm:$0xff]  ;;  %s2367_s5 = sld [smem:[#allocation3 + $0xd]] }
  0x24   :  { %76 = vrot.lane.b32.xlu1 %v53_v15, %s2574_s22  ;;  %74 = vrot.lane.b32.xlu0 %v52_v16, %s2574_s22  ;;  %v173_v29 = vmul.f32 %v171_v27, %v2670_v26  ;;  %v172_v30 = vmul.f32 %v171_v27, %v2675_v28  ;;  %v175_v33 = vmul.f32 %v171_v27, %v2684_v31  ;;  %v221_v43 = vstv %s2343_s17  ;;  %s26_s6 = sld [smem:[#allocation3]] }
  0x25   :  { %v174_v34 = vmul.f32 %v171_v27, %v2689_v32  ;;  %v177_v37 = vmul.f32 %v171_v27, %v2698_v35  ;;  %v176_v38 = vmul.f32 %v171_v27, %v2703_v36  ;;  %v179_v41 = vmul.f32 %v171_v27, %v2712_v39  ;;  %s2341_s7 = sld [smem:[#allocation3 + $0x3]] }
  0x26   :  { %v178_v42 = vmul.f32 %v171_v27, %v2717_v40  ;;  %v223_v44 = vmul.f32 %v221_v43, %v2670_v26  ;;  %v222_v45 = vmul.f32 %v221_v43, %v2675_v28  ;;  %v225_v46 = vmul.f32 %v221_v43, %v2684_v31  ;;  %s2912_s17 = sld [smem:[#allocation3 + $0xe]] }
  0x27   :  { %v224_v47 = vmul.f32 %v221_v43, %v2689_v32  ;;  %v227_v48 = vmul.f32 %v221_v43, %v2698_v35  ;;  %v226_v49 = vmul.f32 %v221_v43, %v2703_v36  ;;  %v229_v50 = vmul.f32 %v221_v43, %v2712_v39  ;;  %s2378_s25 = sld [smem:[#allocation3 + $0x10]] }
  0x28   :  { %114 = vrot.lane.b32.xlu1 %v97_v18, %s2575_s4  ;;  %112 = vrot.lane.b32.xlu0 %v96_v19, %s2575_s4  ;;  %v228_v51 = vmul.f32 %v221_v43, %v2717_v40  ;;  %v297_v53 = vstv %s2345_s23  ;;  %v347_v11 = vstv %s2346_s9  ;;  %s2344_s26 = sld [smem:[#allocation3 + $0x6]] }
  0x29   :  { %v299_v55 = vmul.f32 %v297_v53, %v2742_v52  ;;  %v298_v56 = vmul.f32 %v297_v53, %v2747_v54  ;;  %v301_v59 = vmul.f32 %v297_v53, %v2756_v57  ;;  %v300_v60 = vmul.f32 %v297_v53, %v2761_v58  ;;  %v2354_v43 = vld [vmem:[%s4828_s1 + $0xb0] sm:$0xff]  ;;  %s2379_s10 = sld [smem:[#allocation3 + $0x11]] }
  0x2a   :  { %v303_v63 = vmul.f32 %v297_v53, %v2770_v61  ;;  %v302_v2 = vmul.f32 %v297_v53, %v2775_v62  ;;  %v305_v7 = vmul.f32 %v297_v53, %v2784_v5  ;;  %v304_v8 = vmul.f32 %v297_v53, %v2789_v6  ;;  %s2389_s0 = sld [smem:[#allocation3 + $0x13]] }
  0x2b   :  { %v349_v12 = vmul.f32 %v347_v11, %v2742_v52  ;;  %v348_v15 = vmul.f32 %v347_v11, %v2747_v54  ;;  %v351_v16 = vmul.f32 %v347_v11, %v2756_v57  ;;  %v350_v17 = vmul.f32 %v347_v11, %v2761_v58  ;;  %s2390_s29 = sld [smem:[#allocation3 + $0x14]] }
  0x2c   :  { %118 = vrot.lane.b32.xlu1 %v99_v20, %s2575_s4  ;;  %116 = vrot.lane.b32.xlu0 %v98_v21, %s2575_s4  ;;  %v353_v18 = vmul.f32 %v347_v11, %v2770_v61  ;;  %v352_v19 = vmul.f32 %v347_v11, %v2775_v62  ;;  %v355_v20 = vmul.f32 %v347_v11, %v2784_v5  ;;  %s2400_s9 = sld [smem:[#allocation3 + $0x16]] }
  0x2d   :  { %v354_v21 = vmul.f32 %v347_v11, %v2789_v6  ;;  %v551_v11 = vstv %s2367_s5  ;;  %s2401_s21 = sld [smem:[#allocation3 + $0x17]] }
  0x2e   :  { %s2412_s13 = sld [smem:[#allocation3 + $0x1a]] }
  0x2f   :  { %s2422_s3 = sld [smem:[#allocation3 + $0x2]] }
  0x30   :  { %122 = vrot.lane.b32.xlu1 %v101_v22, %s2575_s4  ;;  %120 = vrot.lane.b32.xlu0 %v100_v23, %s2575_s4  ;;  %v2814_v22 = vld [vmem:[%s4828_s1 + $0x68] sm:$0xff]  ;;  %v425_v23 = vstv %s2356_s14  ;;  %s2377_s28 = sld [smem:[#allocation3 + $0xf]] }
  0x31   :  { %s3554_s30 = sld [smem:[#allocation3 + $0x15]] }
  0x32   :  { %s2466_s8 = sld [smem:[#allocation3 + $0xe]] }
  0x33   :  { %s1177_s5 = sld [smem:[#allocation3]] }
  0x34   :  { %126 = vrot.lane.b32.xlu1 %v103_v24, %s2575_s4  ;;  %124 = vrot.lane.b32.xlu0 %v102_v25, %s2575_s4  ;;  %v2819_v24 = vld [vmem:[%s4828_s1 + $0x60] sm:$0xff]  ;;  %v427_v25 = vmul.f32 %v2814_v22, %v425_v23  ;;  %s4314_s11 = sld [smem:[#allocation3 + $0x6]] }
  0x35   :  { %v426_v27 = vmul.f32 %v2819_v24, %v425_v23  ;;  %s4342_s16 = sld [smem:[#allocation3 + $0x14]] }
  0x36   :  { %s2464_s18 = sld [smem:[#allocation3 + $0xc]] }
  0x37   :  { %s2509_s24 = sld [smem:[#allocation3 + $0x19]] }
  0x38   :  { %190 = vrot.lane.b32.xlu1 %v173_v29, %s2574_s22  ;;  %188 = vrot.lane.b32.xlu0 %v172_v30, %s2574_s22  ;;  %v2828_v29 = vld [vmem:[%s4828_s1 + $0x80] sm:$0xff]  ;;  %v2833_v30 = vld [vmem:[%s4828_s1 + $0x78] sm:$0xff] }
  0x3c   :  { %194 = vrot.lane.b32.xlu1 %v175_v33, %s2574_s22  ;;  %192 = vrot.lane.b32.xlu0 %v174_v34, %s2574_s22  ;;  %v429_v33 = vmul.f32 %v2828_v29, %v425_v23  ;;  %v428_v34 = vmul.f32 %v2833_v30, %v425_v23 }
  0x40   :  { %198 = vrot.lane.b32.xlu1 %v177_v37, %s2574_s22  ;;  %196 = vrot.lane.b32.xlu0 %v176_v38, %s2574_s22  ;;  %v2842_v37 = vld [vmem:[%s4828_s1 + $0x98] sm:$0xff]  ;;  %v2847_v38 = vld [vmem:[%s4828_s1 + $0x90] sm:$0xff] }
  0x44   :  { %202 = vrot.lane.b32.xlu1 %v179_v41, %s2574_s22  ;;  %200 = vrot.lane.b32.xlu0 %v178_v42, %s2574_s22  ;;  %v431_v41 = vmul.f32 %v2842_v37, %v425_v23  ;;  %v430_v42 = vmul.f32 %v2847_v38, %v425_v23 }
  0x48   :  { %240 = vrot.lane.b32.xlu1 %v223_v44, %s2575_s4  ;;  %238 = vrot.lane.b32.xlu0 %v222_v45, %s2575_s4  ;;  %v2353_v44 = vld [vmem:[%s4828_s1 + $0xa8] sm:$0xff]  ;;  %v433_v45 = vmul.f32 %v2354_v43, %v425_v23 }
  0x4c   :  { %244 = vrot.lane.b32.xlu1 %v225_v46, %s2575_s4  ;;  %242 = vrot.lane.b32.xlu0 %v224_v47, %s2575_s4  ;;  %v432_v46 = vmul.f32 %v2353_v44, %v425_v23  ;;  %v475_v47 = vstv %s2357_s27  ;;  %v2894_v23 = vld [vmem:[%s4828_s1 + $0x81] sm:$0xff]  ;;  %s2411_s27 = sld [smem:[#allocation3 + $0x19]] }
  0x50   :  { %248 = vrot.lane.b32.xlu1 %v227_v48, %s2575_s4  ;;  %246 = vrot.lane.b32.xlu0 %v226_v49, %s2575_s4  ;;  %v477_v48 = vmul.f32 %v2814_v22, %v475_v47  ;;  %v476_v49 = vmul.f32 %v2819_v24, %v475_v47 }
  0x54   :  { %252 = vrot.lane.b32.xlu1 %v229_v50, %s2575_s4  ;;  %250 = vrot.lane.b32.xlu0 %v228_v51, %s2575_s4  ;;  %v479_v50 = vmul.f32 %v2828_v29, %v475_v47  ;;  %v478_v51 = vmul.f32 %v2833_v30, %v475_v47 }
  0x58   :  { %316 = vrot.lane.b32.xlu1 %v299_v55, %s2574_s22  ;;  %314 = vrot.lane.b32.xlu0 %v298_v56, %s2574_s22  ;;  %v481_v56 = vmul.f32 %v2842_v37, %v475_v47 }
  0x5c   :  { %320 = vrot.lane.b32.xlu1 %v301_v59, %s2574_s22  ;;  %318 = vrot.lane.b32.xlu0 %v300_v60, %s2574_s22  ;;  %v480_v59 = vmul.f32 %v2847_v38, %v475_v47 }
  0x60   :  { %324 = vrot.lane.b32.xlu1 %v303_v63, %s2574_s22  ;;  %322 = vrot.lane.b32.xlu0 %v302_v2, %s2574_s22  ;;  %v483_v2 = vmul.f32 %v2354_v43, %v475_v47  ;;  %v2910_v43 = vld [vmem:[%s4828_s1 + $0x99] sm:$0xff] }
  0x64   :  { %328 = vrot.lane.b32.xlu1 %v305_v7, %s2574_s22  ;;  %326 = vrot.lane.b32.xlu0 %v304_v8, %s2574_s22  ;;  %v482_v7 = vmul.f32 %v2353_v44, %v475_v47  ;;  %v2878_v8 = vld [vmem:[%s4828_s1 + $0x69] sm:$0xff] }
  0x68   :  { %366 = vrot.lane.b32.xlu1 %v349_v12, %s2575_s4  ;;  %364 = vrot.lane.b32.xlu0 %v348_v15, %s2575_s4  ;;  %v2883_v12 = vld [vmem:[%s4828_s1 + $0x61] sm:$0xff]  ;;  %v27_v15 = vstv %s26_s6  ;;  %s4376_s6 = sld [smem:[#allocation3 + $0x9]] }
  0x69   :  { %v33_v47 = vmul.f32 %v27_v15, %v2626_v9 }
  0x6c   :  { %370 = vrot.lane.b32.xlu1 %v351_v16, %s2575_s4  ;;  %368 = vrot.lane.b32.xlu0 %v350_v17, %s2575_s4 }
  0x70   :  { %374 = vrot.lane.b32.xlu1 %v353_v18, %s2575_s4  ;;  %372 = vrot.lane.b32.xlu0 %v352_v19, %s2575_s4  ;;  %v553_v18 = vmul.f32 %v2878_v8, %v551_v11  ;;  %v552_v19 = vmul.f32 %v2883_v12, %v551_v11 }
  0x74   :  { %378 = vrot.lane.b32.xlu1 %v355_v20, %s2575_s4  ;;  %376 = vrot.lane.b32.xlu0 %v354_v21, %s2575_s4  ;;  %v28_v20 = vmul.f32 %v27_v15, %v2605_v1  ;;  %v29_v21 = vmul.f32 %v27_v15, %v2615_v4  ;;  %v555_v1 = vmul.f32 %v2894_v23, %v551_v11 }
  0x78   :  { %444 = vrot.lane.b32.xlu1 %v427_v25, %s2574_s22  ;;  %442 = vrot.lane.b32.xlu0 %v426_v27, %s2574_s22  ;;  %v2899_v25 = vld [vmem:[%s4828_s1 + $0x79] sm:$0xff] }
  0x79   :  { %v554_v4 = vmul.f32 %v2899_v25, %v551_v11 }
  0x7c   :  { %448 = vrot.lane.b32.xlu1 %v429_v33, %s2574_s22  ;;  %446 = vrot.lane.b32.xlu0 %v428_v34, %s2574_s22  ;;  %v153_v34 = vstv %s2341_s7 }
  0x7d   :  { %v157_v9 = vmul.f32 %v153_v34, %v2684_v31  ;;  %v34_v31 = vmul.f32 %v27_v15, %v2645_v14 }
  0x80   :  { %452 = vrot.lane.b32.xlu1 %v431_v41, %s2574_s22  ;;  %450 = vrot.lane.b32.xlu0 %v430_v42, %s2574_s22  ;;  %v30_v41 = vmul.f32 %v27_v15, %v2600_v0  ;;  %v31_v42 = vmul.f32 %v27_v15, %v2610_v3  ;;  %v2917_v0 = vld [vmem:[%s4828_s1 + $0x91] sm:$0xff]  ;;  %v155_v3 = vmul.f32 %v153_v34, %v2670_v26 }
  0x81   :  { %v2930_v26 = vld [vmem:[%s4828_s1 + $0xb1] sm:$0xff] }
  0x84   :  { %456 = vrot.lane.b32.xlu1 %v433_v45, %s2574_s22  ;;  %454 = vrot.lane.b32.xlu0 %v432_v46, %s2574_s22  ;;  %v154_v46 = vmul.f32 %v153_v34, %v2675_v28  ;;  %v156_v28 = vmul.f32 %v153_v34, %v2689_v32 }
  0x88   :  { %494 = vrot.lane.b32.xlu1 %v477_v48, %s2575_s4  ;;  %492 = vrot.lane.b32.xlu0 %v476_v49, %s2575_s4 }
  0x8a   :  { %v67_v53 = vpop.permute.xlu1 %66  ;;  %v63_v55 = vpop.permute.xlu0 %62 }
  0x8b   :  { %v86_v44 = vadd.f32 %v63_v55, %v28_v20  ;;  %v557_v55 = vmul.f32 %v2910_v43, %v551_v11 }
  0x8c   :  { %498 = vrot.lane.b32.xlu1 %v479_v50, %s2575_s4  ;;  %496 = vrot.lane.b32.xlu0 %v478_v51, %s2575_s4  ;;  %v32_v50 = vmul.f32 %v27_v15, %v2631_v10  ;;  %v88_v10 = vadd.f32 %v67_v53, %v30_v41  ;;  %v559_v53 = vmul.f32 %v2930_v26, %v551_v11  ;;  %v601_v41 = vstv %s2912_s17  ;;  %s2355_s17 = sld [smem:[#allocation3 + $0x9]] }
  0x8e   :  { %v69_v60 = vpop.permute.xlu1 %68  ;;  %v65_v63 = vpop.permute.xlu0 %64 }
  0x8f   :  { %v87_v45 = vadd.f32 %v65_v63, %v29_v21  ;;  %v89_v63 = vadd.f32 %v69_v60, %v31_v42  ;;  %v159_v42 = vmul.f32 %v153_v34, %v2698_v35  ;;  %v602_v35 = vmul.f32 %v2883_v12, %v601_v41 }
  0x90   :  { %502 = vrot.lane.b32.xlu1 %v481_v56, %s2575_s4  ;;  %500 = vrot.lane.b32.xlu0 %v480_v59, %s2575_s4  ;;  %v556_v59 = vmul.f32 %v2917_v0, %v551_v11  ;;  %v605_v12 = vmul.f32 %v2894_v23, %v601_v41 }
  0x92   :  { %v73_v16 = vpop.permute.xlu1 %72  ;;  %v71_v17 = vpop.permute.xlu0 %70 }
  0x94   :  { %506 = vrot.lane.b32.xlu1 %v483_v2, %s2575_s4  ;;  %504 = vrot.lane.b32.xlu0 %v482_v7, %s2575_s4  ;;  %v2937_v2 = vld [vmem:[%s4828_s1 + $0xa9] sm:$0xff] }
  0x95   :  { %v558_v60 = vmul.f32 %v2937_v2, %v551_v11  ;;  %v160_v11 = vmul.f32 %v153_v34, %v2717_v40 }
  0x96   :  { %v77_v27 = vpop.permute.xlu1 %76  ;;  %v75_v33 = vpop.permute.xlu0 %74 }
  0x98   :  { %570 = vrot.lane.b32.xlu1 %v553_v18, %s2574_s22  ;;  %568 = vrot.lane.b32.xlu0 %v552_v19, %s2574_s22  ;;  %v35_v19 = vmul.f32 %v27_v15, %v2640_v13  ;;  %v91_v13 = vadd.f32 %v73_v16, %v33_v47 }
  0x9a   :  { %v115_v48 = vpop.permute.xlu1 %114  ;;  %v113_v49 = vpop.permute.xlu0 %112  ;;  %v93_v16 = vadd.f32 %v77_v27, %v35_v19  ;;  %v608_v19 = vmul.f32 %v2937_v2, %v601_v41 }
  0x9b   :  { %v137_v51 = vadd.f32 %v115_v48, %v87_v45  ;;  %v136_v56 = vadd.f32 %v113_v49, %v86_v44  ;;  %v90_v44 = vadd.f32 %v71_v17, %v32_v50  ;;  %v603_v49 = vmul.f32 %v2878_v8, %v601_v41 }
  0x9c   :  { %574 = vrot.lane.b32.xlu1 %v555_v1, %s2574_s22  ;;  %572 = vrot.lane.b32.xlu0 %v554_v4, %s2574_s22  ;;  %v158_v4 = vmul.f32 %v153_v34, %v2703_v36  ;;  %v161_v36 = vmul.f32 %v153_v34, %v2712_v39  ;;  %v92_v17 = vadd.f32 %v75_v33, %v34_v31  ;;  %v2990_v31 = vld [vmem:[%s4828_s1 + $0x62] sm:$0xff] }
  0x9d   :  { %v2939_v7 = vadd.f32 %v155_v3, %v137_v51  ;;  %v2941_v18 = vadd.f32 %v154_v46, %v136_v56  ;;  %v604_v39 = vmul.f32 %v2899_v25, %v601_v41  ;;  %v607_v34 = vmul.f32 %v2910_v43, %v601_v41 }
  0x9e   :  { %v119_v20 = vpop.permute.xlu1 %118  ;;  %v117_v21 = vpop.permute.xlu0 %116 }
  0x9f   :  { %v139_v1 = vadd.f32 %v119_v20, %v89_v63  ;;  %v138_v32 = vadd.f32 %v117_v21, %v88_v10  ;;  %v609_v63 = vmul.f32 %v2930_v26, %v601_v41  ;;  %v2985_v20 = vld [vmem:[%s4828_s1 + $0x6a] sm:$0xff]  ;;  %v677_v21 = vstv %s2378_s25 }
  0xa0   :  { %578 = vrot.lane.b32.xlu1 %v557_v55, %s2574_s22  ;;  %576 = vrot.lane.b32.xlu0 %v556_v59, %s2574_s22 }
  0xa1   :  { %v2952_v45 = vadd.f32 %v157_v9, %v139_v1  ;;  %v2954_v14 = vadd.f32 %v156_v28, %v138_v32  ;;  %v606_v9 = vmul.f32 %v2917_v0, %v601_v41  ;;  %v2999_v41 = vld [vmem:[%s4828_s1 + $0x82] sm:$0xff] }
  0xa2   :  { %v123_v15 = vpop.permute.xlu1 %122  ;;  %v121_v3 = vpop.permute.xlu0 %120 }
  0xa3   :  { %v141_v46 = vadd.f32 %v123_v15, %v91_v13  ;;  %v140_v48 = vadd.f32 %v121_v3, %v90_v44  ;;  %v279_v44 = vstv %s2344_s26  ;;  %v681_v15 = vmul.f32 %v2999_v41, %v677_v21  ;;  %s2477_s26 = sld [smem:[#allocation3 + $0x11]] }
  0xa4   :  { %582 = vrot.lane.b32.xlu1 %v559_v53, %s2574_s22  ;;  %580 = vrot.lane.b32.xlu0 %v558_v60, %s2574_s22  ;;  %v679_v53 = vmul.f32 %v2985_v20, %v677_v21  ;;  %v678_v60 = vmul.f32 %v2990_v31, %v677_v21 }
  0xa5   :  { %v2962_v47 = vadd.f32 %v159_v42, %v141_v46  ;;  %v2964_v50 = vadd.f32 %v158_v4, %v140_v48  ;;  %v3004_v42 = vld [vmem:[%s4828_s1 + $0x7a] sm:$0xff] }
  0xa6   :  { %v127_v51 = vpop.permute.xlu1 %126  ;;  %v125_v56 = vpop.permute.xlu0 %124  ;;  %v680_v3 = vmul.f32 %v3004_v42, %v677_v21  ;;  %v3013_v46 = vld [vmem:[%s4828_s1 + $0x9a] sm:$0xff] }
  0xa7   :  { %v143_v55 = vadd.f32 %v127_v51, %v93_v16  ;;  %v142_v8 = vadd.f32 %v125_v56, %v92_v17 }
  0xa8   :  { %620 = vrot.lane.b32.xlu1 %v603_v49, %s2575_s4  ;;  %618 = vrot.lane.b32.xlu0 %v602_v35, %s2575_s4  ;;  %v3020_v35 = vld [vmem:[%s4828_s1 + $0x92] sm:$0xff] }
  0xa9   :  { %v2970_v59 = vadd.f32 %v161_v36, %v143_v55  ;;  %v2972_v40 = vadd.f32 %v160_v11, %v142_v8  ;;  %v281_v36 = vmul.f32 %v279_v44, %v2742_v52  ;;  %v280_v11 = vmul.f32 %v279_v44, %v2747_v54 }
  0xaa   :  { %v191_v27 = vpop.permute.xlu1 %190  ;;  %v189_v33 = vpop.permute.xlu0 %188  ;;  %v683_v55 = vmul.f32 %v3013_v46, %v677_v21  ;;  %v283_v52 = vmul.f32 %v279_v44, %v2756_v57  ;;  %v282_v54 = vmul.f32 %v279_v44, %v2761_v58 }
  0xab   :  { %v213_v48 = vadd.f32 %v191_v27, %v2939_v7  ;;  %v212_v49 = vadd.f32 %v189_v33, %v2941_v18  ;;  %v682_v7 = vmul.f32 %v3020_v35, %v677_v21  ;;  %v3031_v18 = vld [vmem:[%s4828_s1 + $0xb2] sm:$0xff] }
  0xac   :  { %624 = vrot.lane.b32.xlu1 %v605_v12, %s2575_s4  ;;  %622 = vrot.lane.b32.xlu0 %v604_v39, %s2575_s4  ;;  %v3040_v39 = vld [vmem:[%s4828_s1 + $0xaa] sm:$0xff]  ;;  %v685_v57 = vmul.f32 %v3031_v18, %v677_v21 }
  0xad   :  { %v684_v58 = vmul.f32 %v3040_v39, %v677_v21 }
  0xae   :  { %v195_v28 = vpop.permute.xlu1 %194  ;;  %v193_v10 = vpop.permute.xlu0 %192 }
  0xaf   :  { %v215_v8 = vadd.f32 %v195_v28, %v2952_v45  ;;  %v214_v12 = vadd.f32 %v193_v10, %v2954_v14  ;;  %v727_v45 = vstv %s2379_s10  ;;  %v285_v14 = vmul.f32 %v279_v44, %v2770_v61  ;;  %s3573_s10 = sld [smem:[#allocation3 + $0x7]] }
  0xb0   :  { %628 = vrot.lane.b32.xlu1 %v607_v34, %s2575_s4  ;;  %626 = vrot.lane.b32.xlu0 %v606_v9, %s2575_s4  ;;  %v284_v28 = vmul.f32 %v279_v44, %v2775_v62  ;;  %v728_v61 = vmul.f32 %v2990_v31, %v727_v45  ;;  %v287_v62 = vmul.f32 %v279_v44, %v2784_v5 }
  0xb1   :  { %v731_v5 = vmul.f32 %v2999_v41, %v727_v45 }
  0xb2   :  { %v199_v1 = vpop.permute.xlu1 %198  ;;  %v197_v32 = vpop.permute.xlu0 %196 }
  0xb3   :  { %v217_v10 = vadd.f32 %v199_v1, %v2962_v47  ;;  %v286_v47 = vmul.f32 %v279_v44, %v2789_v6  ;;  %v730_v6 = vmul.f32 %v3004_v42, %v727_v45 }
  0xb4   :  { %632 = vrot.lane.b32.xlu1 %v609_v63, %s2575_s4  ;;  %630 = vrot.lane.b32.xlu0 %v608_v19, %s2575_s4 }
  0xb6   :  { %v203_v4 = vpop.permute.xlu1 %202  ;;  %v201_v13 = vpop.permute.xlu0 %200 }
  0xb7   :  { %v218_v21 = vadd.f32 %v201_v13, %v2972_v40  ;;  %v733_v13 = vmul.f32 %v3013_v46, %v727_v45 }
  0xb8   :  { %696 = vrot.lane.b32.xlu1 %v679_v53, %s2574_s22  ;;  %694 = vrot.lane.b32.xlu0 %v678_v60, %s2574_s22  ;;  %v216_v53 = vadd.f32 %v197_v32, %v2964_v50  ;;  %v219_v50 = vadd.f32 %v203_v4, %v2970_v59 }
  0xba   :  { %v241_v16 = vpop.permute.xlu1 %240  ;;  %v239_v17 = vpop.permute.xlu0 %238 }
  0xbb   :  { %v263_v51 = vadd.f32 %v241_v16, %v213_v48  ;;  %v262_v56 = vadd.f32 %v239_v17, %v212_v49 }
  0xbc   :  { %700 = vrot.lane.b32.xlu1 %v681_v15, %s2574_s22  ;;  %698 = vrot.lane.b32.xlu0 %v680_v3, %s2574_s22 }
  0xbd   :  { %v3042_v27 = vadd.f32 %v281_v36, %v263_v51  ;;  %v3044_v33 = vadd.f32 %v280_v11, %v262_v56  ;;  %v729_v11 = vmul.f32 %v2985_v20, %v727_v45 }
  0xbe   :  { %v245_v34 = vpop.permute.xlu1 %244  ;;  %v243_v9 = vpop.permute.xlu0 %242 }
  0xbf   :  { %v265_v63 = vadd.f32 %v245_v34, %v215_v8  ;;  %v264_v19 = vadd.f32 %v243_v9, %v214_v12  ;;  %v734_v8 = vmul.f32 %v3040_v39, %v727_v45  ;;  %v3089_v12 = vld [vmem:[%s4828_s1 + $0xc8] sm:$0xff]  ;;  %v805_v34 = vstv %s2389_s0  ;;  %v3094_v9 = vld [vmem:[%s4828_s1 + $0xc0] sm:$0xff]  ;;  %s3705_s0 = sld [smem:[#allocation3 + $0x18]] }
  0xc0   :  { %704 = vrot.lane.b32.xlu1 %v683_v55, %s2574_s22  ;;  %702 = vrot.lane.b32.xlu0 %v682_v7, %s2574_s22  ;;  %v732_v55 = vmul.f32 %v3020_v35, %v727_v45 }
  0xc1   :  { %v3054_v60 = vadd.f32 %v283_v52, %v265_v63  ;;  %v3056_v15 = vadd.f32 %v282_v54, %v264_v19  ;;  %v735_v54 = vmul.f32 %v3031_v18, %v727_v45  ;;  %v3103_v45 = vld [vmem:[%s4828_s1 + $0xe0] sm:$0xff] }
  0xc2   :  { %v249_v3 = vpop.permute.xlu1 %248  ;;  %v247_v48 = vpop.permute.xlu0 %246 }
  0xc3   :  { %v267_v49 = vadd.f32 %v249_v3, %v217_v10  ;;  %v266_v36 = vadd.f32 %v247_v48, %v216_v53  ;;  %v3114_v53 = vstv %s2355_s17  ;;  %v809_v3 = vmul.f32 %v3103_v45, %v805_v34  ;;  %s2421_s17 = sld [smem:[#allocation3 + $0x1]] }
  0xc4   :  { %708 = vrot.lane.b32.xlu1 %v685_v57, %s2574_s22  ;;  %706 = vrot.lane.b32.xlu0 %v684_v58, %s2574_s22  ;;  %v807_v57 = vmul.f32 %v3089_v12, %v805_v34  ;;  %v806_v58 = vmul.f32 %v3094_v9, %v805_v34 }
  0xc5   :  { %v3066_v1 = vadd.f32 %v285_v14, %v267_v49  ;;  %v3068_v32 = vadd.f32 %v284_v28, %v266_v36  ;;  %v3108_v14 = vld [vmem:[%s4828_s1 + $0xd8] sm:$0xff] }
  0xc6   :  { %v253_v16 = vpop.permute.xlu1 %252  ;;  %v251_v17 = vpop.permute.xlu0 %250  ;;  %v808_v48 = vmul.f32 %v3108_v14, %v805_v34  ;;  %v3123_v49 = vld [vmem:[%s4828_s1 + $0xf8] sm:$0xff] }
  0xc7   :  { %v269_v51 = vadd.f32 %v253_v16, %v219_v50  ;;  %v268_v56 = vadd.f32 %v251_v17, %v218_v21 }
  0xc8   :  { %746 = vrot.lane.b32.xlu1 %v729_v11, %s2575_s4  ;;  %744 = vrot.lane.b32.xlu0 %v728_v61, %s2575_s4  ;;  %v3130_v61 = vld [vmem:[%s4828_s1 + $0xf0] sm:$0xff] }
  0xc9   :  { %v3074_v44 = vadd.f32 %v287_v62, %v269_v51  ;;  %v3076_v59 = vadd.f32 %v286_v47, %v268_v56  ;;  %v409_v62 = vmul.f32 %v2814_v22, %v3114_v53  ;;  %v408_v47 = vmul.f32 %v2819_v24, %v3114_v53 }
  0xca   :  { %v317_v40 = vpop.permute.xlu1 %316  ;;  %v315_v4 = vpop.permute.xlu0 %314  ;;  %v811_v51 = vmul.f32 %v3123_v49, %v805_v34  ;;  %v411_v22 = vmul.f32 %v2828_v29, %v3114_v53  ;;  %v410_v24 = vmul.f32 %v2833_v30, %v3114_v53 }
  0xcb   :  { %v339_v36 = vadd.f32 %v317_v40, %v3042_v27  ;;  %v338_v11 = vadd.f32 %v315_v4, %v3044_v33  ;;  %v810_v27 = vmul.f32 %v3130_v61, %v805_v34  ;;  %v3143_v33 = vld [vmem:[%s4828_s1 + $0x110] sm:$0xff] }
  0xcc   :  { %750 = vrot.lane.b32.xlu1 %v731_v5, %s2575_s4  ;;  %748 = vrot.lane.b32.xlu0 %v730_v6, %s2575_s4  ;;  %v3154_v6 = vld [vmem:[%s4828_s1 + $0x108] sm:$0xff] }
  0xcd   :  { %v812_v30 = vmul.f32 %v3154_v6, %v805_v34 }
  0xce   :  { %v321_v7 = vpop.permute.xlu1 %320  ;;  %v319_v52 = vpop.permute.xlu0 %318 }
  0xcf   :  { %v341_v56 = vadd.f32 %v321_v7, %v3054_v60  ;;  %v340_v5 = vadd.f32 %v319_v52, %v3056_v15  ;;  %v855_v60 = vstv %s2390_s29  ;;  %v413_v15 = vmul.f32 %v2842_v37, %v3114_v53  ;;  %s3544_s29 = sld [smem:[#allocation3 + $0x12]] }
  0xd0   :  { %754 = vrot.lane.b32.xlu1 %v733_v13, %s2575_s4  ;;  %752 = vrot.lane.b32.xlu0 %v732_v55, %s2575_s4  ;;  %v412_v7 = vmul.f32 %v2847_v38, %v3114_v53  ;;  %v857_v37 = vmul.f32 %v3089_v12, %v855_v60  ;;  %v856_v38 = vmul.f32 %v3094_v9, %v855_v60 }
  0xd2   :  { %v325_v63 = vpop.permute.xlu1 %324  ;;  %v323_v19 = vpop.permute.xlu0 %322 }
  0xd3   :  { %v343_v52 = vadd.f32 %v325_v63, %v3066_v1 }
  0xd4   :  { %758 = vrot.lane.b32.xlu1 %v735_v54, %s2575_s4  ;;  %756 = vrot.lane.b32.xlu0 %v734_v8, %s2575_s4  ;;  %v813_v8 = vmul.f32 %v3143_v33, %v805_v34 }
  0xd6   :  { %v3110_v28 = vpop.permute.xlu1 %328  ;;  %v3112_v10 = vpop.permute.xlu0 %326 }
  0xd8   :  { %824 = vrot.lane.b32.xlu1 %v807_v57, %s2574_s22  ;;  %822 = vrot.lane.b32.xlu0 %v806_v58, %s2574_s22  ;;  %v342_v57 = vadd.f32 %v323_v19, %v3068_v32  ;;  %v859_v19 = vmul.f32 %v3103_v45, %v855_v60 }
  0xda   :  { %v367_v50 = vpop.permute.xlu1 %366  ;;  %v365_v21 = vpop.permute.xlu0 %364 }
  0xdb   :  { %v389_v16 = vadd.f32 %v367_v50, %v339_v36  ;;  %v388_v17 = vadd.f32 %v365_v21, %v338_v11 }
  0xdc   :  { %828 = vrot.lane.b32.xlu1 %v809_v3, %s2574_s22  ;;  %826 = vrot.lane.b32.xlu0 %v808_v48, %s2574_s22 }
  0xdd   :  { %v3156_v40 = vadd.f32 %v409_v62, %v389_v16  ;;  %v3158_v4 = vadd.f32 %v408_v47, %v388_v17  ;;  %v858_v47 = vmul.f32 %v3108_v14, %v855_v60  ;;  %v861_v16 = vmul.f32 %v3123_v49, %v855_v60 }
  0xde   :  { %v371_v13 = vpop.permute.xlu1 %370  ;;  %v369_v55 = vpop.permute.xlu0 %368  ;;  %v860_v17 = vmul.f32 %v3130_v61, %v855_v60 }
  0xdf   :  { %v391_v54 = vadd.f32 %v371_v13, %v341_v56  ;;  %v390_v29 = vadd.f32 %v369_v55, %v340_v5  ;;  %v3209_v56 = vld [vmem:[%s4828_s1 + $0xc9] sm:$0xff]  ;;  %v931_v5 = vstv %s2400_s9  ;;  %v3214_v13 = vld [vmem:[%s4828_s1 + $0xc1] sm:$0xff]  ;;  %s2432_s9 = sld [smem:[#allocation3 + $0x4]] }
  0xe0   :  { %832 = vrot.lane.b32.xlu1 %v811_v51, %s2574_s22  ;;  %830 = vrot.lane.b32.xlu0 %v810_v27, %s2574_s22 }
  0xe1   :  { %v3170_v58 = vadd.f32 %v411_v22, %v391_v54  ;;  %v3172_v3 = vadd.f32 %v410_v24, %v390_v29  ;;  %v863_v22 = vmul.f32 %v3143_v33, %v855_v60  ;;  %v862_v24 = vmul.f32 %v3154_v6, %v855_v60  ;;  %v3232_v60 = vld [vmem:[%s4828_s1 + $0xd9] sm:$0xff] }
  0xe2   :  { %v375_v48 = vpop.permute.xlu1 %374  ;;  %v373_v36 = vpop.permute.xlu0 %372  ;;  %v933_v29 = vmul.f32 %v3209_v56, %v931_v5 }
  0xe3   :  { %v393_v11 = vadd.f32 %v375_v48, %v343_v52  ;;  %v392_v62 = vadd.f32 %v373_v36, %v342_v57  ;;  %v934_v57 = vmul.f32 %v3232_v60, %v931_v5  ;;  %v3245_v48 = vld [vmem:[%s4828_s1 + $0xf9] sm:$0xff]  ;;  %v3250_v36 = vld [vmem:[%s4828_s1 + $0xf1] sm:$0xff] }
  0xe4   :  { %836 = vrot.lane.b32.xlu1 %v813_v8, %s2574_s22  ;;  %834 = vrot.lane.b32.xlu0 %v812_v30, %s2574_s22  ;;  %v932_v8 = vmul.f32 %v3214_v13, %v931_v5  ;;  %v3227_v30 = vld [vmem:[%s4828_s1 + $0xe1] sm:$0xff]  ;;  %4876 = vst [vmem:[#allocation14_spill] sm:$0xff] %v3250_v36 }
  0xe5   :  { %v3178_v34 = vadd.f32 %v413_v15, %v393_v11  ;;  %v3180_v1 = vadd.f32 %v412_v7, %v392_v62  ;;  %v935_v52 = vmul.f32 %v3227_v30, %v931_v5 }
  0xe6   :  { %v3182_v32 = vpop.permute.xlu1 %378  ;;  %v3184_v63 = vpop.permute.xlu0 %376 }
  0xe7   :  { %4870 = vst [vmem:[#allocation8_spill] sm:$0xff] %v3178_v34  ;;  %4871 = vst [vmem:[#allocation9_spill] sm:$0xff] %v3180_v1  ;;  %v3372_v1 = vld [vmem:[%s4828_s1 + $0x10a] sm:$0xff] }
  0xe8   :  { %874 = vrot.lane.b32.xlu1 %v857_v37, %s2575_s4  ;;  %872 = vrot.lane.b32.xlu0 %v856_v38, %s2575_s4  ;;  %v937_v37 = vmul.f32 %v3245_v48, %v931_v5  ;;  %v936_v38 = vmul.f32 %v3250_v36, %v931_v5  ;;  %4902 = vst [vmem:[#allocation40_spill] sm:$0xff] %v3372_v1 }
  0xea   :  { %v3190_v50 = vpop.permute.xlu1 %444  ;;  %v3192_v21 = vpop.permute.xlu0 %442 }
  0xec   :  { %878 = vrot.lane.b32.xlu1 %v859_v19, %s2575_s4  ;;  %876 = vrot.lane.b32.xlu0 %v858_v47, %s2575_s4  ;;  %v3263_v19 = vld [vmem:[%s4828_s1 + $0x111] sm:$0xff]  ;;  %v3268_v47 = vld [vmem:[%s4828_s1 + $0x109] sm:$0xff] }
  0xed   :  { %4877 = vst [vmem:[#allocation15_spill] sm:$0xff] %v3263_v19  ;;  %4878 = vst [vmem:[#allocation16_spill] sm:$0xff] %v3268_v47 }
  0xee   :  { %v3198_v51 = vpop.permute.xlu1 %448  ;;  %v3200_v27 = vpop.permute.xlu0 %446 }
  0xf0   :  { %882 = vrot.lane.b32.xlu1 %v861_v16, %s2575_s4  ;;  %880 = vrot.lane.b32.xlu0 %v860_v17, %s2575_s4 }
  0xf2   :  { %v3216_v55 = vpop.permute.xlu1 %452  ;;  %v3218_v54 = vpop.permute.xlu0 %450 }
  0xf3   :  { %4872 = vst [vmem:[#allocation10_spill] sm:$0xff] %v3216_v55  ;;  %4873 = vst [vmem:[#allocation11_spill] sm:$0xff] %v3218_v54  ;;  %v3367_v54 = vld [vmem:[%s4828_s1 + $0x112] sm:$0xff] }
  0xf4   :  { %886 = vrot.lane.b32.xlu1 %v863_v22, %s2575_s4  ;;  %884 = vrot.lane.b32.xlu0 %v862_v24, %s2575_s4  ;;  %v939_v22 = vmul.f32 %v3263_v19, %v931_v5  ;;  %v938_v24 = vmul.f32 %v3268_v47, %v931_v5  ;;  %4901 = vst [vmem:[#allocation39_spill] sm:$0xff] %v3367_v54 }
  0xf6   :  { %v3234_v15 = vpop.permute.xlu1 %456  ;;  %v3236_v7 = vpop.permute.xlu0 %454 }
  0xf7   :  { %4874 = vst [vmem:[#allocation12_spill] sm:$0xff] %v3234_v15  ;;  %4875 = vst [vmem:[#allocation13_spill] sm:$0xff] %v3236_v7 }
  0xf8   :  { %950 = vrot.lane.b32.xlu1 %v933_v29, %s2574_s22  ;;  %948 = vrot.lane.b32.xlu0 %v932_v8, %s2574_s22  ;;  %v981_v29 = vstv %s2401_s21  ;;  %s2433_s21 = sld [smem:[#allocation3 + $0x5]] }
  0xf9   :  { %v982_v7 = vmul.f32 %v3214_v13, %v981_v29  ;;  %v985_v5 = vmul.f32 %v3227_v30, %v981_v29  ;;  %v989_v15 = vmul.f32 %v3263_v19, %v981_v29  ;;  %v3336_v19 = vld [vmem:[%s4828_s1 + $0xda] sm:$0xff] }
  0xfa   :  { %v3252_v11 = vpop.permute.xlu1 %494  ;;  %v3254_v62 = vpop.permute.xlu0 %492  ;;  %4894 = vst [vmem:[#allocation32_spill] sm:$0xff] %v3336_v19 }
  0xfc   :  { %954 = vrot.lane.b32.xlu1 %v935_v52, %s2574_s22  ;;  %952 = vrot.lane.b32.xlu0 %v934_v57, %s2574_s22  ;;  %v983_v57 = vmul.f32 %v3209_v56, %v981_v29 }
  0xfe   :  { %v3270_v16 = vpop.permute.xlu1 %498  ;;  %v3272_v17 = vpop.permute.xlu0 %496 }
  0xff   :  { %4879 = vst [vmem:[#allocation17_spill] sm:$0xff] %v3270_v16  ;;  %4880 = vst [vmem:[#allocation18_spill] sm:$0xff] %v3272_v17  ;;  %v1107_v17 = vstv %s2412_s13  ;;  %s2476_s13 = sld [smem:[#allocation3 + $0x10]] }
 0x100   :  { %958 = vrot.lane.b32.xlu1 %v937_v37, %s2574_s22  ;;  %956 = vrot.lane.b32.xlu0 %v936_v38, %s2574_s22 }
 0x102   :  { %v3278_v8 = vpop.permute.xlu1 %502  ;;  %v3280_v52 = vpop.permute.xlu0 %500 }
 0x103   :  { %4881 = vst [vmem:[#allocation19_spill] sm:$0xff] %v3278_v8  ;;  %4882 = vst [vmem:[#allocation20_spill] sm:$0xff] %v3280_v52  ;;  %v984_v52 = vmul.f32 %v3232_v60, %v981_v29  ;;  %v3354_v8 = vld [vmem:[%s4828_s1 + $0xf2] sm:$0xff] }
 0x104   :  { %962 = vrot.lane.b32.xlu1 %v939_v22, %s2574_s22  ;;  %960 = vrot.lane.b32.xlu0 %v938_v24, %s2574_s22  ;;  %4898 = vst [vmem:[#allocation36_spill] sm:$0xff] %v3354_v8 }
 0x106   :  { %v3286_v37 = vpop.permute.xlu1 %506  ;;  %v3288_v38 = vpop.permute.xlu0 %504 }
 0x107   :  { %4883 = vst [vmem:[#allocation21_spill] sm:$0xff] %v3286_v37  ;;  %4884 = vst [vmem:[#allocation22_spill] sm:$0xff] %v3288_v38  ;;  %v987_v37 = vmul.f32 %v3245_v48, %v981_v29  ;;  %v986_v38 = vmul.f32 %v3250_v36, %v981_v29 }
 0x108   :  { %1000 = vrot.lane.b32.xlu1 %v983_v57, %s2575_s4  ;;  %998 = vrot.lane.b32.xlu0 %v982_v7, %s2575_s4 }
 0x10a   :  { %v3294_v22 = vpop.permute.xlu1 %570  ;;  %v3296_v24 = vpop.permute.xlu0 %568 }
 0x10b   :  { %4885 = vst [vmem:[#allocation23_spill] sm:$0xff] %v3294_v22  ;;  %4886 = vst [vmem:[#allocation24_spill] sm:$0xff] %v3296_v24  ;;  %v988_v24 = vmul.f32 %v3268_v47, %v981_v29  ;;  %v3331_v47 = vld [vmem:[%s4828_s1 + $0xe2] sm:$0xff]  ;;  %v3349_v22 = vld [vmem:[%s4828_s1 + $0xfa] sm:$0xff] }
 0x10c   :  { %1004 = vrot.lane.b32.xlu1 %v985_v5, %s2575_s4  ;;  %1002 = vrot.lane.b32.xlu0 %v984_v52, %s2575_s4  ;;  %v3313_v52 = vld [vmem:[%s4828_s1 + $0xca] sm:$0xff]  ;;  %v1057_v5 = vstv %s2411_s27  ;;  %4893 = vst [vmem:[#allocation31_spill] sm:$0xff] %v3331_v47  ;;  %4897 = vst [vmem:[#allocation35_spill] sm:$0xff] %v3349_v22  ;;  %s2366_s27 = sld [smem:[#allocation3 + $0xc]] }
 0x10d   :  { %4889 = vst [vmem:[#allocation27_spill] sm:$0xff] %v3313_v52  ;;  %v1059_v29 = vmul.f32 %v3313_v52, %v1057_v5 }
 0x10e   :  { %v3302_v57 = vpop.permute.xlu1 %574  ;;  %v3304_v7 = vpop.permute.xlu0 %572 }
 0x10f   :  { %4887 = vst [vmem:[#allocation25_spill] sm:$0xff] %v3302_v57  ;;  %4888 = vst [vmem:[#allocation26_spill] sm:$0xff] %v3304_v7  ;;  %v3318_v57 = vld [vmem:[%s4828_s1 + $0xc2] sm:$0xff] }
 0x110   :  { %1008 = vrot.lane.b32.xlu1 %v987_v37, %s2575_s4  ;;  %1006 = vrot.lane.b32.xlu0 %v986_v38, %s2575_s4  ;;  %4890 = vst [vmem:[#allocation28_spill] sm:$0xff] %v3318_v57  ;;  %v1058_v38 = vmul.f32 %v3318_v57, %v1057_v5 }
 0x112   :  { %v3320_v7 = vpop.permute.xlu1 %578  ;;  %v3322_v37 = vpop.permute.xlu0 %576 }
 0x113   :  { %4891 = vst [vmem:[#allocation29_spill] sm:$0xff] %v3320_v7  ;;  %4892 = vst [vmem:[#allocation30_spill] sm:$0xff] %v3322_v37 }
 0x114   :  { %1012 = vrot.lane.b32.xlu1 %v989_v15, %s2575_s4  ;;  %1010 = vrot.lane.b32.xlu0 %v988_v24, %s2575_s4  ;;  %v1061_v15 = vmul.f32 %v3331_v47, %v1057_v5  ;;  %v1060_v24 = vmul.f32 %v3336_v19, %v1057_v5 }
 0x116   :  { %v3338_v7 = vpop.permute.xlu1 %582  ;;  %v3340_v37 = vpop.permute.xlu0 %580 }
 0x117   :  { %4895 = vst [vmem:[#allocation33_spill] sm:$0xff] %v3338_v7  ;;  %4896 = vst [vmem:[#allocation34_spill] sm:$0xff] %v3340_v37  ;;  %v1062_v7 = vmul.f32 %v3354_v8, %v1057_v5 }
 0x118   :  { %1076 = vrot.lane.b32.xlu1 %v1059_v29, %s2574_s22  ;;  %1074 = vrot.lane.b32.xlu0 %v1058_v38, %s2574_s22  ;;  %v1063_v38 = vmul.f32 %v3349_v22, %v1057_v5 }
 0x11a   :  { %v3356_v37 = vpop.permute.xlu1 %620  ;;  %v3358_v29 = vpop.permute.xlu0 %618 }
 0x11b   :  { %4899 = vst [vmem:[#allocation37_spill] sm:$0xff] %v3356_v37  ;;  %4900 = vst [vmem:[#allocation38_spill] sm:$0xff] %v3358_v29 }
 0x11c   :  { %1080 = vrot.lane.b32.xlu1 %v1061_v15, %s2574_s22  ;;  %1078 = vrot.lane.b32.xlu0 %v1060_v24, %s2574_s22  ;;  %v1065_v15 = vmul.f32 %v3367_v54, %v1057_v5  ;;  %v1064_v24 = vmul.f32 %v3372_v1, %v1057_v5  ;;  %v1111_v5 = vmul.f32 %v3331_v47, %v1107_v17 }
 0x11d   :  { %v1114_v47 = vmul.f32 %v3372_v1, %v1107_v17  ;;  %v2415_v1 = vld [vmem:[%s4828_s1 + $0x138] sm:$0xff] }
 0x11e   :  { %v3374_v37 = vpop.permute.xlu1 %624  ;;  %v3376_v29 = vpop.permute.xlu0 %622 }
 0x11f   :  { %4903 = vst [vmem:[#allocation41_spill] sm:$0xff] %v3374_v37  ;;  %4904 = vst [vmem:[#allocation42_spill] sm:$0xff] %v3376_v29  ;;  %v1109_v37 = vmul.f32 %v3313_v52, %v1107_v17  ;;  %v1108_v29 = vmul.f32 %v3318_v57, %v1107_v17 }
 0x120   :  { %1084 = vrot.lane.b32.xlu1 %v1063_v38, %s2574_s22  ;;  %1082 = vrot.lane.b32.xlu0 %v1062_v7, %s2574_s22 }
 0x122   :  { %v3382_v16 = vpop.permute.xlu1 %628  ;;  %v3384_v36 = vpop.permute.xlu0 %626 }
 0x123   :  { %4905 = vst [vmem:[#allocation43_spill] sm:$0xff] %v3382_v16  ;;  %4906 = vst [vmem:[#allocation44_spill] sm:$0xff] %v3384_v36  ;;  %v1110_v36 = vmul.f32 %v3336_v19, %v1107_v17  ;;  %v1115_v19 = vmul.f32 %v3367_v54, %v1107_v17  ;;  %v2419_v16 = vld [vmem:[%s4828_s1 + $0x168] sm:$0xff] }
 0x124   :  { %1088 = vrot.lane.b32.xlu1 %v1065_v15, %s2574_s22  ;;  %1086 = vrot.lane.b32.xlu0 %v1064_v24, %s2574_s22 }
 0x126   :  { %v3390_v38 = vpop.permute.xlu1 %632  ;;  %v3392_v7 = vpop.permute.xlu0 %630 }
 0x127   :  { %4907 = vst [vmem:[#allocation45_spill] sm:$0xff] %v3390_v38  ;;  %4908 = vst [vmem:[#allocation46_spill] sm:$0xff] %v3392_v7  ;;  %v1113_v38 = vmul.f32 %v3349_v22, %v1107_v17  ;;  %v1112_v7 = vmul.f32 %v3354_v8, %v1107_v17  ;;  %v2413_v8 = vld [vmem:[%s4828_s1 + $0x120] sm:$0xff] }
 0x128   :  { %1126 = vrot.lane.b32.xlu1 %v1109_v37, %s2575_s4  ;;  %1124 = vrot.lane.b32.xlu0 %v1108_v29, %s2575_s4  ;;  %v2416_v17 = vld [vmem:[%s4828_s1 + $0x140] sm:$0xff] }
 0x12a   :  { %v3398_v15 = vpop.permute.xlu1 %696  ;;  %v3400_v24 = vpop.permute.xlu0 %694 }
 0x12b   :  { %4909 = vst [vmem:[#allocation47_spill] sm:$0xff] %v3398_v15  ;;  %4910 = vst [vmem:[#allocation48_spill] sm:$0xff] %v3400_v24 }
 0x12c   :  { %1130 = vrot.lane.b32.xlu1 %v1111_v5, %s2575_s4  ;;  %1128 = vrot.lane.b32.xlu0 %v1110_v36, %s2575_s4  ;;  %v2414_v36 = vld [vmem:[%s4828_s1 + $0x128] sm:$0xff]  ;;  %v1196_v5 = vstv %s2421_s17  ;;  %s4633_s17 = sld [smem:[#allocation3 + $0x17]] }
 0x12e   :  { %v3406_v37 = vpop.permute.xlu1 %700  ;;  %v3408_v29 = vpop.permute.xlu0 %698 }
 0x12f   :  { %4911 = vst [vmem:[#allocation49_spill] sm:$0xff] %v3406_v37  ;;  %4912 = vst [vmem:[#allocation50_spill] sm:$0xff] %v3408_v29 }
 0x130   :  { %1134 = vrot.lane.b32.xlu1 %v1113_v38, %s2575_s4  ;;  %1132 = vrot.lane.b32.xlu0 %v1112_v7, %s2575_s4  ;;  %v1198_v38 = vmul.f32 %v2414_v36, %v1196_v5  ;;  %v1197_v7 = vmul.f32 %v2413_v8, %v1196_v5 }
 0x132   :  { %v3420_v22 = vpop.permute.xlu1 %704  ;;  %v3422_v57 = vpop.permute.xlu0 %702 }
 0x133   :  { %4913 = vst [vmem:[#allocation51_spill] sm:$0xff] %v3420_v22  ;;  %4914 = vst [vmem:[#allocation52_spill] sm:$0xff] %v3422_v57  ;;  %v2418_v57 = vld [vmem:[%s4828_s1 + $0x158] sm:$0xff]  ;;  %v2417_v22 = vld [vmem:[%s4828_s1 + $0x150] sm:$0xff] }
 0x134   :  { %1138 = vrot.lane.b32.xlu1 %v1115_v19, %s2575_s4  ;;  %1136 = vrot.lane.b32.xlu0 %v1114_v47, %s2575_s4  ;;  %v1200_v19 = vmul.f32 %v2416_v17, %v1196_v5  ;;  %v1199_v47 = vmul.f32 %v2415_v1, %v1196_v5 }
 0x136   :  { %v3432_v54 = vpop.permute.xlu1 %708  ;;  %v3434_v29 = vpop.permute.xlu0 %706 }
 0x137   :  { %4915 = vst [vmem:[#allocation53_spill] sm:$0xff] %v3432_v54  ;;  %4916 = vst [vmem:[#allocation54_spill] sm:$0xff] %v3434_v29  ;;  %v2420_v29 = vld [vmem:[%s4828_s1 + $0x170] sm:$0xff] }
 0x138   :  { %1215 = vrot.lane.b32.xlu1 %v1198_v38, %s2574_s22  ;;  %1213 = vrot.lane.b32.xlu0 %v1197_v7, %s2574_s22  ;;  %v1202_v38 = vmul.f32 %v2418_v57, %v1196_v5  ;;  %v1201_v7 = vmul.f32 %v2417_v22, %v1196_v5 }
 0x13a   :  { %v3444_v37 = vpop.permute.xlu1 %746  ;;  %v3446_v54 = vpop.permute.xlu0 %744 }
 0x13b   :  { %4917 = vst [vmem:[#allocation55_spill] sm:$0xff] %v3444_v37  ;;  %4918 = vst [vmem:[#allocation56_spill] sm:$0xff] %v3446_v54  ;;  %v1246_v54 = vstv %s2422_s3  ;;  %s3861_s3 = sld [smem:[#allocation3 + $0xa]] }
 0x13c   :  { %1219 = vrot.lane.b32.xlu1 %v1200_v19, %s2574_s22  ;;  %1217 = vrot.lane.b32.xlu0 %v1199_v47, %s2574_s22  ;;  %v1204_v19 = vmul.f32 %v2420_v29, %v1196_v5  ;;  %v1203_v47 = vmul.f32 %v2419_v16, %v1196_v5  ;;  %v1248_v55 = vmul.f32 %v2414_v36, %v1246_v54 }
 0x13d   :  { %v1247_v34 = vmul.f32 %v2413_v8, %v1246_v54  ;;  %v1250_v5 = vmul.f32 %v2416_v17, %v1246_v54  ;;  %v1252_v8 = vmul.f32 %v2418_v57, %v1246_v54  ;;  %v1251_v36 = vmul.f32 %v2417_v22, %v1246_v54  ;;  %v2423_v57 = vld [vmem:[%s4828_s1 + $0x121] sm:$0xff] }
 0x13e   :  { %v3456_v52 = vpop.permute.xlu1 %750  ;;  %v3458_v24 = vpop.permute.xlu0 %748  ;;  %v1322_v17 = vstv %s2432_s9  ;;  %s2510_s9 = sld [smem:[#allocation3 + $0x1a]] }
 0x13f   :  { %4919 = vst [vmem:[#allocation57_spill] sm:$0xff] %v3456_v52  ;;  %4920 = vst [vmem:[#allocation58_spill] sm:$0xff] %v3458_v24 }
 0x140   :  { %1223 = vrot.lane.b32.xlu1 %v1202_v38, %s2574_s22  ;;  %1221 = vrot.lane.b32.xlu0 %v1201_v7, %s2574_s22  ;;  %v1249_v38 = vmul.f32 %v2415_v1, %v1246_v54  ;;  %v1253_v1 = vmul.f32 %v2419_v16, %v1246_v54  ;;  %v2425_v16 = vld [vmem:[%s4828_s1 + $0x139] sm:$0xff] }
 0x142   :  { %v3462_v37 = vpop.permute.xlu1 %754  ;;  %v3464_v15 = vpop.permute.xlu0 %752 }
 0x143   :  { %4921 = vst [vmem:[#allocation59_spill] sm:$0xff] %v3462_v37  ;;  %4922 = vst [vmem:[#allocation60_spill] sm:$0xff] %v3464_v15 }
 0x144   :  { %1227 = vrot.lane.b32.xlu1 %v1204_v19, %s2574_s22  ;;  %1225 = vrot.lane.b32.xlu0 %v1203_v47, %s2574_s22 }
 0x146   :  { %v3468_v52 = vpop.permute.xlu1 %758  ;;  %v3470_v24 = vpop.permute.xlu0 %756 }
 0x147   :  { %4923 = vst [vmem:[#allocation61_spill] sm:$0xff] %v3468_v52  ;;  %4924 = vst [vmem:[#allocation62_spill] sm:$0xff] %v3470_v24  ;;  %v3530_v52 = vld [vmem:[%s4828_s1 + $0x169] sm:$0xff] }
 0x148   :  { %1265 = vrot.lane.b32.xlu1 %v1248_v55, %s2575_s4  ;;  %1263 = vrot.lane.b32.xlu0 %v1247_v34, %s2575_s4  ;;  %v1254_v34 = vmul.f32 %v2420_v29, %v1246_v54  ;;  %v2424_v55 = vld [vmem:[%s4828_s1 + $0x129] sm:$0xff]  ;;  %v1323_v29 = vmul.f32 %v2423_v57, %v1322_v17  ;;  %v2426_v54 = vld [vmem:[%s4828_s1 + $0x141] sm:$0xff] }
 0x14a   :  { %v3474_v7 = vpop.permute.xlu1 %824  ;;  %v3476_v15 = vpop.permute.xlu0 %822 }
 0x14b   :  { %4925 = vst [vmem:[#allocation63_spill] sm:$0xff] %v3474_v7  ;;  %4926 = vst [vmem:[#allocation64_spill] sm:$0xff] %v3476_v15 }
 0x14c   :  { %1269 = vrot.lane.b32.xlu1 %v1250_v5, %s2575_s4  ;;  %1267 = vrot.lane.b32.xlu0 %v1249_v38, %s2575_s4  ;;  %v1324_v38 = vmul.f32 %v2424_v55, %v1322_v17 }
 0x14e   :  { %v3480_v19 = vpop.permute.xlu1 %828  ;;  %v3482_v47 = vpop.permute.xlu0 %826 }
 0x14f   :  { %4927 = vst [vmem:[#allocation65_spill] sm:$0xff] %v3480_v19  ;;  %4928 = vst [vmem:[#allocation66_spill] sm:$0xff] %v3482_v47 }
 0x150   :  { %1273 = vrot.lane.b32.xlu1 %v1252_v8, %s2575_s4  ;;  %1271 = vrot.lane.b32.xlu0 %v1251_v36, %s2575_s4 }
 0x152   :  { %v3492_v22 = vpop.permute.xlu1 %832  ;;  %v3494_v5 = vpop.permute.xlu0 %830 }
 0x153   :  { %4929 = vst [vmem:[#allocation67_spill] sm:$0xff] %v3492_v22  ;;  %4930 = vst [vmem:[#allocation68_spill] sm:$0xff] %v3494_v5  ;;  %v2428_v5 = vld [vmem:[%s4828_s1 + $0x159] sm:$0xff]  ;;  %v2427_v22 = vld [vmem:[%s4828_s1 + $0x151] sm:$0xff] }
 0x154   :  { %1277 = vrot.lane.b32.xlu1 %v1254_v34, %s2575_s4  ;;  %1275 = vrot.lane.b32.xlu0 %v1253_v1, %s2575_s4  ;;  %v1326_v34 = vmul.f32 %v2426_v54, %v1322_v17  ;;  %v1325_v1 = vmul.f32 %v2425_v16, %v1322_v17 }
 0x156   :  { %v3504_v8 = vpop.permute.xlu1 %836  ;;  %v3506_v36 = vpop.permute.xlu0 %834 }
 0x157   :  { %4931 = vst [vmem:[#allocation69_spill] sm:$0xff] %v3504_v8  ;;  %4932 = vst [vmem:[#allocation70_spill] sm:$0xff] %v3506_v36  ;;  %v3525_v36 = vld [vmem:[%s4828_s1 + $0x171] sm:$0xff] }
 0x158   :  { %1341 = vrot.lane.b32.xlu1 %v1324_v38, %s2574_s22  ;;  %1339 = vrot.lane.b32.xlu0 %v1323_v29, %s2574_s22  ;;  %v1328_v38 = vmul.f32 %v2428_v5, %v1322_v17  ;;  %v1327_v29 = vmul.f32 %v2427_v22, %v1322_v17 }
 0x15a   :  { %v3516_v24 = vpop.permute.xlu1 %874  ;;  %v3518_v8 = vpop.permute.xlu0 %872 }
 0x15b   :  { %4933 = vst [vmem:[#allocation71_spill] sm:$0xff] %v3516_v24  ;;  %4934 = vst [vmem:[#allocation72_spill] sm:$0xff] %v3518_v8  ;;  %v1372_v8 = vstv %s2433_s21  ;;  %s3738_s21 = sld [smem:[#allocation3 + $0x8]] }
 0x15c   :  { %1345 = vrot.lane.b32.xlu1 %v1326_v34, %s2574_s22  ;;  %1343 = vrot.lane.b32.xlu0 %v1325_v1, %s2574_s22  ;;  %v1330_v34 = vmul.f32 %v3525_v36, %v1322_v17  ;;  %v1329_v1 = vmul.f32 %v3530_v52, %v1322_v17  ;;  %v1376_v17 = vmul.f32 %v2426_v54, %v1372_v8  ;;  %v2519_v54 = vld [vmem:[%s4828_s1 + $0x69] sm:$0xff] }
 0x15e   :  { %v3532_v47 = vpop.permute.xlu1 %878  ;;  %v3534_v19 = vpop.permute.xlu0 %876 }
 0x15f   :  { %4935 = vst [vmem:[#allocation73_spill] sm:$0xff] %v3532_v47  ;;  %4936 = vst [vmem:[#allocation74_spill] sm:$0xff] %v3534_v19  ;;  %v1374_v19 = vmul.f32 %v2424_v55, %v1372_v8  ;;  %v533_v47 = vstv %s2366_s27 }
 0x160   :  { %1349 = vrot.lane.b32.xlu1 %v1328_v38, %s2574_s22  ;;  %1347 = vrot.lane.b32.xlu0 %v1327_v29, %s2574_s22  ;;  %v1373_v38 = vmul.f32 %v2423_v57, %v1372_v8  ;;  %v2518_v57 = vld [vmem:[%s4828_s1 + $0xa8] sm:$0xff]  ;;  %v3597_v7 = vmul.f32 %v2930_v26, %v533_v47 }
 0x162   :  { %v3540_v24 = vpop.permute.xlu1 %882  ;;  %v3542_v37 = vpop.permute.xlu0 %880 }
 0x163   :  { %4937 = vst [vmem:[#allocation75_spill] sm:$0xff] %v3540_v24  ;;  %4938 = vst [vmem:[#allocation76_spill] sm:$0xff] %v3542_v37  ;;  %v1375_v37 = vmul.f32 %v2425_v16, %v1372_v8  ;;  %v3571_v16 = vmul.f32 %v2519_v54, %v533_v47  ;;  %v3594_v24 = vmul.f32 %v2917_v0, %v533_v47 }
 0x164   :  { %1353 = vrot.lane.b32.xlu1 %v1330_v34, %s2574_s22  ;;  %1351 = vrot.lane.b32.xlu0 %v1329_v1, %s2574_s22  ;;  %v2517_v34 = vld [vmem:[%s4828_s1 + $0xb0] sm:$0xff]  ;;  %v659_v1 = vstv %s2377_s28 }
 0x165   :  { %v3560_v55 = vmul.f32 %v2517_v34, %v3114_v53  ;;  %v3609_v0 = vmul.f32 %v2990_v31, %v659_v1  ;;  %v3612_v26 = vmul.f32 %v2999_v41, %v659_v1 }
 0x166   :  { %v3548_v29 = vpop.permute.xlu1 %886  ;;  %v3550_v15 = vpop.permute.xlu0 %884 }
 0x167   :  { %4939 = vst [vmem:[#allocation77_spill] sm:$0xff] %v3548_v29  ;;  %4940 = vst [vmem:[#allocation78_spill] sm:$0xff] %v3550_v15  ;;  %v3581_v15 = vmul.f32 %v2894_v23, %v533_v47  ;;  %v787_v23 = vstv %s3544_s29 }
 0x168   :  { %1391 = vrot.lane.b32.xlu1 %v1374_v19, %s2575_s4  ;;  %1389 = vrot.lane.b32.xlu0 %v1373_v38, %s2575_s4  ;;  %v3566_v19 = vmul.f32 %v2518_v57, %v3114_v53  ;;  %v2520_v38 = vld [vmem:[%s4828_s1 + $0x61] sm:$0xff]  ;;  %v3584_v53 = vmul.f32 %v2899_v25, %v533_v47  ;;  %v3587_v57 = vmul.f32 %v2910_v43, %v533_v47 }
 0x169   :  { %v3578_v34 = vmul.f32 %v2520_v38, %v533_v47  ;;  %v3600_v38 = vmul.f32 %v2937_v2, %v533_v47  ;;  %v3604_v25 = vmul.f32 %v2985_v20, %v659_v1  ;;  %v1378_v43 = vmul.f32 %v2428_v5, %v1372_v8 }
 0x16a   :  { %v3589_v54 = vpop.permute.xlu1 %950  ;;  %v3591_v29 = vpop.permute.xlu0 %948  ;;  %v3615_v2 = vmul.f32 %v3004_v42, %v659_v1  ;;  %v3618_v47 = vmul.f32 %v3013_v46, %v659_v1  ;;  %v3621_v20 = vmul.f32 %v3020_v35, %v659_v1  ;;  %v3630_v31 = vmul.f32 %v3089_v12, %v787_v23 }
 0x16b   :  { %4941 = vst [vmem:[#allocation79_spill] sm:$0xff] %v3589_v54  ;;  %v1377_v54 = vmul.f32 %v2427_v22, %v1372_v8  ;;  %v3627_v22 = vmul.f32 %v3040_v39, %v659_v1  ;;  %v3637_v46 = vmul.f32 %v3094_v9, %v787_v23  ;;  %v3640_v35 = vmul.f32 %v3103_v45, %v787_v23 }
 0x16c   :  { %1395 = vrot.lane.b32.xlu1 %v1376_v17, %s2575_s4  ;;  %1393 = vrot.lane.b32.xlu0 %v1375_v37, %s2575_s4  ;;  %v3624_v37 = vmul.f32 %v3031_v18, %v659_v1  ;;  %v3643_v18 = vmul.f32 %v3108_v14, %v787_v23  ;;  %v3646_v39 = vmul.f32 %v3123_v49, %v787_v23  ;;  %v913_v5 = vstv %s3554_s30 }
 0x16d   :  { %v345_v12 = vadd.f32 %v3110_v28, %v3074_v44  ;;  %v1380_v9 = vmul.f32 %v3525_v36, %v1372_v8  ;;  %v1379_v17 = vmul.f32 %v3530_v52, %v1372_v8  ;;  %v467_v45 = vadd.f32 %v3190_v50, %v3156_v40  ;;  %v3665_v44 = vld [vmem:[%s4828_s1 + $0x12a] sm:$0xff]  ;;  %v3673_v52 = vld [vmem:[%s4828_s1 + $0x122] sm:$0xff] }
 0x16e   :  { %v3632_v41 = vpop.permute.xlu1 %954  ;;  %v3634_v42 = vpop.permute.xlu0 %952  ;;  %v466_v14 = vadd.f32 %v3192_v21, %v3158_v4  ;;  %v3660_v49 = vmul.f32 %v3130_v61, %v787_v23  ;;  %v3668_v28 = vstv %s3573_s10  ;;  %v344_v40 = vadd.f32 %v3112_v10, %v3076_v59  ;;  %s2431_s10 = sld [smem:[#allocation3 + $0x3]] }
 0x16f   :  { %v395_v4 = vadd.f32 %v3182_v32, %v345_v12  ;;  %v3679_v61 = vmul.f32 %v3143_v33, %v787_v23  ;;  %v3682_v50 = vmul.f32 %v3154_v6, %v787_v23  ;;  %v517_v36 = vadd.f32 %v3252_v11, %v467_v45  ;;  %v3720_v11 = vld [vmem:[%s4828_s1 + $0x142] sm:$0xff]  ;;  %v4947_v23 = vld [vmem:[#allocation14_spill] sm:$0xff] }
 0x170   :  { %1399 = vrot.lane.b32.xlu1 %v1378_v43, %s2575_s4  ;;  %1397 = vrot.lane.b32.xlu0 %v1377_v54, %s2575_s4  ;;  %v516_v1 = vadd.f32 %v3254_v62, %v466_v14  ;;  %v3691_v54 = vmul.f32 %v3209_v56, %v913_v5  ;;  %v3694_v59 = vmul.f32 %v3214_v13, %v913_v5  ;;  %v3725_v62 = vld [vmem:[%s4828_s1 + $0x13a] sm:$0xff]  ;;  %v4952_v45 = vld [vmem:[#allocation18_spill] sm:$0xff] }
 0x171   :  { %v3697_v10 = vmul.f32 %v3227_v30, %v913_v5  ;;  %v1450_v33 = vmul.f32 %v3665_v44, %v3668_v28  ;;  %v1449_v6 = vmul.f32 %v3673_v52, %v3668_v28  ;;  %v469_v32 = vadd.f32 %v3198_v51, %v3170_v58  ;;  %v4945_v51 = vld [vmem:[#allocation8_spill] sm:$0xff] }
 0x172   :  { %v3684_v21 = vpop.permute.xlu1 %958  ;;  %v3686_v8 = vpop.permute.xlu0 %956  ;;  %v468_v56 = vadd.f32 %v3200_v27, %v3172_v3  ;;  %v3712_v13 = vmul.f32 %v3232_v60, %v913_v5  ;;  %v3715_v30 = vmul.f32 %v3245_v48, %v913_v5  ;;  %v394_v58 = vadd.f32 %v3184_v63, %v344_v40  ;;  %v4946_v3 = vld [vmem:[#allocation10_spill] sm:$0xff] }
 0x173   :  { %4942 = vst [vmem:[#allocation80_spill] sm:$0xff] %v3684_v21  ;;  %4943 = vst [vmem:[#allocation81_spill] sm:$0xff] %v3686_v8  ;;  %v471_v27 = vadd.f32 %v4946_v3, %v4945_v51  ;;  %v423_v60 = vadd.f32 %v3560_v55, %v395_v4  ;;  %v3732_v48 = vmul.f32 %v4947_v23, %v913_v5  ;;  %v4953_v51 = vld [vmem:[#allocation9_spill] sm:$0xff]  ;;  %v4954_v3 = vld [vmem:[#allocation11_spill] sm:$0xff] }
 0x174   :  { %1403 = vrot.lane.b32.xlu1 %v1380_v9, %s2575_s4  ;;  %1401 = vrot.lane.b32.xlu0 %v1379_v17, %s2575_s4  ;;  %4944 = vst [vmem:[#allocation82_spill] sm:$0xff] %v3715_v30  ;;  %v4951_v9 = vld [vmem:[#allocation17_spill] sm:$0xff]  ;;  %v518_v14 = vadd.f32 %v4952_v45, %v468_v56  ;;  %v543_v63 = vadd.f32 %v3571_v16, %v517_v36  ;;  %v4956_v56 = vld [vmem:[#allocation23_spill] sm:$0xff]  ;;  %v4957_v16 = vld [vmem:[#allocation24_spill] sm:$0xff] }
 0x175   :  { %4948 = vst [vmem:[#allocation8_spill] sm:$0xff] %v3732_v48  ;;  %v519_v17 = vadd.f32 %v4951_v9, %v469_v32  ;;  %v542_v40 = vadd.f32 %v3578_v34, %v516_v1  ;;  %v470_v55 = vadd.f32 %v4954_v3, %v4953_v51  ;;  %v1452_v4 = vmul.f32 %v3720_v11, %v3668_v28  ;;  %v4955_v32 = vld [vmem:[#allocation19_spill] sm:$0xff]  ;;  %v4960_v51 = vld [vmem:[#allocation12_spill] sm:$0xff]  ;;  %v4973_v30 = vld [vmem:[#allocation29_spill] sm:$0xff] }
 0x176   :  { %v3734_v43 = vpop.permute.xlu1 %962  ;;  %v3736_v12 = vpop.permute.xlu0 %960  ;;  %v1451_v23 = vmul.f32 %v3725_v62, %v3668_v28  ;;  %v521_v9 = vadd.f32 %v4955_v32, %v471_v27  ;;  %v593_v45 = vadd.f32 %v4956_v56, %v543_v63  ;;  %v4958_v34 = vld [vmem:[#allocation15_spill] sm:$0xff]  ;;  %v473_v3 = vadd.f32 %v4960_v51, %v423_v60  ;;  %v4961_v63 = vld [vmem:[#allocation20_spill] sm:$0xff]  ;;  %v4964_v51 = vld [vmem:[#allocation37_spill] sm:$0xff] }
 0x177   :  { %4949 = vst [vmem:[#allocation10_spill] sm:$0xff] %v3734_v43  ;;  %4950 = vst [vmem:[#allocation14_spill] sm:$0xff] %v3736_v12  ;;  %v592_v36 = vadd.f32 %v4957_v16, %v542_v40  ;;  %v3756_v1 = vmul.f32 %v4958_v34, %v913_v5  ;;  %v422_v27 = vadd.f32 %v3566_v19, %v394_v58  ;;  %v4962_v32 = vld [vmem:[#allocation16_spill] sm:$0xff]  ;;  %v3781_v12 = vld [vmem:[%s4828_s1 + $0x172] sm:$0xff] }
 0x178   :  { %1467 = vrot.lane.b32.xlu1 %v1450_v33, %s2574_s22  ;;  %1465 = vrot.lane.b32.xlu0 %v1449_v6, %s2574_s22  ;;  %v3761_v33 = vld [vmem:[%s4828_s1 + $0x15a] sm:$0xff]  ;;  %v3766_v6 = vld [vmem:[%s4828_s1 + $0x152] sm:$0xff]  ;;  %v520_v40 = vadd.f32 %v4961_v63, %v470_v55  ;;  %v3772_v56 = vmul.f32 %v4962_v32, %v913_v5  ;;  %v545_v43 = vadd.f32 %v3581_v15, %v519_v17  ;;  %v4966_v63 = vld [vmem:[#allocation13_spill] sm:$0xff] }
 0x179   :  { %4959 = vst [vmem:[#allocation17_spill] sm:$0xff] %v3756_v1  ;;  %v544_v60 = vadd.f32 %v3584_v53, %v518_v14  ;;  %v643_v19 = vadd.f32 %v4964_v51, %v593_v45  ;;  %v4965_v58 = vld [vmem:[#allocation38_spill] sm:$0xff]  ;;  %v472_v5 = vadd.f32 %v4966_v63, %v422_v27  ;;  %v1454_v32 = vmul.f32 %v3761_v33, %v3668_v28  ;;  %v4967_v53 = vld [vmem:[#allocation25_spill] sm:$0xff] }
 0x17a   :  { %4963 = vst [vmem:[#allocation18_spill] sm:$0xff] %v3772_v56  ;;  %v3774_v16 = vpop.permute.xlu1 %1000  ;;  %v3776_v34 = vpop.permute.xlu0 %998  ;;  %v642_v55 = vadd.f32 %v4965_v58, %v592_v36  ;;  %v1453_v56 = vmul.f32 %v3766_v6, %v3668_v28  ;;  %v3795_v15 = vstv %s3705_s0  ;;  %v595_v17 = vadd.f32 %v4967_v53, %v545_v43  ;;  %v4968_v14 = vld [vmem:[#allocation26_spill] sm:$0xff]  ;;  %s4014_s0 = sld [smem:[#allocation3 + $0xb]] }
 0x17b   :  { %v594_v45 = vadd.f32 %v4968_v14, %v544_v60  ;;  %v547_v36 = vadd.f32 %v3587_v57, %v521_v9  ;;  %v1456_v27 = vmul.f32 %v3781_v12, %v3668_v28  ;;  %v4970_v58 = vld [vmem:[#allocation22_spill] sm:$0xff]  ;;  %v546_v1 = vadd.f32 %v3594_v24, %v520_v40  ;;  %v4971_v57 = vld [vmem:[#allocation41_spill] sm:$0xff]  ;;  %v4975_v40 = vld [vmem:[#allocation47_spill] sm:$0xff] }
 0x17c   :  { %1471 = vrot.lane.b32.xlu1 %v1452_v4, %s2574_s22  ;;  %1469 = vrot.lane.b32.xlu0 %v1451_v23, %s2574_s22  ;;  %v3805_v4 = vld [vmem:[%s4828_s1 + $0x16a] sm:$0xff]  ;;  %v522_v63 = vadd.f32 %v4970_v58, %v472_v5  ;;  %v3815_v60 = vstv %s3738_s21  ;;  %v645_v9 = vadd.f32 %v4971_v57, %v595_v17  ;;  %v669_v21 = vadd.f32 %v3604_v25, %v643_v19  ;;  %v4976_v17 = vld [vmem:[#allocation48_spill] sm:$0xff]  ;;  %s2465_s21 = sld [smem:[#allocation3 + $0xd]] }
 0x17d   :  { %v4969_v23 = vld [vmem:[#allocation21_spill] sm:$0xff]  ;;  %v4972_v53 = vld [vmem:[#allocation42_spill] sm:$0xff]  ;;  %v668_v48 = vadd.f32 %v3609_v0, %v642_v55  ;;  %v1455_v24 = vmul.f32 %v3805_v4, %v3668_v28  ;;  %v1500_v25 = vmul.f32 %v3665_v44, %v3815_v60  ;;  %v4977_v0 = vld [vmem:[#allocation27_spill] sm:$0xff] }
 0x17e   :  { %v523_v51 = vadd.f32 %v4969_v23, %v473_v3  ;;  %v3810_v8 = vpop.permute.xlu1 %1004  ;;  %v3812_v43 = vpop.permute.xlu0 %1002  ;;  %v644_v14 = vadd.f32 %v4972_v53, %v594_v45  ;;  %v597_v3 = vadd.f32 %v4973_v30, %v547_v36  ;;  %v4974_v23 = vld [vmem:[#allocation30_spill] sm:$0xff]  ;;  %v719_v58 = vadd.f32 %v4975_v40, %v669_v21  ;;  %v4978_v55 = vld [vmem:[#allocation43_spill] sm:$0xff]  ;;  %v4981_v40 = vld [vmem:[#allocation56_spill] sm:$0xff] }
 0x17f   :  { %v596_v5 = vadd.f32 %v4974_v23, %v546_v1  ;;  %v718_v57 = vadd.f32 %v4976_v17, %v668_v48  ;;  %v3833_v19 = vmul.f32 %v4977_v0, %v3795_v15  ;;  %v548_v1 = vadd.f32 %v3600_v38, %v522_v63  ;;  %v4980_v53 = vld [vmem:[#allocation55_spill] sm:$0xff]  ;;  %v4982_v0 = vld [vmem:[#allocation33_spill] sm:$0xff] }
 0x180   :  { %1475 = vrot.lane.b32.xlu1 %v1454_v32, %s2574_s22  ;;  %1473 = vrot.lane.b32.xlu0 %v1453_v56, %s2574_s22  ;;  %v549_v30 = vadd.f32 %v3597_v7, %v523_v51  ;;  %v647_v56 = vadd.f32 %v4978_v55, %v597_v3  ;;  %v4979_v32 = vld [vmem:[#allocation44_spill] sm:$0xff]  ;;  %v671_v48 = vadd.f32 %v3612_v26, %v645_v9  ;;  %v4983_v51 = vld [vmem:[#allocation34_spill] sm:$0xff]  ;;  %v4984_v3 = vld [vmem:[#allocation49_spill] sm:$0xff] }
 0x181   :  { %v646_v45 = vadd.f32 %v4979_v32, %v596_v5  ;;  %v670_v36 = vadd.f32 %v3615_v2, %v644_v14  ;;  %v769_v23 = vadd.f32 %v4980_v53, %v719_v58  ;;  %v768_v17 = vadd.f32 %v4981_v40, %v718_v57  ;;  %v4985_v26 = vld [vmem:[#allocation50_spill] sm:$0xff]  ;;  %v4986_v2 = vld [vmem:[#allocation28_spill] sm:$0xff]  ;;  %v4987_v57 = vld [vmem:[#allocation45_spill] sm:$0xff] }
 0x182   :  { %v3839_v28 = vpop.permute.xlu1 %1008  ;;  %v3841_v21 = vpop.permute.xlu0 %1006  ;;  %v599_v7 = vadd.f32 %v4982_v0, %v549_v30  ;;  %v598_v38 = vadd.f32 %v4983_v51, %v548_v1  ;;  %v1499_v63 = vmul.f32 %v3673_v52, %v3815_v60  ;;  %v721_v5 = vadd.f32 %v4984_v3, %v671_v48  ;;  %v4988_v30 = vld [vmem:[#allocation46_spill] sm:$0xff] }
 0x183   :  { %v720_v9 = vadd.f32 %v4985_v26, %v670_v36  ;;  %v3857_v14 = vmul.f32 %v4986_v2, %v3795_v15  ;;  %v1502_v58 = vmul.f32 %v3720_v11, %v3815_v60  ;;  %v673_v1 = vadd.f32 %v3618_v47, %v647_v56  ;;  %v4989_v36 = vld [vmem:[#allocation57_spill] sm:$0xff]  ;;  %v4990_v40 = vld [vmem:[#allocation58_spill] sm:$0xff]  ;;  %v4991_v26 = vld [vmem:[#allocation51_spill] sm:$0xff] }
 0x184   :  { %1479 = vrot.lane.b32.xlu1 %v1456_v27, %s2574_s22  ;;  %1477 = vrot.lane.b32.xlu0 %v1455_v24, %s2574_s22  ;;  %v649_v27 = vadd.f32 %v4987_v57, %v599_v7  ;;  %v648_v24 = vadd.f32 %v4988_v30, %v598_v38  ;;  %v672_v55 = vadd.f32 %v3621_v20, %v646_v45  ;;  %v4992_v2 = vld [vmem:[#allocation52_spill] sm:$0xff]  ;;  %v4993_v20 = vld [vmem:[#allocation63_spill] sm:$0xff] }
 0x185   :  { %v771_v53 = vadd.f32 %v4989_v36, %v721_v5  ;;  %v770_v0 = vadd.f32 %v4990_v40, %v720_v9  ;;  %v797_v51 = vadd.f32 %v3630_v31, %v769_v23  ;;  %v796_v3 = vadd.f32 %v3637_v46, %v768_v17  ;;  %v4994_v45 = vld [vmem:[#allocation64_spill] sm:$0xff]  ;;  %v4995_v9 = vld [vmem:[#allocation31_spill] sm:$0xff] }
 0x186   :  { %v3867_v32 = vpop.permute.xlu1 %1012  ;;  %v3869_v48 = vpop.permute.xlu0 %1010  ;;  %v723_v7 = vadd.f32 %v4991_v26, %v673_v1  ;;  %v722_v38 = vadd.f32 %v4992_v2, %v672_v55  ;;  %v1501_v47 = vmul.f32 %v3725_v62, %v3815_v60  ;;  %v3885_v31 = vmul.f32 %v4995_v9, %v3795_v15  ;;  %v4996_v17 = vld [vmem:[#allocation59_spill] sm:$0xff]  ;;  %v4997_v57 = vld [vmem:[#allocation60_spill] sm:$0xff] }
 0x187   :  { %v847_v56 = vadd.f32 %v4993_v20, %v797_v51  ;;  %v846_v5 = vadd.f32 %v4994_v45, %v796_v3  ;;  %v1504_v46 = vmul.f32 %v3761_v33, %v3815_v60  ;;  %v675_v23 = vadd.f32 %v3624_v37, %v649_v27  ;;  %v4998_v51 = vld [vmem:[#allocation71_spill] sm:$0xff]  ;;  %v4999_v26 = vld [vmem:[#allocation72_spill] sm:$0xff]  ;;  %v5000_v37 = vld [vmem:[#allocation53_spill] sm:$0xff] }
 0x188   :  { %1517 = vrot.lane.b32.xlu1 %v1500_v25, %s2575_s4  ;;  %1515 = vrot.lane.b32.xlu0 %v1499_v63, %s2575_s4  ;;  %v674_v25 = vadd.f32 %v3627_v22, %v648_v24  ;;  %v773_v63 = vadd.f32 %v4996_v17, %v723_v7  ;;  %v772_v30 = vadd.f32 %v4997_v57, %v722_v38  ;;  %v5001_v22 = vld [vmem:[#allocation54_spill] sm:$0xff]  ;;  %v5002_v38 = vld [vmem:[#allocation65_spill] sm:$0xff] }
 0x189   :  { %v799_v36 = vadd.f32 %v3640_v35, %v771_v53  ;;  %v798_v40 = vadd.f32 %v3643_v18, %v770_v0  ;;  %v897_v3 = vadd.f32 %v4998_v51, %v847_v56  ;;  %v896_v2 = vadd.f32 %v4999_v26, %v846_v5  ;;  %v5003_v35 = vld [vmem:[#allocation66_spill] sm:$0xff]  ;;  %v5004_v56 = vld [vmem:[#allocation61_spill] sm:$0xff] }
 0x18a   :  { %v3893_v1 = vpop.permute.xlu1 %1076  ;;  %v3895_v55 = vpop.permute.xlu0 %1074  ;;  %v725_v27 = vadd.f32 %v5000_v37, %v675_v23  ;;  %v724_v24 = vadd.f32 %v5001_v22, %v674_v25  ;;  %v1503_v7 = vmul.f32 %v3766_v6, %v3815_v60  ;;  %v1506_v18 = vmul.f32 %v3781_v12, %v3815_v60  ;;  %v5005_v5 = vld [vmem:[#allocation62_spill] sm:$0xff]  ;;  %v3925_v17 = vld [vmem:[%s4828_s1 + $0x188] sm:$0xff]  ;;  %v5010_v22 = vld [vmem:[#allocation79_spill] sm:$0xff] }
 0x18b   :  { %v849_v20 = vadd.f32 %v5002_v38, %v799_v36  ;;  %v848_v53 = vadd.f32 %v5003_v35, %v798_v40  ;;  %v3912_v0 = vstv %s3861_s3  ;;  %v5006_v57 = vld [vmem:[#allocation73_spill] sm:$0xff]  ;;  %v5007_v40 = vld [vmem:[#allocation74_spill] sm:$0xff]  ;;  %v923_v26 = vadd.f32 %v3691_v54, %v897_v3  ;;  %v3946_v3 = vld [vmem:[%s4828_s1 + $0x180] sm:$0xff]  ;;  %s2487_s3 = sld [smem:[#allocation3 + $0x13]] }
 0x18c   :  { %1521 = vrot.lane.b32.xlu1 %v1502_v58, %s2575_s4  ;;  %1519 = vrot.lane.b32.xlu0 %v1501_v47, %s2575_s4  ;;  %v775_v45 = vadd.f32 %v5004_v56, %v725_v27  ;;  %v774_v9 = vadd.f32 %v5005_v5, %v724_v24  ;;  %v801_v58 = vadd.f32 %v3646_v39, %v773_v63  ;;  %v5008_v39 = vld [vmem:[#allocation67_spill] sm:$0xff]  ;;  %v5014_v35 = vld [vmem:[#allocation76_spill] sm:$0xff] }
 0x18d   :  { %v800_v47 = vadd.f32 %v3660_v49, %v772_v30  ;;  %v899_v36 = vadd.f32 %v5006_v57, %v849_v20  ;;  %v898_v51 = vadd.f32 %v5007_v40, %v848_v53  ;;  %v922_v37 = vadd.f32 %v3694_v59, %v896_v2  ;;  %v5009_v49 = vld [vmem:[#allocation68_spill] sm:$0xff]  ;;  %5012 = vst [vmem:[#allocation9_spill] sm:$0xff] %v3946_v3  ;;  %v5017_v57 = vld [vmem:[#allocation70_spill] sm:$0xff] }
 0x18e   :  { %v3918_v23 = vpop.permute.xlu1 %1080  ;;  %v3920_v25 = vpop.permute.xlu0 %1078  ;;  %v851_v63 = vadd.f32 %v5008_v39, %v801_v58  ;;  %v1505_v27 = vmul.f32 %v3805_v4, %v3815_v60  ;;  %v973_v24 = vadd.f32 %v5010_v22, %v923_v26  ;;  %v5011_v20 = vld [vmem:[#allocation32_spill] sm:$0xff]  ;;  %v1578_v59 = vmul.f32 %v3925_v17, %v3912_v0  ;;  %v5013_v60 = vld [vmem:[#allocation75_spill] sm:$0xff]  ;;  %v5021_v39 = vld [vmem:[#allocation78_spill] sm:$0xff] }
 0x18f   :  { %v850_v30 = vadd.f32 %v5009_v49, %v800_v47  ;;  %v972_v38 = vadd.f32 %v3591_v29, %v922_v37  ;;  %v1042_v54 = vmul.f32 %v5011_v20, %v3795_v15  ;;  %v802_v2 = vadd.f32 %v3682_v50, %v774_v9  ;;  %v3959_v5 = vld [vmem:[%s4828_s1 + $0x1a0] sm:$0xff]  ;;  %v5022_v49 = vld [vmem:[#allocation82_spill] sm:$0xff] }
 0x190   :  { %1525 = vrot.lane.b32.xlu1 %v1504_v46, %s2575_s4  ;;  %1523 = vrot.lane.b32.xlu0 %v1503_v7, %s2575_s4  ;;  %v803_v46 = vadd.f32 %v3679_v61, %v775_v45  ;;  %v901_v7 = vadd.f32 %v5013_v60, %v851_v63  ;;  %5015 = vst [vmem:[#allocation11_spill] sm:$0xff] %v3959_v5  ;;  %v5016_v45 = vld [vmem:[#allocation69_spill] sm:$0xff] }
 0x191   :  { %v900_v53 = vadd.f32 %v5014_v35, %v850_v30  ;;  %v925_v58 = vadd.f32 %v3697_v10, %v899_v36  ;;  %v924_v47 = vadd.f32 %v3712_v13, %v898_v51  ;;  %v1023_v61 = vadd.f32 %v3774_v16, %v973_v24  ;;  %v5018_v13 = vld [vmem:[#allocation35_spill] sm:$0xff]  ;;  %v5025_v35 = vld [vmem:[#allocation81_spill] sm:$0xff] }
 0x192   :  { %v3952_v29 = vpop.permute.xlu1 %1084  ;;  %v3954_v56 = vpop.permute.xlu0 %1082  ;;  %v1022_v50 = vadd.f32 %v3776_v34, %v972_v38  ;;  %v853_v9 = vadd.f32 %v5016_v45, %v803_v46  ;;  %v852_v40 = vadd.f32 %v5017_v57, %v802_v2  ;;  %v1577_v26 = vmul.f32 %v3946_v3, %v3912_v0  ;;  %v3980_v36 = vld [vmem:[%s4828_s1 + $0x198] sm:$0xff]  ;;  %v5024_v2 = vld [vmem:[#allocation80_spill] sm:$0xff] }
 0x193   :  { %v975_v37 = vadd.f32 %v3632_v41, %v925_v58  ;;  %v974_v10 = vadd.f32 %v3634_v42, %v924_v47  ;;  %v1045_v16 = vmul.f32 %v5018_v13, %v3795_v15  ;;  %v1580_v34 = vmul.f32 %v3959_v5, %v3912_v0  ;;  %5019 = vst [vmem:[#allocation19_spill] sm:$0xff] %v3980_v36  ;;  %v5023_v41 = vld [vmem:[#allocation8_spill] sm:$0xff]  ;;  %v5029_v47 = vld [vmem:[#allocation17_spill] sm:$0xff] }
 0x194   :  { %1529 = vrot.lane.b32.xlu1 %v1506_v18, %s2575_s4  ;;  %1527 = vrot.lane.b32.xlu0 %v1505_v27, %s2575_s4  ;;  %v5020_v18 = vld [vmem:[#allocation77_spill] sm:$0xff]  ;;  %v902_v63 = vadd.f32 %v5021_v39, %v852_v40  ;;  %v927_v30 = vadd.f32 %v5022_v49, %v901_v7  ;;  %v926_v27 = vadd.f32 %v5023_v41, %v900_v53 }
 0x195   :  { %v903_v51 = vadd.f32 %v5020_v18, %v853_v9  ;;  %v1025_v24 = vadd.f32 %v3810_v8, %v975_v37  ;;  %v1024_v38 = vadd.f32 %v3812_v43, %v974_v10  ;;  %v1049_v20 = vadd.f32 %v3833_v19, %v1023_v61  ;;  %v5026_v43 = vld [vmem:[#allocation36_spill] sm:$0xff]  ;;  %v5030_v61 = vld [vmem:[#allocation18_spill] sm:$0xff] }
 0x196   :  { %v3986_v42 = vpop.permute.xlu1 %1088  ;;  %v3988_v22 = vpop.permute.xlu0 %1086  ;;  %v1048_v46 = vadd.f32 %v3857_v14, %v1022_v50  ;;  %v977_v60 = vadd.f32 %v5024_v2, %v927_v30  ;;  %v976_v58 = vadd.f32 %v5025_v35, %v926_v27  ;;  %v1579_v7 = vmul.f32 %v3980_v36, %v3912_v0  ;;  %v4007_v14 = vld [vmem:[%s4828_s1 + $0x1b8] sm:$0xff] }
 0x197   :  { %v1099_v53 = vadd.f32 %v3893_v1, %v1049_v20  ;;  %v1044_v19 = vmul.f32 %v5026_v43, %v3795_v15  ;;  %5027 = vst [vmem:[#allocation23_spill] sm:$0xff] %v4007_v14  ;;  %v929_v1 = vadd.f32 %v5029_v47, %v903_v51  ;;  %v1051_v40 = vadd.f32 %v3885_v31, %v1025_v24 }
 0x198   :  { %1595 = vrot.lane.b32.xlu1 %v1578_v59, %s2574_s22  ;;  %1593 = vrot.lane.b32.xlu0 %v1577_v26, %s2574_s22  ;;  %v1098_v8 = vadd.f32 %v3895_v55, %v1048_v46  ;;  %v4012_v59 = vld [vmem:[%s4828_s1 + $0x1b0] sm:$0xff]  ;;  %v928_v55 = vadd.f32 %v5030_v61, %v902_v63  ;;  %v1027_v50 = vadd.f32 %v3839_v28, %v977_v60 }
 0x199   :  { %5028 = vst [vmem:[#allocation24_spill] sm:$0xff] %v4012_v59  ;;  %v1026_v45 = vadd.f32 %v3841_v21, %v976_v58  ;;  %v1050_v26 = vadd.f32 %v1042_v54, %v1024_v38  ;;  %v1582_v13 = vmul.f32 %v4007_v14, %v3912_v0  ;;  %v1581_v18 = vmul.f32 %v4012_v59, %v3912_v0  ;;  %v5031_v28 = vld [vmem:[#allocation10_spill] sm:$0xff] }
 0x19a   :  { %v1127_v9 = vpop.permute.xlu1 %1126  ;;  %v1125_v57 = vpop.permute.xlu0 %1124  ;;  %v979_v51 = vadd.f32 %v5031_v28, %v929_v1  ;;  %v5032_v21 = vld [vmem:[#allocation14_spill] sm:$0xff]  ;;  %v1101_v63 = vadd.f32 %v3918_v23, %v1051_v40  ;;  %v1053_v49 = vadd.f32 %v1045_v16, %v1027_v50  ;;  %v5035_v23 = vld [vmem:[#allocation39_spill] sm:$0xff]  ;;  %v1702_v28 = vstv %s2465_s21 }
 0x19b   :  { %v1149_v37 = vadd.f32 %v1127_v9, %v1099_v53  ;;  %v1148_v10 = vadd.f32 %v1125_v57, %v1098_v8  ;;  %v978_v39 = vadd.f32 %v5032_v21, %v928_v55  ;;  %v1100_v31 = vadd.f32 %v3920_v25, %v1050_v26  ;;  %v4036_v54 = vld [vmem:[%s4828_s1 + $0x1d0] sm:$0xff]  ;;  %v5036_v25 = vld [vmem:[#allocation40_spill] sm:$0xff] }
 0x19c   :  { %1599 = vrot.lane.b32.xlu1 %v1580_v34, %s2574_s22  ;;  %1597 = vrot.lane.b32.xlu0 %v1579_v7, %s2574_s22  ;;  %5033 = vst [vmem:[#allocation15_spill] sm:$0xff] %v4036_v54  ;;  %v4041_v34 = vld [vmem:[%s4828_s1 + $0x1c8] sm:$0xff]  ;;  %v1052_v30 = vadd.f32 %v1044_v19, %v1026_v45  ;;  %v1047_v41 = vmul.f32 %v5035_v23, %v3795_v15 }
 0x19d   :  { %1160 = vst.msk [vmem:[#allocation4 + $0x8] sm:$0xff] %vm1158_vm0, %v1149_v37  ;;  %1159 = vst.msk [vmem:[#allocation4] sm:$0xff] %vm1158_vm0, %v1148_v10  ;;  %v1046_v27 = vmul.f32 %v5036_v25, %v3795_v15  ;;  %v1029_v20 = vadd.f32 %v3867_v32, %v979_v51  ;;  %v1028_v46 = vadd.f32 %v3869_v48, %v978_v39  ;;  %v1626_v32 = vstv %s4014_s0  ;;  %v4098_v51 = vld [vmem:[%s4828_s1 + $0x181] sm:$0xff]  ;;  %s2322_s0 = sshll.u32 %s2576_s15, 4  ;;  %s2323_s0 = int_to_ptr.vmem [resolvable:$true] %s2322_s0 }
 0x19e   :  { %5034 = vst [vmem:[#allocation12_spill] sm:$0xff] %v4041_v34  ;;  %v1131_v24 = vpop.permute.xlu1 %1130  ;;  %v1129_v38 = vpop.permute.xlu0 %1128  ;;  %v1584_v16 = vmul.f32 %v4036_v54, %v3912_v0  ;;  %v1583_v35 = vmul.f32 %v4041_v34, %v3912_v0  ;;  %v1103_v15 = vadd.f32 %v3952_v29, %v1053_v49  ;;  %v1102_v58 = vadd.f32 %v3954_v56, %v1052_v30  ;;  %v4111_v49 = vld [vmem:[%s4828_s1 + $0x1a1] sm:$0xff]  ;;  %v4116_v30 = vld [vmem:[%s4828_s1 + $0x199] sm:$0xff]  ;;  %p2554_p6 = scmp.lt.s32.totalorder %s2323_s0, %s2323_s0 }
 0x19f   :  { %v1151_v2 = vadd.f32 %v1131_v24, %v1101_v63  ;;  %v1150_v60 = vadd.f32 %v1129_v38, %v1100_v31  ;;  %v1055_v53 = vadd.f32 %v1047_v41, %v1029_v20  ;;  %v1054_v8 = vadd.f32 %v1046_v27, %v1028_v46  ;;  %5038 = vst [vmem:[#allocation16_spill] sm:$0xff] %v4098_v51  ;;  %v4129_v24 = vld [vmem:[%s4828_s1 + $0x1b9] sm:$0xff]  ;;  %v4134_v38 = vld [vmem:[%s4828_s1 + $0x1b1] sm:$0xff] }
 0x1a0   :  { %1603 = vrot.lane.b32.xlu1 %v1582_v13, %s2574_s22  ;;  %1601 = vrot.lane.b32.xlu0 %v1581_v18, %s2574_s22  ;;  %v1628_v0 = vmul.f32 %v3925_v17, %v1626_v32  ;;  %v1627_v29 = vmul.f32 %v3946_v3, %v1626_v32  ;;  %v1630_v45 = vmul.f32 %v3959_v5, %v1626_v32  ;;  %v4093_v18 = vld [vmem:[%s4828_s1 + $0x189] sm:$0xff] }
 0x1a1   :  { %1162 = vst.msk [vmem:[#allocation4 + $0x18] sm:$0xff] %vm1158_vm0, %v1151_v2  ;;  %1161 = vst.msk [vmem:[#allocation4 + $0x10] sm:$0xff] %vm1158_vm0, %v1150_v60  ;;  %v1105_v56 = vadd.f32 %v3986_v42, %v1055_v53  ;;  %v1104_v47 = vadd.f32 %v3988_v22, %v1054_v8  ;;  %v1629_v9 = vmul.f32 %v3980_v36, %v1626_v32  ;;  %v2522_v36 = vld [vmem:[%s4828_s1 + $0x120] sm:$0xff] }
 0x1a2   :  { %v1135_v48 = vpop.permute.xlu1 %1134  ;;  %v1133_v7 = vpop.permute.xlu0 %1132  ;;  %v1632_v57 = vmul.f32 %v4007_v14, %v1626_v32  ;;  %v1631_v40 = vmul.f32 %v4012_v59, %v1626_v32  ;;  %v1634_v10 = vmul.f32 %v4036_v54, %v1626_v32  ;;  %v1633_v13 = vmul.f32 %v4041_v34, %v1626_v32  ;;  %5037 = vst [vmem:[#allocation20_spill] sm:$0xff] %v4093_v18 }
 0x1a3   :  { %v1153_v43 = vadd.f32 %v1135_v48, %v1103_v15  ;;  %v1152_v19 = vadd.f32 %v1133_v7, %v1102_v58  ;;  %v1704_v63 = vmul.f32 %v4093_v18, %v1702_v28  ;;  %v1703_v31 = vmul.f32 %v4098_v51, %v1702_v28  ;;  %5039 = vst [vmem:[#allocation37_spill] sm:$0xff] %v4111_v49 }
 0x1a4   :  { %1607 = vrot.lane.b32.xlu1 %v1584_v16, %s2574_s22  ;;  %1605 = vrot.lane.b32.xlu0 %v1583_v35, %s2574_s22  ;;  %5040 = vst [vmem:[#allocation38_spill] sm:$0xff] %v4116_v30  ;;  %v1706_v25 = vmul.f32 %v4111_v49, %v1702_v28  ;;  %v1705_v27 = vmul.f32 %v4116_v30, %v1702_v28  ;;  %5041 = vst [vmem:[#allocation13_spill] sm:$0xff] %v4129_v24  ;;  %v4147_v16 = vld [vmem:[%s4828_s1 + $0x1d1] sm:$0xff]  ;;  %v4152_v35 = vld [vmem:[%s4828_s1 + $0x1c9] sm:$0xff] }
 0x1a5   :  { %1164 = vst.msk [vmem:[#allocation4 + $0x28] sm:$0xff] %vm1158_vm0, %v1153_v43  ;;  %1163 = vst.msk [vmem:[#allocation4 + $0x20] sm:$0xff] %vm1158_vm0, %v1152_v19  ;;  %v1708_v2 = vmul.f32 %v4129_v24, %v1702_v28  ;;  %v1707_v60 = vmul.f32 %v4134_v38, %v1702_v28  ;;  %v1710_v32 = vmul.f32 %v4147_v16, %v1702_v28  ;;  %v1752_v7 = vstv %s2466_s8 }
 0x1a6   :  { %v1139_v1 = vpop.permute.xlu1 %1138  ;;  %v1137_v61 = vpop.permute.xlu0 %1136  ;;  %5042 = vst [vmem:[#allocation25_spill] sm:$0xff] %v4134_v38  ;;  %5043 = vst [vmem:[#allocation26_spill] sm:$0xff] %v4147_v16  ;;  %v1709_v48 = vmul.f32 %v4152_v35, %v1702_v28  ;;  %v1754_v43 = vmul.f32 %v4093_v18, %v1752_v7  ;;  %v1753_v19 = vmul.f32 %v4098_v51, %v1752_v7  ;;  %v4202_v28 = vld [vmem:[%s4828_s1 + $0x182] sm:$0xff] }
 0x1a7   :  { %v1155_v55 = vadd.f32 %v1139_v1, %v1105_v56  ;;  %v1154_v50 = vadd.f32 %v1137_v61, %v1104_v47  ;;  %5044 = vst [vmem:[#allocation21_spill] sm:$0xff] %v4152_v35  ;;  %v1756_v56 = vmul.f32 %v4111_v49, %v1752_v7  ;;  %v1755_v47 = vmul.f32 %v4116_v30, %v1752_v7 }
 0x1a8   :  { %1645 = vrot.lane.b32.xlu1 %v1628_v0, %s2575_s4  ;;  %1643 = vrot.lane.b32.xlu0 %v1627_v29, %s2575_s4  ;;  %5048 = vst [vmem:[#allocation29_spill] sm:$0xff] %v4202_v28 }
 0x1a9   :  { %1166 = vst.msk [vmem:[#allocation4 + $0x38] sm:$0xff] %vm1158_vm0, %v1155_v55  ;;  %1165 = vst.msk [vmem:[#allocation4 + $0x30] sm:$0xff] %vm1158_vm0, %v1154_v50  ;;  %v1758_v55 = vmul.f32 %v4129_v24, %v1752_v7  ;;  %v1757_v50 = vmul.f32 %v4134_v38, %v1752_v7 }
 0x1aa   :  { %v4074_v42 = vpop.permute.xlu1 %1215  ;;  %v4076_v22 = vpop.permute.xlu0 %1213 }
 0x1ac   :  { %1649 = vrot.lane.b32.xlu1 %v1630_v45, %s2575_s4  ;;  %1647 = vrot.lane.b32.xlu0 %v1629_v9, %s2575_s4 }
 0x1ae   :  { %v4082_v26 = vpop.permute.xlu1 %1219  ;;  %v4084_v37 = vpop.permute.xlu0 %1217 }
 0x1b0   :  { %1653 = vrot.lane.b32.xlu1 %v1632_v57, %s2575_s4  ;;  %1651 = vrot.lane.b32.xlu0 %v1631_v40, %s2575_s4  ;;  %v1760_v57 = vmul.f32 %v4147_v16, %v1752_v7  ;;  %v1759_v40 = vmul.f32 %v4152_v35, %v1752_v7  ;;  %v1878_v16 = vstv %s2477_s26 }
 0x1b1   :  { %v1879_v49 = vmul.f32 %v4202_v28, %v1878_v16 }
 0x1b2   :  { %v4100_v21 = vpop.permute.xlu1 %1223  ;;  %v4102_v39 = vpop.permute.xlu0 %1221 }
 0x1b4   :  { %1657 = vrot.lane.b32.xlu1 %v1634_v10, %s2575_s4  ;;  %1655 = vrot.lane.b32.xlu0 %v1633_v13, %s2575_s4  ;;  %v4197_v10 = vld [vmem:[%s4828_s1 + $0x18a] sm:$0xff]  ;;  %v1828_v13 = vstv %s2476_s13 }
 0x1b5   :  { %5047 = vst [vmem:[#allocation42_spill] sm:$0xff] %v4197_v10  ;;  %v1880_v30 = vmul.f32 %v4197_v10, %v1878_v16 }
 0x1b6   :  { %v4118_v23 = vpop.permute.xlu1 %1227  ;;  %v4120_v41 = vpop.permute.xlu0 %1225 }
 0x1b8   :  { %1721 = vrot.lane.b32.xlu1 %v1704_v63, %s2574_s22  ;;  %1719 = vrot.lane.b32.xlu0 %v1703_v31, %s2574_s22 }
 0x1ba   :  { %v4136_v20 = vpop.permute.xlu1 %1265  ;;  %v4138_v46 = vpop.permute.xlu0 %1263 }
 0x1bc   :  { %1725 = vrot.lane.b32.xlu1 %v1706_v25, %s2574_s22  ;;  %1723 = vrot.lane.b32.xlu0 %v1705_v27, %s2574_s22  ;;  %v1830_v25 = vmul.f32 %v4197_v10, %v1828_v13  ;;  %v1829_v27 = vmul.f32 %v4202_v28, %v1828_v13 }
 0x1be   :  { %v4154_v15 = vpop.permute.xlu1 %1269  ;;  %v4156_v58 = vpop.permute.xlu0 %1267 }
 0x1c0   :  { %1729 = vrot.lane.b32.xlu1 %v1708_v2, %s2574_s22  ;;  %1727 = vrot.lane.b32.xlu0 %v1707_v60, %s2574_s22  ;;  %v4215_v2 = vld [vmem:[%s4828_s1 + $0x1a2] sm:$0xff]  ;;  %v4220_v60 = vld [vmem:[%s4828_s1 + $0x19a] sm:$0xff] }
 0x1c1   :  { %5051 = vst [vmem:[#allocation48_spill] sm:$0xff] %v4215_v2  ;;  %5052 = vst [vmem:[#allocation27_spill] sm:$0xff] %v4220_v60  ;;  %v1832_v7 = vmul.f32 %v4215_v2, %v1828_v13  ;;  %v1881_v51 = vmul.f32 %v4220_v60, %v1878_v16 }
 0x1c2   :  { %v4162_v53 = vpop.permute.xlu1 %1273  ;;  %v4164_v8 = vpop.permute.xlu0 %1271 }
 0x1c4   :  { %1733 = vrot.lane.b32.xlu1 %v1710_v32, %s2574_s22  ;;  %1731 = vrot.lane.b32.xlu0 %v1709_v48, %s2574_s22 }
 0x1c6   :  { %v4170_v0 = vpop.permute.xlu1 %1277  ;;  %v4172_v29 = vpop.permute.xlu0 %1275 }
 0x1c8   :  { %1771 = vrot.lane.b32.xlu1 %v1754_v43, %s2575_s4  ;;  %1769 = vrot.lane.b32.xlu0 %v1753_v19, %s2575_s4  ;;  %v1831_v43 = vmul.f32 %v4220_v60, %v1828_v13  ;;  %v4233_v19 = vld [vmem:[%s4828_s1 + $0x1ba] sm:$0xff] }
 0x1c9   :  { %5053 = vst [vmem:[#allocation43_spill] sm:$0xff] %v4233_v19  ;;  %v1884_v28 = vmul.f32 %v4233_v19, %v1878_v16 }
 0x1ca   :  { %v4178_v1 = vpop.permute.xlu1 %1341  ;;  %v4180_v61 = vpop.permute.xlu0 %1339 }
 0x1cc   :  { %1775 = vrot.lane.b32.xlu1 %v1756_v56, %s2575_s4  ;;  %1773 = vrot.lane.b32.xlu0 %v1755_v47, %s2575_s4  ;;  %v4238_v56 = vld [vmem:[%s4828_s1 + $0x1b2] sm:$0xff] }
 0x1cd   :  { %5054 = vst [vmem:[#allocation44_spill] sm:$0xff] %v4238_v56  ;;  %v1883_v10 = vmul.f32 %v4238_v56, %v1878_v16 }
 0x1ce   :  { %v4186_v45 = vpop.permute.xlu1 %1345  ;;  %v4188_v9 = vpop.permute.xlu0 %1343 }
 0x1cf   :  { %5045 = vst [vmem:[#allocation22_spill] sm:$0xff] %v4186_v45  ;;  %5046 = vst [vmem:[#allocation41_spill] sm:$0xff] %v4188_v9  ;;  %v2535_v45 = vld [vmem:[%s4828_s1 + $0x171] sm:$0xff] }
 0x1d0   :  { %1779 = vrot.lane.b32.xlu1 %v1758_v55, %s2575_s4  ;;  %1777 = vrot.lane.b32.xlu0 %v1757_v50, %s2575_s4  ;;  %v1834_v50 = vmul.f32 %v4233_v19, %v1828_v13  ;;  %v4330_v19 = vld [vmem:[%s4828_s1 + $0x1f8] sm:$0xff] }
 0x1d2   :  { %v4204_v63 = vpop.permute.xlu1 %1349  ;;  %v4206_v31 = vpop.permute.xlu0 %1347 }
 0x1d3   :  { %5049 = vst [vmem:[#allocation30_spill] sm:$0xff] %v4204_v63  ;;  %5050 = vst [vmem:[#allocation47_spill] sm:$0xff] %v4206_v31  ;;  %v1430_v63 = vstv %s4314_s11 }
 0x1d4   :  { %1783 = vrot.lane.b32.xlu1 %v1760_v57, %s2575_s4  ;;  %1781 = vrot.lane.b32.xlu0 %v1759_v40, %s2575_s4  ;;  %v1833_v57 = vmul.f32 %v4238_v56, %v1828_v13  ;;  %v4251_v40 = vld [vmem:[%s4828_s1 + $0x1d2] sm:$0xff]  ;;  %v4308_v56 = vld [vmem:[%s4828_s1 + $0x1e0] sm:$0xff] }
 0x1d5   :  { %5057 = vst [vmem:[#allocation33_spill] sm:$0xff] %v4251_v40  ;;  %v1886_v60 = vmul.f32 %v4251_v40, %v1878_v16 }
 0x1d6   :  { %v4222_v32 = vpop.permute.xlu1 %1353  ;;  %v4224_v48 = vpop.permute.xlu0 %1351 }
 0x1d8   :  { %1847 = vrot.lane.b32.xlu1 %v1830_v25, %s2574_s22  ;;  %1845 = vrot.lane.b32.xlu0 %v1829_v27, %s2574_s22  ;;  %v4256_v25 = vld [vmem:[%s4828_s1 + $0x1ca] sm:$0xff] }
 0x1d9   :  { %5058 = vst [vmem:[#allocation34_spill] sm:$0xff] %v4256_v25 }
 0x1da   :  { %v4240_v47 = vpop.permute.xlu1 %1391  ;;  %v4242_v55 = vpop.permute.xlu0 %1389 }
 0x1db   :  { %5055 = vst [vmem:[#allocation55_spill] sm:$0xff] %v4240_v47  ;;  %5056 = vst [vmem:[#allocation56_spill] sm:$0xff] %v4242_v55 }
 0x1dc   :  { %1851 = vrot.lane.b32.xlu1 %v1832_v7, %s2574_s22  ;;  %1849 = vrot.lane.b32.xlu0 %v1831_v43, %s2574_s22  ;;  %v1836_v7 = vmul.f32 %v4251_v40, %v1828_v13  ;;  %v1835_v43 = vmul.f32 %v4256_v25, %v1828_v13  ;;  %v1882_v13 = vmul.f32 %v4215_v2, %v1878_v16  ;;  %v4325_v40 = vld [vmem:[%s4828_s1 + $0x200] sm:$0xff] }
 0x1dd   :  { %v1885_v2 = vmul.f32 %v4256_v25, %v1878_v16 }
 0x1de   :  { %v4258_v27 = vpop.permute.xlu1 %1395  ;;  %v4260_v35 = vpop.permute.xlu0 %1393 }
 0x1df   :  { %5059 = vst [vmem:[#allocation49_spill] sm:$0xff] %v4258_v27  ;;  %5060 = vst [vmem:[#allocation50_spill] sm:$0xff] %v4260_v35  ;;  %v2531_v35 = vld [vmem:[%s4828_s1 + $0x141] sm:$0xff] }
 0x1e0   :  { %1855 = vrot.lane.b32.xlu1 %v1834_v50, %s2574_s22  ;;  %1853 = vrot.lane.b32.xlu0 %v1833_v57, %s2574_s22 }
 0x1e2   :  { %v4266_v38 = vpop.permute.xlu1 %1399  ;;  %v4268_v24 = vpop.permute.xlu0 %1397 }
 0x1e3   :  { %5061 = vst [vmem:[#allocation28_spill] sm:$0xff] %v4266_v38  ;;  %5062 = vst [vmem:[#allocation45_spill] sm:$0xff] %v4268_v24  ;;  %v2523_v24 = vld [vmem:[%s4828_s1 + $0x140] sm:$0xff] }
 0x1e4   :  { %1859 = vrot.lane.b32.xlu1 %v1836_v7, %s2574_s22  ;;  %1857 = vrot.lane.b32.xlu0 %v1835_v43, %s2574_s22 }
 0x1e6   :  { %v4274_v50 = vpop.permute.xlu1 %1403  ;;  %v4276_v57 = vpop.permute.xlu0 %1401 }
 0x1e8   :  { %1897 = vrot.lane.b32.xlu1 %v1880_v30, %s2575_s4  ;;  %1895 = vrot.lane.b32.xlu0 %v1879_v49, %s2575_s4 }
 0x1ea   :  { %v4282_v7 = vpop.permute.xlu1 %1467  ;;  %v4284_v43 = vpop.permute.xlu0 %1465 }
 0x1eb   :  { %5063 = vst [vmem:[#allocation46_spill] sm:$0xff] %v4282_v7  ;;  %5064 = vst [vmem:[#allocation57_spill] sm:$0xff] %v4284_v43  ;;  %v2525_v7 = vld [vmem:[%s4828_s1 + $0x170] sm:$0xff] }
 0x1ec   :  { %1901 = vrot.lane.b32.xlu1 %v1882_v13, %s2575_s4  ;;  %1899 = vrot.lane.b32.xlu0 %v1881_v51, %s2575_s4  ;;  %v4301_v51 = vld [vmem:[%s4828_s1 + $0x1e8] sm:$0xff]  ;;  %v4303_v13 = vstv %s2487_s3 }
 0x1ed   :  { %v1958_v16 = vmul.f32 %v4301_v51, %v4303_v13  ;;  %v1957_v25 = vmul.f32 %v4308_v56, %v4303_v13  ;;  %v1960_v59 = vmul.f32 %v4325_v40, %v4303_v13  ;;  %v1959_v14 = vmul.f32 %v4330_v19, %v4303_v13 }
 0x1ee   :  { %v4290_v30 = vpop.permute.xlu1 %1471  ;;  %v4292_v49 = vpop.permute.xlu0 %1469 }
 0x1ef   :  { %5065 = vst [vmem:[#allocation58_spill] sm:$0xff] %v4290_v30  ;;  %5066 = vst [vmem:[#allocation51_spill] sm:$0xff] %v4292_v49  ;;  %v1304_v49 = vstv %s2431_s10  ;;  %s2475_s10 = sld [smem:[#allocation3 + $0xf]] }
 0x1f0   :  { %1905 = vrot.lane.b32.xlu1 %v1884_v28, %s2575_s4  ;;  %1903 = vrot.lane.b32.xlu0 %v1883_v10, %s2575_s4  ;;  %v4404_v27 = vmul.f32 %v2531_v35, %v1304_v49  ;;  %v2533_v35 = vld [vmem:[%s4828_s1 + $0x159] sm:$0xff]  ;;  %v1312_v54 = vmul.f32 %v2535_v45, %v1304_v49 }
 0x1f1   :  { %v4424_v34 = vmul.f32 %v2533_v35, %v1304_v49 }
 0x1f2   :  { %v4310_v28 = vpop.permute.xlu1 %1475  ;;  %v4312_v10 = vpop.permute.xlu0 %1473 }
 0x1f3   :  { %5067 = vst [vmem:[#allocation52_spill] sm:$0xff] %v4310_v28  ;;  %5068 = vst [vmem:[#allocation63_spill] sm:$0xff] %v4312_v10  ;;  %v4347_v10 = vld [vmem:[%s4828_s1 + $0x218] sm:$0xff]  ;;  %v4352_v28 = vld [vmem:[%s4828_s1 + $0x210] sm:$0xff] }
 0x1f4   :  { %1909 = vrot.lane.b32.xlu1 %v1886_v60, %s2575_s4  ;;  %1907 = vrot.lane.b32.xlu0 %v1885_v2, %s2575_s4  ;;  %v1178_v2 = vstv %s1177_s5  ;;  %5071 = vst [vmem:[#allocation59_spill] sm:$0xff] %v4347_v10  ;;  %5072 = vst [vmem:[#allocation60_spill] sm:$0xff] %v4352_v28 }
 0x1f5   :  { %v1179_v5 = vmul.f32 %v2522_v36, %v1178_v2  ;;  %v1182_v38 = vmul.f32 %v2523_v24, %v1178_v2  ;;  %v1186_v36 = vmul.f32 %v2525_v7, %v1178_v2  ;;  %v2527_v24 = vld [vmem:[%s4828_s1 + $0x158] sm:$0xff]  ;;  %v1962_v7 = vmul.f32 %v4347_v10, %v4303_v13  ;;  %5075 = vst [vmem:[#allocation53_spill] sm:$0xff] %v4424_v34  ;;  %v2536_v34 = vld [vmem:[%s4828_s1 + $0x169] sm:$0xff] }
 0x1f6   :  { %v4332_v18 = vpop.permute.xlu1 %1479  ;;  %v4334_v60 = vpop.permute.xlu0 %1477  ;;  %v4381_v31 = vmul.f32 %v2527_v24, %v1178_v2  ;;  %v2529_v24 = vld [vmem:[%s4828_s1 + $0x129] sm:$0xff]  ;;  %v1311_v47 = vmul.f32 %v2536_v34, %v1304_v49 }
 0x1f7   :  { %5069 = vst [vmem:[#allocation64_spill] sm:$0xff] %v4332_v18  ;;  %5070 = vst [vmem:[#allocation31_spill] sm:$0xff] %v4334_v60  ;;  %v1306_v18 = vmul.f32 %v2529_v24, %v1304_v49  ;;  %v2532_v24 = vld [vmem:[%s4828_s1 + $0x139] sm:$0xff]  ;;  %v1244_v55 = vadd.f32 %v4118_v23, %v1186_v36  ;;  %v4466_v36 = vmul.f32 %v3725_v62, %v1430_v63 }
 0x1f8   :  { %1975 = vrot.lane.b32.xlu1 %v1958_v16, %s2574_s22  ;;  %1973 = vrot.lane.b32.xlu0 %v1957_v25, %s2574_s22  ;;  %v2521_v25 = vld [vmem:[%s4828_s1 + $0x128] sm:$0xff]  ;;  %v1240_v62 = vadd.f32 %v4082_v26, %v1182_v38 }
 0x1f9   :  { %v1180_v16 = vmul.f32 %v2521_v25, %v1178_v2  ;;  %v2524_v25 = vld [vmem:[%s4828_s1 + $0x138] sm:$0xff] }
 0x1fa   :  { %v4360_v30 = vpop.permute.xlu1 %1517  ;;  %v4362_v3 = vpop.permute.xlu0 %1515  ;;  %v1181_v43 = vmul.f32 %v2524_v25, %v1178_v2  ;;  %v1961_v25 = vmul.f32 %v4352_v28, %v4303_v13  ;;  %v2534_v28 = vld [vmem:[%s4828_s1 + $0x151] sm:$0xff] }
 0x1fb   :  { %5073 = vst [vmem:[#allocation71_spill] sm:$0xff] %v4360_v30  ;;  %5074 = vst [vmem:[#allocation72_spill] sm:$0xff] %v4362_v3  ;;  %v2526_v30 = vld [vmem:[%s4828_s1 + $0x168] sm:$0xff]  ;;  %v4429_v9 = vmul.f32 %v2534_v28, %v1304_v49  ;;  %v4444_v28 = vmul.f32 %v3665_v44, %v1430_v63  ;;  %v1238_v34 = vadd.f32 %v4074_v42, %v1180_v16 }
 0x1fc   :  { %v1185_v3 = vmul.f32 %v2526_v30, %v1178_v2  ;;  %1979 = vrot.lane.b32.xlu1 %v1960_v59, %s2574_s22  ;;  %1977 = vrot.lane.b32.xlu0 %v1959_v14, %s2574_s22  ;;  %v2528_v30 = vld [vmem:[%s4828_s1 + $0x150] sm:$0xff]  ;;  %v2530_v14 = vld [vmem:[%s4828_s1 + $0x121] sm:$0xff]  ;;  %v1237_v44 = vadd.f32 %v4076_v22, %v1179_v5  ;;  %v1290_v16 = vadd.f32 %v4154_v15, %v1240_v62 }
 0x1fd   :  { %v4393_v60 = vmul.f32 %v2528_v30, %v1178_v2  ;;  %v1305_v59 = vmul.f32 %v2530_v14, %v1304_v49  ;;  %v4409_v2 = vld [vmem:[%s4828_s1 + $0x230] sm:$0xff]  ;;  %v4414_v30 = vld [vmem:[%s4828_s1 + $0x228] sm:$0xff]  ;;  %v4419_v14 = vmul.f32 %v2532_v24, %v1304_v49  ;;  %5076 = vst [vmem:[#allocation54_spill] sm:$0xff] %v4429_v9  ;;  %v4447_v9 = vmul.f32 %v3673_v52, %v1430_v63 }
 0x1fe   :  { %v4434_v24 = vpop.permute.xlu1 %1521  ;;  %v4436_v10 = vpop.permute.xlu0 %1519  ;;  %v1243_v35 = vadd.f32 %v4120_v41, %v1185_v3  ;;  %v1964_v23 = vmul.f32 %v4409_v2, %v4303_v13  ;;  %v1963_v3 = vmul.f32 %v4414_v30, %v4303_v13  ;;  %v4456_v41 = vstv %s4342_s16  ;;  %s4511_s16 = sld [smem:[#allocation3 + $0x16]] }
 0x1ff   :  { %v1294_v52 = vadd.f32 %v4170_v0, %v1244_v55  ;;  %v4463_v49 = vmul.f32 %v3720_v11, %v1430_v63  ;;  %v4472_v13 = vmul.f32 %v3766_v6, %v1430_v63  ;;  %v1288_v5 = vadd.f32 %v4136_v20, %v1238_v34  ;;  %v5078_v34 = vld [vmem:[#allocation56_spill] sm:$0xff] }
 0x200   :  { %1983 = vrot.lane.b32.xlu1 %v1962_v7, %s2574_s22  ;;  %1981 = vrot.lane.b32.xlu0 %v1961_v25, %s2574_s22  ;;  %v1293_v45 = vadd.f32 %v4172_v29, %v1243_v35  ;;  %v4469_v7 = vmul.f32 %v3761_v33, %v1430_v63  ;;  %v1287_v22 = vadd.f32 %v4138_v46, %v1237_v44  ;;  %v4483_v0 = vstv %s4376_s6 }
 0x201   :  { %v2008_v11 = vmul.f32 %v4301_v51, %v4456_v41  ;;  %v1239_v33 = vadd.f32 %v4084_v37, %v1181_v43  ;;  %v2007_v6 = vmul.f32 %v4308_v56, %v4456_v41  ;;  %v1320_v29 = vadd.f32 %v1312_v54, %v1294_v52  ;;  %v5081_v52 = vld [vmem:[#allocation22_spill] sm:$0xff] }
 0x202   :  { %v4474_v25 = vpop.permute.xlu1 %1525  ;;  %v4476_v42 = vpop.permute.xlu0 %1523  ;;  %v1319_v20 = vadd.f32 %v1311_v47, %v1293_v45  ;;  %v1438_v46 = vmul.f32 %v3781_v12, %v1430_v63  ;;  %v1437_v55 = vmul.f32 %v3805_v4, %v1430_v63  ;;  %v4497_v37 = vmul.f32 %v3925_v17, %v4483_v0  ;;  %v5082_v45 = vld [vmem:[#allocation41_spill] sm:$0xff] }
 0x203   :  { %v1289_v35 = vadd.f32 %v4156_v58, %v1239_v33  ;;  %v2010_v43 = vmul.f32 %v4325_v40, %v4456_v41  ;;  %v1313_v54 = vadd.f32 %v1305_v59, %v1287_v22  ;;  %v1370_v47 = vadd.f32 %v4222_v32, %v1320_v29  ;;  %v5084_v33 = vld [vmem:[#allocation12_spill] sm:$0xff]  ;;  %v5085_v29 = vld [vmem:[#allocation53_spill] sm:$0xff] }
 0x204   :  { %1987 = vrot.lane.b32.xlu1 %v1964_v23, %s2574_s22  ;;  %1985 = vrot.lane.b32.xlu0 %v1963_v3, %s2574_s22  ;;  %v1314_v23 = vadd.f32 %v1306_v18, %v1288_v5  ;;  %v1369_v12 = vadd.f32 %v4224_v48, %v1319_v20  ;;  %v1242_v4 = vadd.f32 %v4100_v21, %v4381_v31  ;;  %v5077_v3 = vld [vmem:[#allocation55_spill] sm:$0xff] }
 0x205   :  { %v1241_v15 = vadd.f32 %v4102_v39, %v4393_v60  ;;  %v2009_v17 = vmul.f32 %v4330_v19, %v4456_v41  ;;  %v1363_v58 = vadd.f32 %v4180_v61, %v1313_v54  ;;  %v1420_v63 = vadd.f32 %v4274_v50, %v1370_v47  ;;  %v5079_v50 = vld [vmem:[#allocation59_spill] sm:$0xff]  ;;  %v5088_v54 = vld [vmem:[#allocation50_spill] sm:$0xff] }
 0x206   :  { %v1530_v26 = vpop.permute.xlu1 %1529  ;;  %v1528_v38 = vpop.permute.xlu0 %1527  ;;  %v1364_v18 = vadd.f32 %v4178_v1, %v1314_v23  ;;  %v1419_v21 = vadd.f32 %v4276_v57, %v1369_v12  ;;  %v1292_v31 = vadd.f32 %v4162_v53, %v1242_v4  ;;  %v1316_v32 = vadd.f32 %v4404_v27, %v1290_v16  ;;  %v5080_v57 = vld [vmem:[#allocation15_spill] sm:$0xff]  ;;  %v5086_v16 = vld [vmem:[#allocation54_spill] sm:$0xff]  ;;  %v5087_v23 = vld [vmem:[#allocation49_spill] sm:$0xff] }
 0x207   :  { %v1291_v39 = vadd.f32 %v4164_v8, %v1241_v15  ;;  %v1315_v48 = vadd.f32 %v4419_v14, %v1289_v35  ;;  %v1413_v61 = vadd.f32 %v5078_v34, %v1363_v58  ;;  %v2012_v44 = vmul.f32 %v5079_v50, %v4456_v41  ;;  %v5083_v14 = vld [vmem:[#allocation60_spill] sm:$0xff] }
 0x208   :  { %2025 = vrot.lane.b32.xlu1 %v2008_v11, %s2575_s4  ;;  %2023 = vrot.lane.b32.xlu0 %v2007_v6, %s2575_s4  ;;  %v1414_v1 = vadd.f32 %v5077_v3, %v1364_v18  ;;  %v1566_v53 = vmul.f32 %v5080_v57, %v4483_v0  ;;  %v1366_v8 = vadd.f32 %v5081_v52, %v1316_v32  ;;  %v5089_v15 = vld [vmem:[#allocation64_spill] sm:$0xff]  ;;  %v5090_v18 = vld [vmem:[#allocation31_spill] sm:$0xff] }
 0x209   :  { %v1365_v27 = vadd.f32 %v5082_v45, %v1315_v48  ;;  %v2011_v5 = vmul.f32 %v5083_v14, %v4456_v41  ;;  %v1446_v22 = vadd.f32 %v1438_v46, %v1420_v63  ;;  %v1445_v11 = vadd.f32 %v1437_v55, %v1419_v21  ;;  %v5091_v63 = vld [vmem:[#allocation30_spill] sm:$0xff]  ;;  %v5095_v52 = vld [vmem:[#allocation28_spill] sm:$0xff] }
 0x20a   :  { %v4521_v60 = vpop.permute.xlu1 %1595  ;;  %v4523_v59 = vpop.permute.xlu0 %1593  ;;  %v2014_v62 = vmul.f32 %v4409_v2, %v4456_v41  ;;  %v1565_v6 = vmul.f32 %v5084_v33, %v4483_v0  ;;  %v1318_v20 = vadd.f32 %v5085_v29, %v1292_v31  ;;  %v1317_v35 = vadd.f32 %v5086_v16, %v1291_v39  ;;  %v5092_v31 = vld [vmem:[#allocation47_spill] sm:$0xff]  ;;  %v5093_v48 = vld [vmem:[#allocation46_spill] sm:$0xff] }
 0x20b   :  { %v1415_v47 = vadd.f32 %v5088_v54, %v1365_v27  ;;  %v1440_v46 = vadd.f32 %v4444_v28, %v1414_v1  ;;  %v1439_v55 = vadd.f32 %v4447_v9, %v1413_v61  ;;  %v1495_v58 = vadd.f32 %v5090_v18, %v1445_v11  ;;  %v4562_v28 = vld [vmem:[%s4828_s1 + $0x1e9] sm:$0xff]  ;;  %v5097_v33 = vld [vmem:[#allocation71_spill] sm:$0xff] }
 0x20c   :  { %2029 = vrot.lane.b32.xlu1 %v2010_v43, %s2575_s4  ;;  %2027 = vrot.lane.b32.xlu0 %v2009_v17, %s2575_s4  ;;  %v1416_v43 = vadd.f32 %v5087_v23, %v1366_v8  ;;  %v1496_v17 = vadd.f32 %v5089_v15, %v1446_v22  ;;  %v1368_v21 = vadd.f32 %v5091_v63, %v1318_v20  ;;  %v4565_v9 = vstv %s4511_s16  ;;  %v5094_v1 = vld [vmem:[#allocation57_spill] sm:$0xff]  ;;  %v5100_v23 = vld [vmem:[#allocation58_spill] sm:$0xff] }
 0x20d   :  { %v1367_v39 = vadd.f32 %v5092_v31, %v1317_v35  ;;  %v2013_v32 = vmul.f32 %v4414_v30, %v4456_v41  ;;  %v1490_v3 = vadd.f32 %v5093_v48, %v1440_v46  ;;  %v1489_v34 = vadd.f32 %v5094_v1, %v1439_v55  ;;  %v5096_v8 = vld [vmem:[#allocation45_spill] sm:$0xff]  ;;  %v5101_v46 = vld [vmem:[#allocation51_spill] sm:$0xff] }
 0x20e   :  { %v4545_v12 = vpop.permute.xlu1 %1599  ;;  %v4547_v4 = vpop.permute.xlu0 %1597  ;;  %v1546_v61 = vadd.f32 %v1530_v26, %v1496_v17  ;;  %v1545_v57 = vadd.f32 %v1528_v38, %v1495_v58  ;;  %v1418_v41 = vadd.f32 %v5095_v52, %v1368_v21  ;;  %v1442_v27 = vadd.f32 %v4463_v49, %v1416_v43  ;;  %v5098_v38 = vld [vmem:[#allocation72_spill] sm:$0xff]  ;;  %v5099_v20 = vld [vmem:[#allocation9_spill] sm:$0xff]  ;;  %v5102_v43 = vld [vmem:[#allocation11_spill] sm:$0xff] }
 0x20f   :  { %v1417_v45 = vadd.f32 %v5096_v8, %v1367_v39  ;;  %v1540_v26 = vadd.f32 %v5097_v33, %v1490_v3  ;;  %v1539_v29 = vadd.f32 %v5098_v38, %v1489_v34  ;;  %v1559_v16 = vmul.f32 %v5099_v20, %v4483_v0  ;;  %v5103_v55 = vld [vmem:[#allocation19_spill] sm:$0xff]  ;;  %v4601_v58 = vld [vmem:[%s4828_s1 + $0x201] sm:$0xff] }
 0x210   :  { %2033 = vrot.lane.b32.xlu1 %v2012_v44, %s2575_s4  ;;  %2031 = vrot.lane.b32.xlu0 %v2011_v5, %s2575_s4  ;;  %v4572_v44 = vld [vmem:[%s4828_s1 + $0x1e1] sm:$0xff]  ;;  %v1441_v5 = vadd.f32 %v4466_v36, %v1415_v47  ;;  %v2084_v35 = vmul.f32 %v4562_v28, %v4565_v9  ;;  %v1492_v54 = vadd.f32 %v5100_v23, %v1442_v27  ;;  %v4626_v52 = vld [vmem:[%s4828_s1 + $0x219] sm:$0xff] }
 0x211   :  { %v2083_v36 = vmul.f32 %v4572_v44, %v4565_v9  ;;  %v1562_v47 = vmul.f32 %v5102_v43, %v4483_v0  ;;  %v1561_v15 = vmul.f32 %v5103_v55, %v4483_v0  ;;  %v1574_v17 = vadd.f32 %v1566_v53, %v1546_v61  ;;  %v5106_v27 = vld [vmem:[#allocation23_spill] sm:$0xff] }
 0x212   :  { %v4578_v22 = vpop.permute.xlu1 %1603  ;;  %v4580_v11 = vpop.permute.xlu0 %1601  ;;  %v1491_v49 = vadd.f32 %v5101_v46, %v1441_v5  ;;  %v1573_v18 = vadd.f32 %v1565_v6, %v1545_v57  ;;  %v1444_v63 = vadd.f32 %v4469_v7, %v1418_v41  ;;  %v1443_v21 = vadd.f32 %v4472_v13, %v1417_v45  ;;  %v4631_v41 = vld [vmem:[%s4828_s1 + $0x211] sm:$0xff] }
 0x213   :  { %v1542_v31 = vadd.f32 %v4434_v24, %v1492_v54  ;;  %v1567_v48 = vadd.f32 %v1559_v16, %v1539_v29  ;;  %v2086_v7 = vmul.f32 %v4601_v58, %v4565_v9  ;;  %v5104_v24 = vld [vmem:[#allocation52_spill] sm:$0xff]  ;;  %v1564_v5 = vmul.f32 %v5106_v27, %v4483_v0  ;;  %v5111_v27 = vld [vmem:[#allocation38_spill] sm:$0xff] }
 0x214   :  { %2037 = vrot.lane.b32.xlu1 %v2014_v62, %s2575_s4  ;;  %2035 = vrot.lane.b32.xlu0 %v2013_v32, %s2575_s4  ;;  %v4606_v62 = vld [vmem:[%s4828_s1 + $0x1f9] sm:$0xff]  ;;  %v1541_v39 = vadd.f32 %v4436_v10, %v1491_v49  ;;  %v1568_v32 = vadd.f32 %v4497_v37, %v1540_v26  ;;  %v1494_v34 = vadd.f32 %v5104_v24, %v1444_v63 }
 0x215   :  { %v2085_v13 = vmul.f32 %v4606_v62, %v4565_v9  ;;  %v5105_v10 = vld [vmem:[#allocation63_spill] sm:$0xff]  ;;  %v1617_v37 = vadd.f32 %v4523_v59, %v1567_v48  ;;  %v1570_v8 = vadd.f32 %v1562_v47, %v1542_v31  ;;  %v2087_v23 = vmul.f32 %v4631_v41, %v4565_v9  ;;  %v5108_v48 = vld [vmem:[#allocation20_spill] sm:$0xff] }
 0x216   :  { %v1608_v53 = vpop.permute.xlu1 %1607  ;;  %v1606_v6 = vpop.permute.xlu0 %1605  ;;  %v1493_v61 = vadd.f32 %v5105_v10, %v1443_v21  ;;  %v1618_v57 = vadd.f32 %v4521_v60, %v1568_v32  ;;  %v1569_v45 = vadd.f32 %v1561_v15, %v1541_v39  ;;  %v5107_v60 = vld [vmem:[#allocation24_spill] sm:$0xff]  ;;  %v1544_v38 = vadd.f32 %v4474_v25, %v1494_v34  ;;  %v4652_v25 = vld [vmem:[%s4828_s1 + $0x231] sm:$0xff] }
 0x217   :  { %v1624_v3 = vadd.f32 %v1608_v53, %v1574_v17  ;;  %v1623_v1 = vadd.f32 %v1606_v6, %v1573_v18  ;;  %v1563_v59 = vmul.f32 %v5107_v60, %v4483_v0  ;;  %v1620_v0 = vadd.f32 %v4545_v12, %v1570_v8  ;;  %v5110_v8 = vld [vmem:[#allocation37_spill] sm:$0xff] }
 0x218   :  { %2101 = vrot.lane.b32.xlu1 %v2084_v35, %s2574_s22  ;;  %2099 = vrot.lane.b32.xlu0 %v2083_v36, %s2574_s22  ;;  %v1543_v29 = vadd.f32 %v4476_v42, %v1493_v61  ;;  %v2088_v35 = vmul.f32 %v4626_v52, %v4565_v9  ;;  %v1619_v54 = vadd.f32 %v4547_v4, %v1569_v45  ;;  %v4657_v42 = vld [vmem:[%s4828_s1 + $0x229] sm:$0xff]  ;;  %v2132_v18 = vstv %s4633_s17  ;;  %s2549_s17 = scalar_lea.vmem %s2323_s0, 2048 }
 0x219   :  { %v1572_v36 = vadd.f32 %v1564_v5, %v1544_v38  ;;  %v2090_v12 = vmul.f32 %v4652_v25, %v4565_v9  ;;  %v2089_v4 = vmul.f32 %v4657_v42, %v4565_v9  ;;  %v1684_v31 = vstv %s2464_s18  ;;  %p2550_p5 = scmp.ne.s32.totalorder %s2323_s0, %s2549_s17  ;;  %p2555_p7 = scmp.lt.s32.totalorder %s2549_s17, %s2549_s17 }
 0x21a   :  { %v1646_v33 = vpop.permute.xlu1 %1645  ;;  %v1644_v26 = vpop.permute.xlu0 %1643  ;;  %v1571_v43 = vadd.f32 %v1563_v59, %v1543_v29  ;;  %v2134_v6 = vmul.f32 %v4562_v28, %v2132_v18  ;;  %v2133_v32 = vmul.f32 %v4572_v44, %v2132_v18  ;;  %v1686_v9 = vmul.f32 %v5108_v48, %v1684_v31 }
 0x21b   :  { %v1668_v20 = vadd.f32 %v1646_v33, %v1618_v57  ;;  %v1667_v16 = vadd.f32 %v1644_v26, %v1617_v37  ;;  %v1622_v15 = vadd.f32 %v4578_v22, %v1572_v36  ;;  %v2136_v10 = vmul.f32 %v4601_v58, %v2132_v18  ;;  %p2556_p8 = por %p2555_p7, %p2554_p6 }
 0x21c   :  { %2105 = vrot.lane.b32.xlu1 %v2086_v7, %s2574_s22  ;;  %2103 = vrot.lane.b32.xlu0 %v2085_v13, %s2574_s22  ;;  %v1621_v17 = vadd.f32 %v4580_v11, %v1571_v43  ;;  %v5109_v7 = vld [vmem:[#allocation16_spill] sm:$0xff]  ;;  %v2135_v61 = vmul.f32 %v4606_v62, %v2132_v18  ;;  %v1688_v45 = vmul.f32 %v5110_v8, %v1684_v31  ;;  %v4728_v8 = vld [vmem:[%s4828_s1 + $0x212] sm:$0xff] }
 0x21d   :  { %v1685_v22 = vmul.f32 %v5109_v7, %v1684_v31  ;;  %v1694_v57 = vadd.f32 %v1686_v9, %v1668_v20  ;;  %v1687_v5 = vmul.f32 %v5111_v27, %v1684_v31  ;;  %v2137_v26 = vmul.f32 %v4631_v41, %v2132_v18  ;;  %v5112_v20 = vld [vmem:[#allocation13_spill] sm:$0xff]  ;;  %p2557_p9 = pnand %p2556_p8, %p2550_p5 }
 0x21e   :  { %v1650_v46 = vpop.permute.xlu1 %1649  ;;  %v1648_v49 = vpop.permute.xlu0 %1647  ;;  %v2140_v36 = vmul.f32 %v4652_v25, %v2132_v18  ;;  %v2139_v43 = vmul.f32 %v4657_v42, %v2132_v18 }
 0x21f   :  { %v1670_v47 = vadd.f32 %v1650_v46, %v1620_v0  ;;  %v1669_v55 = vadd.f32 %v1648_v49, %v1619_v54  ;;  %v1693_v37 = vadd.f32 %v1685_v22, %v1667_v16  ;;  %v1690_v16 = vmul.f32 %v5112_v20, %v1684_v31  ;;  %v4709_v22 = vld [vmem:[%s4828_s1 + $0x202] sm:$0xff] }
 0x220   :  { %2109 = vrot.lane.b32.xlu1 %v2088_v35, %s2574_s22  ;;  %2107 = vrot.lane.b32.xlu0 %v2087_v23, %s2574_s22  ;;  %v5113_v35 = vld [vmem:[#allocation25_spill] sm:$0xff] }
 0x221   :  { %v1696_v38 = vadd.f32 %v1688_v45, %v1670_v47  ;;  %v1695_v29 = vadd.f32 %v1687_v5, %v1669_v55  ;;  %v1689_v23 = vmul.f32 %v5113_v35, %v1684_v31 }
 0x222   :  { %v1654_v63 = vpop.permute.xlu1 %1653  ;;  %v1652_v21 = vpop.permute.xlu0 %1651 }
 0x223   :  { %v1672_v39 = vadd.f32 %v1654_v63, %v1622_v15  ;;  %v1671_v53 = vadd.f32 %v1652_v21, %v1621_v17  ;;  %v5115_v15 = vld [vmem:[#allocation21_spill] sm:$0xff]  ;;  %v2208_v21 = vstv %s2509_s24 }
 0x224   :  { %2113 = vrot.lane.b32.xlu1 %v2090_v12, %s2574_s22  ;;  %2111 = vrot.lane.b32.xlu0 %v2089_v4, %s2574_s22  ;;  %v5114_v12 = vld [vmem:[#allocation26_spill] sm:$0xff]  ;;  %v1691_v17 = vmul.f32 %v5115_v15, %v1684_v31 }
 0x225   :  { %v1692_v4 = vmul.f32 %v5114_v12, %v1684_v31  ;;  %v1698_v47 = vadd.f32 %v1690_v16, %v1672_v39  ;;  %v1697_v55 = vadd.f32 %v1689_v23, %v1671_v53  ;;  %v4695_v63 = vld [vmem:[%s4828_s1 + $0x1ea] sm:$0xff]  ;;  %v2258_v23 = vstv %s2510_s9 }
 0x226   :  { %v1658_v13 = vpop.permute.xlu1 %1657  ;;  %v1656_v11 = vpop.permute.xlu0 %1655  ;;  %v2210_v31 = vmul.f32 %v4695_v63, %v2208_v21 }
 0x227   :  { %v1674_v24 = vadd.f32 %v1658_v13, %v1624_v3  ;;  %v1673_v34 = vadd.f32 %v1656_v11, %v1623_v1  ;;  %v2138_v1 = vmul.f32 %v4626_v52, %v2132_v18  ;;  %v4714_v13 = vld [vmem:[%s4828_s1 + $0x1fa] sm:$0xff] }
 0x228   :  { %2151 = vrot.lane.b32.xlu1 %v2134_v6, %s2575_s4  ;;  %2149 = vrot.lane.b32.xlu0 %v2133_v32, %s2575_s4  ;;  %v4700_v6 = vld [vmem:[%s4828_s1 + $0x1e2] sm:$0xff] }
 0x229   :  { %v2209_v39 = vmul.f32 %v4700_v6, %v2208_v21  ;;  %v1700_v53 = vadd.f32 %v1692_v4, %v1674_v24  ;;  %v1699_v7 = vadd.f32 %v1691_v17, %v1673_v34  ;;  %v2212_v24 = vmul.f32 %v4709_v22, %v2208_v21  ;;  %v5118_v4 = vld [vmem:[#allocation42_spill] sm:$0xff] }
 0x22a   :  { %v1722_v60 = vpop.permute.xlu1 %1721  ;;  %v1720_v59 = vpop.permute.xlu0 %1719  ;;  %v2211_v34 = vmul.f32 %v4714_v13, %v2208_v21 }
 0x22b   :  { %v1744_v33 = vadd.f32 %v1722_v60, %v1694_v57  ;;  %v1743_v3 = vadd.f32 %v1720_v59, %v1693_v37  ;;  %v4723_v37 = vld [vmem:[%s4828_s1 + $0x21a] sm:$0xff] }
 0x22c   :  { %2155 = vrot.lane.b32.xlu1 %v2136_v10, %s2575_s4  ;;  %2153 = vrot.lane.b32.xlu0 %v2135_v61, %s2575_s4  ;;  %v2214_v59 = vmul.f32 %v4723_v37, %v2208_v21 }
 0x22e   :  { %v1726_v0 = vpop.permute.xlu1 %1725  ;;  %v1724_v54 = vpop.permute.xlu0 %1723 }
 0x22f   :  { %v1746_v46 = vadd.f32 %v1726_v0, %v1696_v38  ;;  %v1745_v49 = vadd.f32 %v1724_v54, %v1695_v29  ;;  %v4742_v38 = vld [vmem:[%s4828_s1 + $0x22a] sm:$0xff] }
 0x230   :  { %2159 = vrot.lane.b32.xlu1 %v2138_v1, %s2575_s4  ;;  %2157 = vrot.lane.b32.xlu0 %v2137_v26, %s2575_s4  ;;  %v2213_v1 = vmul.f32 %v4728_v8, %v2208_v21  ;;  %v4737_v26 = vld [vmem:[%s4828_s1 + $0x232] sm:$0xff]  ;;  %5117 = vst [vmem:[#allocation66_spill] sm:$0xff] %v4742_v38  ;;  %v2215_v35 = vmul.f32 %v4742_v38, %v2208_v21  ;;  %s2486_s1 = sld [smem:[#allocation3 + $0x12]] }
 0x231   :  { %5116 = vst [vmem:[#allocation65_spill] sm:$0xff] %v4737_v26  ;;  %v2216_v16 = vmul.f32 %v4737_v26, %v2208_v21 }
 0x232   :  { %v1730_v32 = vpop.permute.xlu1 %1729  ;;  %v1728_v48 = vpop.permute.xlu0 %1727 }
 0x233   :  { %v1748_v18 = vadd.f32 %v1730_v32, %v1698_v47  ;;  %v1747_v9 = vadd.f32 %v1728_v48, %v1697_v55  ;;  %v5119_v55 = vld [vmem:[#allocation29_spill] sm:$0xff] }
 0x234   :  { %2163 = vrot.lane.b32.xlu1 %v2140_v36, %s2575_s4  ;;  %2161 = vrot.lane.b32.xlu0 %v2139_v43, %s2575_s4  ;;  %v1810_v36 = vstv %s2475_s10 }
 0x235   :  { %v1812_v47 = vmul.f32 %v5118_v4, %v1810_v36  ;;  %v1811_v15 = vmul.f32 %v5119_v55, %v1810_v36  ;;  %v5125_v55 = vld [vmem:[#allocation34_spill] sm:$0xff] }
 0x236   :  { %v1734_v11 = vpop.permute.xlu1 %1733  ;;  %v1732_v10 = vpop.permute.xlu0 %1731 }
 0x237   :  { %v1750_v61 = vadd.f32 %v1734_v11, %v1700_v53  ;;  %v1749_v57 = vadd.f32 %v1732_v10, %v1699_v7  ;;  %v5120_v53 = vld [vmem:[#allocation48_spill] sm:$0xff]  ;;  %v5121_v11 = vld [vmem:[#allocation27_spill] sm:$0xff] }
 0x238   :  { %2227 = vrot.lane.b32.xlu1 %v2210_v31, %s2574_s22  ;;  %2225 = vrot.lane.b32.xlu0 %v2209_v39, %s2574_s22  ;;  %v1814_v7 = vmul.f32 %v5120_v53, %v1810_v36  ;;  %v1813_v10 = vmul.f32 %v5121_v11, %v1810_v36 }
 0x23a   :  { %v1772_v45 = vpop.permute.xlu1 %1771  ;;  %v1770_v27 = vpop.permute.xlu0 %1769 }
 0x23b   :  { %v1794_v5 = vadd.f32 %v1772_v45, %v1744_v33  ;;  %v1793_v60 = vadd.f32 %v1770_v27, %v1743_v3 }
 0x23c   :  { %2231 = vrot.lane.b32.xlu1 %v2212_v24, %s2574_s22  ;;  %2229 = vrot.lane.b32.xlu0 %v2211_v34, %s2574_s22 }
 0x23d   :  { %v1820_v31 = vadd.f32 %v1812_v47, %v1794_v5  ;;  %v1819_v39 = vadd.f32 %v1811_v15, %v1793_v60  ;;  %v5122_v5 = vld [vmem:[#allocation43_spill] sm:$0xff]  ;;  %v1817_v15 = vmul.f32 %v5125_v55, %v1810_v36 }
 0x23e   :  { %v1776_v33 = vpop.permute.xlu1 %1775  ;;  %v1774_v3 = vpop.permute.xlu0 %1773  ;;  %v1816_v60 = vmul.f32 %v5122_v5, %v1810_v36  ;;  %v1938_v5 = vstv %s2486_s1 }
 0x23f   :  { %v1796_v29 = vadd.f32 %v1776_v33, %v1746_v46  ;;  %v1795_v20 = vadd.f32 %v1774_v3, %v1745_v49  ;;  %v2260_v46 = vmul.f32 %v4695_v63, %v2258_v23  ;;  %v2259_v49 = vmul.f32 %v4700_v6, %v2258_v23  ;;  %v5123_v33 = vld [vmem:[#allocation44_spill] sm:$0xff] }
 0x240   :  { %2235 = vrot.lane.b32.xlu1 %v2214_v59, %s2574_s22  ;;  %2233 = vrot.lane.b32.xlu0 %v2213_v1, %s2574_s22  ;;  %v1815_v3 = vmul.f32 %v5123_v33, %v1810_v36 }
 0x241   :  { %v1822_v59 = vadd.f32 %v1814_v7, %v1796_v29  ;;  %v1821_v1 = vadd.f32 %v1813_v10, %v1795_v20  ;;  %v5124_v29 = vld [vmem:[#allocation33_spill] sm:$0xff] }
 0x242   :  { %v1780_v0 = vpop.permute.xlu1 %1779  ;;  %v1778_v54 = vpop.permute.xlu0 %1777  ;;  %v1818_v20 = vmul.f32 %v5124_v29, %v1810_v36 }
 0x243   :  { %v1798_v43 = vadd.f32 %v1780_v0, %v1748_v18  ;;  %v1797_v12 = vadd.f32 %v1778_v54, %v1747_v9  ;;  %v2262_v18 = vmul.f32 %v4709_v22, %v2258_v23  ;;  %v2261_v9 = vmul.f32 %v4714_v13, %v2258_v23 }
 0x244   :  { %2239 = vrot.lane.b32.xlu1 %v2216_v16, %s2574_s22  ;;  %2237 = vrot.lane.b32.xlu0 %v2215_v35, %s2574_s22  ;;  %s2497_s22 = sld [smem:[#allocation3 + $0x15]] }
 0x245   :  { %v1824_v4 = vadd.f32 %v1816_v60, %v1798_v43  ;;  %v1823_v47 = vadd.f32 %v1815_v3, %v1797_v12 }
 0x246   :  { %v1784_v17 = vpop.permute.xlu1 %1783  ;;  %v1782_v21 = vpop.permute.xlu0 %1781 }
 0x247   :  { %v1800_v32 = vadd.f32 %v1784_v17, %v1750_v61  ;;  %v1799_v48 = vadd.f32 %v1782_v21, %v1749_v57  ;;  %v2264_v61 = vmul.f32 %v4723_v37, %v2258_v23  ;;  %v2263_v57 = vmul.f32 %v4728_v8, %v2258_v23 }
 0x248   :  { %2277 = vrot.lane.b32.xlu1 %v2260_v46, %s2575_s4  ;;  %2275 = vrot.lane.b32.xlu0 %v2259_v49, %s2575_s4  ;;  %v2266_v46 = vmul.f32 %v4737_v26, %v2258_v23  ;;  %v2265_v49 = vmul.f32 %v4742_v38, %v2258_v23 }
 0x24a   :  { %v1848_v24 = vpop.permute.xlu1 %1847  ;;  %v1846_v34 = vpop.permute.xlu0 %1845 }
 0x24b   :  { %v1870_v45 = vadd.f32 %v1848_v24, %v1820_v31  ;;  %v1869_v27 = vadd.f32 %v1846_v34, %v1819_v39  ;;  %v1826_v31 = vadd.f32 %v1818_v20, %v1800_v32  ;;  %v1825_v39 = vadd.f32 %v1817_v15, %v1799_v48 }
 0x24c   :  { %2281 = vrot.lane.b32.xlu1 %v2262_v18, %s2575_s4  ;;  %2279 = vrot.lane.b32.xlu0 %v2261_v9, %s2575_s4  ;;  %v1940_v32 = vmul.f32 %v4301_v51, %v1938_v5  ;;  %v1939_v48 = vmul.f32 %v4308_v56, %v1938_v5  ;;  %v1944_v51 = vmul.f32 %v5079_v50, %v1938_v5 }
 0x24d   :  { %v1943_v56 = vmul.f32 %v5083_v14, %v1938_v5 }
 0x24e   :  { %v1852_v16 = vpop.permute.xlu1 %1851  ;;  %v1850_v35 = vpop.permute.xlu0 %1849 }
 0x24f   :  { %v1872_v0 = vadd.f32 %v1852_v16, %v1822_v59  ;;  %v1871_v54 = vadd.f32 %v1850_v35, %v1821_v1 }
 0x250   :  { %2285 = vrot.lane.b32.xlu1 %v2264_v61, %s2575_s4  ;;  %2283 = vrot.lane.b32.xlu0 %v2263_v57, %s2575_s4 }
 0x252   :  { %v1856_v17 = vpop.permute.xlu1 %1855  ;;  %v1854_v21 = vpop.permute.xlu0 %1853 }
 0x253   :  { %v1874_v18 = vadd.f32 %v1856_v17, %v1824_v4  ;;  %v1873_v9 = vadd.f32 %v1854_v21, %v1823_v47 }
 0x254   :  { %2289 = vrot.lane.b32.xlu1 %v2266_v46, %s2575_s4  ;;  %2287 = vrot.lane.b32.xlu0 %v2265_v49, %s2575_s4  ;;  %s2508_s4 = sld [smem:[#allocation3 + $0x18]] }
 0x256   :  { %v1860_v53 = vpop.permute.xlu1 %1859  ;;  %v1858_v7 = vpop.permute.xlu0 %1857 }
 0x257   :  { %v1876_v11 = vadd.f32 %v1860_v53, %v1826_v31  ;;  %v1875_v23 = vadd.f32 %v1858_v7, %v1825_v39 }
 0x25a   :  { %v1898_v43 = vpop.permute.xlu1 %1897  ;;  %v1896_v12 = vpop.permute.xlu0 %1895 }
 0x25b   :  { %v1920_v10 = vadd.f32 %v1898_v43, %v1870_v45  ;;  %v1919_v24 = vadd.f32 %v1896_v12, %v1869_v27  ;;  %v1942_v27 = vmul.f32 %v4325_v40, %v1938_v5  ;;  %v1946_v40 = vmul.f32 %v4409_v2, %v1938_v5 }
 0x25d   :  { %v1948_v49 = vadd.f32 %v1940_v32, %v1920_v10  ;;  %v1947_v45 = vadd.f32 %v1939_v48, %v1919_v24 }
 0x25e   :  { %v1902_v36 = vpop.permute.xlu1 %1901  ;;  %v1900_v34 = vpop.permute.xlu0 %1899 }
 0x25f   :  { %v1922_v61 = vadd.f32 %v1902_v36, %v1872_v0  ;;  %v1921_v57 = vadd.f32 %v1900_v34, %v1871_v54  ;;  %v1941_v0 = vmul.f32 %v4330_v19, %v1938_v5  ;;  %v1945_v19 = vmul.f32 %v4414_v30, %v1938_v5 }
 0x261   :  { %v1950_v20 = vadd.f32 %v1942_v27, %v1922_v61  ;;  %v1949_v55 = vadd.f32 %v1941_v0, %v1921_v57 }
 0x262   :  { %v1906_v59 = vpop.permute.xlu1 %1905  ;;  %v1904_v1 = vpop.permute.xlu0 %1903 }
 0x263   :  { %v1924_v60 = vadd.f32 %v1906_v59, %v1874_v18  ;;  %v1923_v33 = vadd.f32 %v1904_v1, %v1873_v9 }
 0x265   :  { %v1952_v9 = vadd.f32 %v1944_v51, %v1924_v60  ;;  %v1951_v31 = vadd.f32 %v1943_v56, %v1923_v33 }
 0x266   :  { %v1910_v3 = vpop.permute.xlu1 %1909  ;;  %v1908_v16 = vpop.permute.xlu0 %1907 }
 0x267   :  { %v1926_v35 = vadd.f32 %v1910_v3, %v1876_v11  ;;  %v1925_v46 = vadd.f32 %v1908_v16, %v1875_v23 }
 0x269   :  { %v1954_v23 = vadd.f32 %v1946_v40, %v1926_v35  ;;  %v1953_v43 = vadd.f32 %v1945_v19, %v1925_v46  ;;  %v2190_v19 = vstv %s2508_s4 }
 0x26a   :  { %v1976_v54 = vpop.permute.xlu1 %1975  ;;  %v1974_v4 = vpop.permute.xlu0 %1973 }
 0x26b   :  { %v1998_v47 = vadd.f32 %v1976_v54, %v1948_v49  ;;  %v1997_v29 = vadd.f32 %v1974_v4, %v1947_v45 }
 0x26e   :  { %v1980_v15 = vpop.permute.xlu1 %1979  ;;  %v1978_v17 = vpop.permute.xlu0 %1977 }
 0x26f   :  { %v2000_v21 = vadd.f32 %v1980_v15, %v1950_v20  ;;  %v1999_v18 = vadd.f32 %v1978_v17, %v1949_v55  ;;  %v2064_v20 = vstv %s2497_s22 }
 0x270   :  { %v2066_v17 = vmul.f32 %v4562_v28, %v2064_v20  ;;  %v2067_v40 = vmul.f32 %v4606_v62, %v2064_v20 }
 0x272   :  { %v1984_v39 = vpop.permute.xlu1 %1983  ;;  %v1982_v53 = vpop.permute.xlu0 %1981 }
 0x273   :  { %v2002_v7 = vadd.f32 %v1984_v39, %v1952_v9  ;;  %v2001_v11 = vadd.f32 %v1982_v53, %v1951_v31  ;;  %v2065_v9 = vmul.f32 %v4572_v44, %v2064_v20  ;;  %v2068_v31 = vmul.f32 %v4601_v58, %v2064_v20 }
 0x274   :  { %v2192_v44 = vmul.f32 %v4695_v63, %v2190_v19  ;;  %v2191_v58 = vmul.f32 %v4700_v6, %v2190_v19 }
 0x276   :  { %v1988_v12 = vpop.permute.xlu1 %1987  ;;  %v1986_v50 = vpop.permute.xlu0 %1985 }
 0x277   :  { %v4782_v10 = vadd.f32 %v1988_v12, %v1954_v23  ;;  %v4784_v14 = vadd.f32 %v1986_v50, %v1953_v43 }
 0x27a   :  { %v2026_v24 = vpop.permute.xlu1 %2025  ;;  %v2024_v36 = vpop.permute.xlu0 %2023 }
 0x27b   :  { %v2048_v56 = vadd.f32 %v2026_v24, %v1998_v47  ;;  %v2047_v15 = vadd.f32 %v2024_v36, %v1997_v29  ;;  %v2070_v47 = vmul.f32 %v4626_v52, %v2064_v20  ;;  %v2069_v29 = vmul.f32 %v4631_v41, %v2064_v20 }
 0x27c   :  { %v2194_v41 = vmul.f32 %v4709_v22, %v2190_v19  ;;  %v2196_v22 = vmul.f32 %v4723_v37, %v2190_v19 }
 0x27d   :  { %v2074_v12 = vadd.f32 %v2066_v17, %v2048_v56  ;;  %v2073_v50 = vadd.f32 %v2065_v9, %v2047_v15 }
 0x27e   :  { %v2030_v34 = vpop.permute.xlu1 %2029  ;;  %v2028_v61 = vpop.permute.xlu0 %2027 }
 0x27f   :  { %v2050_v23 = vadd.f32 %v2030_v34, %v2000_v21  ;;  %v2049_v43 = vadd.f32 %v2028_v61, %v1999_v18  ;;  %v2072_v34 = vmul.f32 %v4652_v25, %v2064_v20  ;;  %v2071_v61 = vmul.f32 %v4657_v42, %v2064_v20 }
 0x281   :  { %v2076_v38 = vadd.f32 %v2068_v31, %v2050_v23  ;;  %v2075_v26 = vadd.f32 %v2067_v40, %v2049_v43 }
 0x282   :  { %v2034_v57 = vpop.permute.xlu1 %2033  ;;  %v2032_v2 = vpop.permute.xlu0 %2031 }
 0x283   :  { %v2052_v28 = vadd.f32 %v2034_v57, %v2002_v7  ;;  %v2051_v24 = vadd.f32 %v2032_v2, %v2001_v11  ;;  %v2193_v7 = vmul.f32 %v4714_v13, %v2190_v19  ;;  %v2195_v13 = vmul.f32 %v4728_v8, %v2190_v19 }
 0x285   :  { %v2078_v11 = vadd.f32 %v2070_v47, %v2052_v28  ;;  %v2077_v57 = vadd.f32 %v2069_v29, %v2051_v24 }
 0x286   :  { %v2038_v59 = vpop.permute.xlu1 %2037  ;;  %v2036_v30 = vpop.permute.xlu0 %2035 }
 0x287   :  { %v2054_v63 = vadd.f32 %v2038_v59, %v4782_v10  ;;  %v2053_v6 = vadd.f32 %v2036_v30, %v4784_v14 }
 0x289   :  { %v2079_v10 = vadd.f32 %v2071_v61, %v2053_v6 }
 0x28a   :  { %v2102_v1 = vpop.permute.xlu1 %2101  ;;  %v2100_v5 = vpop.permute.xlu0 %2099 }
 0x28e   :  { %v2106_v60 = vpop.permute.xlu1 %2105  ;;  %v2104_v33 = vpop.permute.xlu0 %2103 }
 0x28f   :  { %v2125_v52 = vadd.f32 %v2104_v33, %v2075_v26 }
 0x292   :  { %v2110_v32 = vpop.permute.xlu1 %2109  ;;  %v2108_v48 = vpop.permute.xlu0 %2107 }
 0x293   :  { %v2127_v42 = vadd.f32 %v2108_v48, %v2077_v57 }
 0x296   :  { %v4786_v3 = vpop.permute.xlu1 %2113  ;;  %v4788_v16 = vpop.permute.xlu0 %2111 }
 0x29a   :  { %v2152_v35 = vpop.permute.xlu1 %2151  ;;  %v2150_v46 = vpop.permute.xlu0 %2149 }
 0x29e   :  { %v2156_v49 = vpop.permute.xlu1 %2155  ;;  %v2154_v45 = vpop.permute.xlu0 %2153 }
 0x2a2   :  { %v2160_v27 = vpop.permute.xlu1 %2159  ;;  %v2158_v0 = vpop.permute.xlu0 %2157 }
 0x2a3   :  { %v2177_v14 = vadd.f32 %v2158_v0, %v2127_v42 }
 0x2a5   :  { %v2203_v8 = vadd.f32 %v2195_v13, %v2177_v14 }
 0x2a6   :  { %v4790_v54 = vpop.permute.xlu1 %2163  ;;  %v4792_v4 = vpop.permute.xlu0 %2161 }
 0x2a7   :  { %5126 = vst [vmem:[#allocation61_spill] sm:$0xff] %v4790_v54  ;;  %5127 = vst [vmem:[#allocation62_spill] sm:$0xff] %v4792_v4  ;;  %v2124_v4 = vadd.f32 %v2102_v1, %v2074_v12  ;;  %v2123_v54 = vadd.f32 %v2100_v5, %v2073_v50  ;;  %v2126_v1 = vadd.f32 %v2106_v60, %v2076_v38 }
 0x2a8   :  { %v2080_v60 = vadd.f32 %v2072_v34, %v2054_v63 }
 0x2a9   :  { %v2174_v21 = vadd.f32 %v2152_v35, %v2124_v4  ;;  %v2173_v18 = vadd.f32 %v2150_v46, %v2123_v54  ;;  %v2176_v35 = vadd.f32 %v2156_v49, %v2126_v1  ;;  %v2175_v46 = vadd.f32 %v2154_v45, %v2125_v52 }
 0x2aa   :  { %v2228_v55 = vpop.permute.xlu1 %2227  ;;  %v2226_v51 = vpop.permute.xlu0 %2225  ;;  %v2128_v4 = vadd.f32 %v2110_v32, %v2078_v11  ;;  %v2130_v15 = vadd.f32 %v4786_v3, %v2080_v60  ;;  %v2129_v32 = vadd.f32 %v4788_v16, %v2079_v10 }
 0x2ab   :  { %v2200_v54 = vadd.f32 %v2192_v44, %v2174_v21  ;;  %v2199_v25 = vadd.f32 %v2191_v58, %v2173_v18  ;;  %v2202_v20 = vadd.f32 %v2194_v41, %v2176_v35  ;;  %v2201_v56 = vadd.f32 %v2193_v7, %v2175_v46 }
 0x2ac   :  { %v2178_v59 = vadd.f32 %v2160_v27, %v2128_v4  ;;  %v5128_v27 = vld [vmem:[#allocation65_spill] sm:$0xff] }
 0x2ad   :  { %v2250_v38 = vadd.f32 %v2228_v55, %v2200_v54  ;;  %v2249_v26 = vadd.f32 %v2226_v51, %v2199_v25  ;;  %v2198_v0 = vmul.f32 %v5128_v27, %v2190_v19  ;;  %v5129_v51 = vld [vmem:[#allocation66_spill] sm:$0xff] }
 0x2ae   :  { %v2232_v39 = vpop.permute.xlu1 %2231  ;;  %v2230_v53 = vpop.permute.xlu0 %2229  ;;  %v2204_v37 = vadd.f32 %v2196_v22, %v2178_v59  ;;  %v2197_v17 = vmul.f32 %v5129_v51, %v2190_v19  ;;  %v5130_v40 = vld [vmem:[#allocation61_spill] sm:$0xff]  ;;  %v5131_v43 = vld [vmem:[#allocation62_spill] sm:$0xff] }
 0x2af   :  { %v2252_v48 = vadd.f32 %v2232_v39, %v2202_v20  ;;  %v2251_v55 = vadd.f32 %v2230_v53, %v2201_v56  ;;  %v2180_v23 = vadd.f32 %v5130_v40, %v2130_v15  ;;  %v2179_v3 = vadd.f32 %v5131_v43, %v2129_v32 }
 0x2b1   :  { %v2206_v29 = vadd.f32 %v2198_v0, %v2180_v23  ;;  %v2205_v28 = vadd.f32 %v2197_v17, %v2179_v3 }
 0x2b2   :  { %v2236_v62 = vpop.permute.xlu1 %2235  ;;  %v2234_v36 = vpop.permute.xlu0 %2233 }
 0x2b3   :  { %v2254_v39 = vadd.f32 %v2236_v62, %v2204_v37  ;;  %v2253_v53 = vadd.f32 %v2234_v36, %v2203_v8 }
 0x2b6   :  { %v2240_v2 = vpop.permute.xlu1 %2239  ;;  %v2238_v5 = vpop.permute.xlu0 %2237 }
 0x2b7   :  { %v2256_v44 = vadd.f32 %v2240_v2, %v2206_v29  ;;  %v2255_v58 = vadd.f32 %v2238_v5, %v2205_v28 }
 0x2ba   :  { %v2278_v30 = vpop.permute.xlu1 %2277  ;;  %v2276_v33 = vpop.permute.xlu0 %2275 }
 0x2bb   :  { %v2300_v49 = vadd.f32 %v2278_v30, %v2250_v38  ;;  %v2299_v45 = vadd.f32 %v2276_v33, %v2249_v26 }
 0x2bd   :  { %2310 = vst.msk [vmem:[#allocation4 + $0x48] sm:$0xff] %vm1158_vm0, %v2300_v49  ;;  %2309 = vst.msk [vmem:[#allocation4 + $0x40] sm:$0xff] %vm1158_vm0, %v2299_v45 }
 0x2be   :  { %v2282_v9 = vpop.permute.xlu1 %2281  ;;  %v2280_v31 = vpop.permute.xlu0 %2279 }
 0x2bf   :  { %v2302_v12 = vadd.f32 %v2282_v9, %v2252_v48  ;;  %v2301_v16 = vadd.f32 %v2280_v31, %v2251_v55 }
 0x2c1   :  { %2312 = vst.msk [vmem:[#allocation4 + $0x58] sm:$0xff] %vm1158_vm0, %v2302_v12  ;;  %2311 = vst.msk [vmem:[#allocation4 + $0x50] sm:$0xff] %vm1158_vm0, %v2301_v16 }
 0x2c2   :  { %v2286_v50 = vpop.permute.xlu1 %2285  ;;  %v2284_v47 = vpop.permute.xlu0 %2283 }
 0x2c3   :  { %v2304_v24 = vadd.f32 %v2286_v50, %v2254_v39  ;;  %v2303_v19 = vadd.f32 %v2284_v47, %v2253_v53 }
 0x2c5   :  { %2314 = vst.msk [vmem:[#allocation4 + $0x68] sm:$0xff] %vm1158_vm0, %v2304_v24  ;;  %2313 = vst.msk [vmem:[#allocation4 + $0x60] sm:$0xff] %vm1158_vm0, %v2303_v19 }
 0x2c6   :  { %v2290_v62 = vpop.permute.xlu1 %2289  ;;  %v2288_v36 = vpop.permute.xlu0 %2287 }
 0x2c7   :  { %v2306_v21 = vadd.f32 %v2290_v62, %v2256_v44  ;;  %v2305_v18 = vadd.f32 %v2288_v36, %v2255_v58 }
 0x2c9   :  { %2316 = vst.msk [vmem:[#allocation4 + $0x78] sm:$0xff] %vm1158_vm0, %v2306_v21  ;;  %2315 = vst.msk [vmem:[#allocation4 + $0x70] sm:$0xff] %vm1158_vm0, %v2305_v18 }
 0x2ca   :  { %2560 = shalt.err (!%p2557_p9)
}
 0x2cb   :  { %s2577_s18 = smov 128   ;;  %s2578_s19 = smov 8  }
 0x2cc   :  { %2328 = dma.vmem_to_hbm [thread:$0]  %s2323_s0, 2048, %s4829_s2, [#allocation5], %s2577_s18, %s2577_s18, %s2578_s19  }
 0x2cd   :  { %2571 = dma.done.wait [#allocation5], 2048  }
 0x2ce   :  { %2572 = vsyncadd [#allocation5], 4294965248 }
 0x2cf   :  { %2332 = vsyncpa [#allocation5], 1 }

</bundles_post_ra>
